<compile_context>
chip_gen: v6e
topology: v6e:2x2x1
jax: 0.10.0
libtpu: 0.0.40
codegen_flags: <defaults>
</compile_context>

<pallas_src>
import functools
import math

import jax
import jax.numpy as jnp
import numpy as np
from jax.experimental import pallas as pl
from jax.experimental.pallas import tpu as pltpu


def _vertical_attn_kernel(x_ref, w_ref, b_ref, mask_ref, keymask_ref, o_ref,
                          ctx_ref, *, num_heads, head_size):
    """One grid step = one batch element x S_BLK fused sequence positions.

    x_ref      : (1, R, S_BLK, H)  activations (original [B,R,S,H] layout), f32
    w_ref      : (H, 3H)           fused [Wq*scale | Wk | Wv], transposed, bf16
    b_ref      : (1, 3H)           fused bias (bq already scaled), f32
    mask_ref   : (M, M)            static block-diagonal -1e9 penalty, f32
    keymask_ref: (1, 1, M)         per-batch additive key mask expanded to M
    o_ref      : (1, R, S_BLK, H)
    ctx_ref    : (M, H) f32        VMEM scratch for the merged-head context
    """
    _, R, S_BLK, H = x_ref.shape
    M = R * S_BLK
    hd = head_size

    # ---- fused QKV projection: one bf16 [M, H] @ [H, 3H] MXU matmul --------
    x2d = x_ref[0].reshape(M, H).astype(jnp.bfloat16)             # [M, H]
    qkv = jnp.dot(x2d, w_ref[...],
                  preferred_element_type=jnp.float32)             # f32 accum
    qkv = qkv + b_ref[...]                                        # [M, 3H] f32

    # ---- additive mask shared by all heads ----------------------------------
    # Static block-diagonal penalty (tokens at different sequence positions
    # never attend to each other) + per-batch key-row mask.
    add_mask = mask_ref[...] + keymask_ref[0]                     # [M, M] f32

    for h in range(num_heads):                                    # static unroll
        q_h = qkv[:, h * hd:(h + 1) * hd].astype(jnp.bfloat16)            # [M, hd]
        k_h = qkv[:, H + h * hd:H + (h + 1) * hd].astype(jnp.bfloat16)    # [M, hd]
        v_h = qkv[:, 2 * H + h * hd:2 * H + (h + 1) * hd].astype(jnp.bfloat16)

        # q @ k^T without materializing a transpose (contract last dims).
        scores = jax.lax.dot_general(
            q_h, k_h, (((1,), (1,)), ((), ())),
            preferred_element_type=jnp.float32)                   # [M, M] f32
        scores = scores + add_mask

        # numerically-stable softmax over the key axis (f32 elementwise)
        scores = scores - jnp.max(scores, axis=-1, keepdims=True)
        p = jnp.exp(scores)                                       # EUP
        denom = jnp.sum(p, axis=-1, keepdims=True)                # [M, 1]
        inv = pl.reciprocal(denom, approx=True)                   # EUP slot
        inv = inv * (2.0 - denom * inv)                           # 1 NR step

        # PV matmul on unnormalized probs (bf16 MXU), normalize afterwards
        pv = jnp.dot(p.astype(jnp.bfloat16), v_h,
                     preferred_element_type=jnp.float32)          # [M, hd]
        ctx_ref[:, h * hd:(h + 1) * hd] = pv * inv                # scratch write

    # Single lane-dense store of the full block.
    o_ref[0] = ctx_ref[...].reshape(R, S_BLK, H).astype(o_ref.dtype)


def _pick_s_block(S, R, target_m=256):
    """Pick an S-tile that divides S, is a multiple of 8 (or == S), and makes
    M = R * s_block lane-dense (multiple of 128) when possible, biggest M that
    fits the compute-tile budget otherwise."""
    cands = [d for d in range(1, S + 1)
             if S % d == 0 and (d % 8 == 0 or d == S)]

    def rank(d):
        m = R * d
        return (m % 128 == 0,                     # prefer lane-dense M
                m <= target_m,                    # prefer within the budget
                m if m <= target_m else -m)       # biggest fit / smallest overshoot

    return max(cands, key=rank)


def prepare_vertical_attention_params(params, num_heads):
    """One-time parameter packing (hoist out of the per-call path).

    Returns (w_qkv [H, 3H] bf16, b_qkv [1, 3H] f32) with the 1/sqrt(hd) scale
    folded into the query weight/bias, pre-transposed so y = x @ W + b matches
    torch's x @ W.T + b."""
    H = params["wq"].shape[0]
    hd = H // num_heads
    scale = 1.0 / math.sqrt(hd)
    w_qkv = jnp.concatenate(
        [params["wq"].T * scale, params["wk"].T, params["wv"].T],
        axis=1).astype(jnp.bfloat16)                                   # [H, 3H]
    b_qkv = jnp.concatenate(
        [params["bq"] * scale, params["bk"], params["bv"]]
    ).reshape(1, 3 * H).astype(jnp.float32)                            # [1, 3H]
    return w_qkv, b_qkv


def vertical_self_attention(hidden_states, attention_mask, params, num_heads,
                            s_block=None, prepared_qkv=None):
    """hidden_states: [B, R, S, H] float32.
    attention_mask: additive mask broadcastable to [B, 1, 1, 1, R]
    (per-batch key-row mask, as used by TaBERT's vertical attention).
    params: wq/wk/wv [H, H] (torch nn.Linear weight layout), bq/bk/bv [H].
    Returns [B, R, S, H]."""
    B, R, S, H = hidden_states.shape
    assert H % num_heads == 0
    head_size = H // num_heads

    if s_block is None:
        s_block = _pick_s_block(S, R)
    assert S % s_block == 0 and (s_block % 8 == 0 or s_block == S), s_block
    M = R * s_block

    if prepared_qkv is None:
        prepared_qkv = prepare_vertical_attention_params(params, num_heads)
    w_qkv, b_qkv = prepared_qkv

    # ---- attention mask: only per-batch key-row masks are supported --------
    am = jnp.asarray(attention_mask, dtype=jnp.float32)
    assert am.ndim <= 5, am.shape
    am5 = am.reshape((1,) * (5 - am.ndim) + am.shape)
    assert (am5.shape[1:4] == (1, 1, 1)
            and am5.shape[0] in (1, B) and am5.shape[4] in (1, R)), (
        "only per-batch key-row masks broadcastable to (B,1,1,1,R) are "
        f"supported, got {attention_mask.shape}")
    key_mask = jnp.broadcast_to(am5, (B, 1, 1, 1, R)).reshape(B, R)
    # token j = r * s_block + s  ->  key row = j // s_block
    key_mask = jnp.repeat(key_mask, s_block, axis=-1).reshape(B, 1, M)

    # ---- static block-diagonal penalty (host-side, shared by all steps) ----
    slot = np.arange(M) % s_block          # sequence-slot id of each fused token
    block_mask = jnp.asarray(
        np.where(slot[:, None] != slot[None, :], -1e9, 0.0), dtype=jnp.float32)

    # ---- VMEM budget & cost estimate ----------------------------------------
    blk_bytes = R * s_block * H * 4
    vmem_needed = (
        2 * 2 * blk_bytes                     # double-buffered in + out blocks
        + H * 3 * H * 2 + 3 * H * 4           # single-buffered bf16 W, f32 b
        + M * M * 4 + 2 * M * 4               # static mask + key mask
        + M * H * 4                           # ctx scratch
        + 6 * M * M * 4)                      # headroom for score/prob temps
    vmem_limit = int(min(max(2 * vmem_needed, 32 * 1024 * 1024),
                         100 * 1024 * 1024))

    grid_steps = B * (S // s_block)
    cost = pl.CostEstimate(
        flops=int(grid_steps * (2 * M * H * 3 * H
                                + num_heads * 4 * M * M * head_size)),
        transcendentals=int(grid_steps * num_heads * M * M),
        bytes_accessed=int(2 * B * R * S * H * 4 + H * 3 * H * 2
                           + M * M * 4 + B * M * 4),
    )

    kernel = functools.partial(
        _vertical_attn_kernel, num_heads=num_heads, head_size=head_size)

    # grid = (B, S // s_block): with B >= 2 there are always >= 2 parallel
    # steps, so both TensorCores on multi-TC chips get work.
    out = pl.pallas_call(
        kernel,
        out_shape=jax.ShapeDtypeStruct((B, R, S, H), hidden_states.dtype),
        grid_spec=pltpu.PrefetchScalarGridSpec(
            num_scalar_prefetch=0,
            grid=(B, S // s_block),
            in_specs=[
                pl.BlockSpec((1, R, s_block, H), lambda b, sb: (b, 0, sb, 0)),
                # grid-invariant operands: single-buffered, stay VMEM-resident
                pl.BlockSpec((H, 3 * H), lambda b, sb: (0, 0),
                             pipeline_mode=pl.Buffered(1)),
                pl.BlockSpec((1, 3 * H), lambda b, sb: (0, 0),
                             pipeline_mode=pl.Buffered(1)),
                pl.BlockSpec((M, M), lambda b, sb: (0, 0),
                             pipeline_mode=pl.Buffered(1)),
                pl.BlockSpec((1, 1, M), lambda b, sb: (b, 0, 0)),
            ],
            out_specs=pl.BlockSpec((1, R, s_block, H),
                                   lambda b, sb: (b, 0, sb, 0)),
            scratch_shapes=[pltpu.VMEM((M, H), jnp.float32)],
        ),
        compiler_params=pltpu.CompilerParams(
            dimension_semantics=("parallel", "parallel"),
            vmem_limit_bytes=vmem_limit),
        cost_estimate=cost,
    )(hidden_states, w_qkv, b_qkv, block_mask, key_mask)
    return out


def vertical_self_attention_reference(hidden_states, attention_mask, params,
                                      num_heads):
    """Pure-JAX mirror of the PyTorch forward (dropout = identity)."""
    B, R, S, H = hidden_states.shape
    hd = H // num_heads
    q = hidden_states @ params["wq"].T + params["bq"]
    k = hidden_states @ params["wk"].T + params["bk"]
    v = hidden_states @ params["wv"].T + params["bv"]

    def t(x):
        x = x.reshape(B, R, S, num_heads, hd)
        return jnp.transpose(x, (0, 2, 3, 1, 4))                # [B,S,nh,R,hd]

    ql, kl, vl = t(q), t(k), t(v)
    scores = jnp.einsum("bsnrd,bsnkd->bsnrk", ql, kl) / math.sqrt(hd)
    scores = scores + attention_mask
    probs = jax.nn.softmax(scores, axis=-1)
    ctx = jnp.einsum("bsnrk,bsnkd->bsnrd", probs, vl)
    ctx = jnp.transpose(ctx, (0, 3, 1, 2, 4)).reshape(B, R, S, H)
    return ctx


if __name__ == "__main__":
    # Small config: hidden=32, 4 vertical attention heads (head_size=8).
    # S=16, R=8 -> fused token count M = 128 (lane-dense).
    B, R, S, H = 2, 8, 16, 32
    NUM_HEADS = 4

    key = jax.random.PRNGKey(0)
    k_x, k_m, k_wq, k_wk, k_wv, k_bq, k_bk, k_bv = jax.random.split(key, 8)

    hidden_states = jax.random.normal(k_x, (B, R, S, H), dtype=jnp.float32)

    # Additive attention mask over key rows, broadcastable to [B, S, nh, R, R].
    row_keep = (jax.random.uniform(k_m, (B, 1, 1, 1, R)) > 0.2).astype(jnp.float32)
    attention_mask = (1.0 - row_keep) * -10000.0

    params = {
        "wq": 0.02 * jax.random.normal(k_wq, (H, H), dtype=jnp.float32),
        "wk": 0.02 * jax.random.normal(k_wk, (H, H), dtype=jnp.float32),
        "wv": 0.02 * jax.random.normal(k_wv, (H, H), dtype=jnp.float32),
        "bq": 0.02 * jax.random.normal(k_bq, (H,), dtype=jnp.float32),
        "bk": 0.02 * jax.random.normal(k_bk, (H,), dtype=jnp.float32),
        "bv": 0.02 * jax.random.normal(k_bv, (H,), dtype=jnp.float32),
    }

    out = vertical_self_attention(hidden_states, attention_mask, params, NUM_HEADS)
    out = jax.block_until_ready(out)

    ref = vertical_self_attention_reference(hidden_states, attention_mask,
                                            params, NUM_HEADS)
    # Tolerance relaxed for bf16 MXU operands (f32 accumulation) and the
    # approximate EUP reciprocal (+1 Newton step) in the softmax normalization.
    np.testing.assert_allclose(np.asarray(out), np.asarray(ref),
                               rtol=2e-2, atol=3e-3)
    assert out.shape == (B, R, S, H)
    print("KERNEL_OK")
</pallas_src>

<mosaic_0001>
module attributes {stable_mosaic.version = 11 : i64} {
  func.func @_vertical_attn_kernel(%arg0: i32, %arg1: i32, %arg2: memref<1x8x16x32xf32, #tpu.memory_space<vmem>>, %arg3: memref<32x96xbf16, #tpu.memory_space<vmem>>, %arg4: memref<1x96xf32, #tpu.memory_space<vmem>>, %arg5: memref<128x128xf32, #tpu.memory_space<vmem>>, %arg6: memref<1x1x128xf32, #tpu.memory_space<vmem>>, %arg7: memref<1x8x16x32xf32, #tpu.memory_space<vmem>>, %arg8: memref<128x32xf32, #tpu.memory_space<vmem>>) attributes {dimension_semantics = [#tpu.dimension_semantics<parallel>, #tpu.dimension_semantics<parallel>], iteration_bounds = array<i64: 2, 1>, scalar_prefetch = 0 : i64, scratch_operands = 1 : i64, tpu.core_type = #tpu.core_type<tc>, window_params = [{transform_indices = @transform_0, window_bounds = array<i64: 1, 8, 16, 32>}, {pipeline_mode = #tpu.pipeline_mode<synchronous>, transform_indices = @transform_1, window_bounds = array<i64: 32, 96>}, {pipeline_mode = #tpu.pipeline_mode<synchronous>, transform_indices = @transform_2, window_bounds = array<i64: 1, 96>}, {pipeline_mode = #tpu.pipeline_mode<synchronous>, transform_indices = @transform_3, window_bounds = array<i64: 128, 128>}, {transform_indices = @transform_4, window_bounds = array<i64: 1, 1, 128>}, {transform_indices = @transform_5, window_bounds = array<i64: 1, 8, 16, 32>}]} {
    %c0 = arith.constant 0 : index
    %c0_0 = arith.constant 0 : index
    %c0_1 = arith.constant 0 : index
    %c0_2 = arith.constant 0 : index
    %0 = vector.load %arg2[%c0, %c0_0, %c0_1, %c0_2] : memref<1x8x16x32xf32, #tpu.memory_space<vmem>>, vector<1x8x16x32xf32>
    %1 = vector.shape_cast %0 : vector<1x8x16x32xf32> to vector<8x16x32xf32>
    %2 = vector.shape_cast %1 : vector<8x16x32xf32> to vector<128x32xf32>
    %3 = arith.truncf %2 : vector<128x32xf32> to vector<128x32xbf16>
    %c0_3 = arith.constant 0 : index
    %c0_4 = arith.constant 0 : index
    %4 = vector.load %arg3[%c0_3, %c0_4] : memref<32x96xbf16, #tpu.memory_space<vmem>>, vector<32x96xbf16>
    %cst = arith.constant dense<0.000000e+00> : vector<128x96xf32>
    %5 = tpu.matmul %3, %4, %cst {dimension_numbers = #tpu.dot_dimension_numbers<[1], [0], [0], [1], [0, 0, 1, 1], [], []>} : vector<128x32xbf16>, vector<32x96xbf16>, vector<128x96xf32> -> vector<128x96xf32>
    %c0_5 = arith.constant 0 : index
    %c0_6 = arith.constant 0 : index
    %6 = vector.load %arg4[%c0_5, %c0_6] : memref<1x96xf32, #tpu.memory_space<vmem>>, vector<1x96xf32>
    %7 = vector.broadcast %6 : vector<1x96xf32> to vector<128x96xf32>
    %8 = arith.addf %5, %7 : vector<128x96xf32>
    %c0_7 = arith.constant 0 : index
    %c0_8 = arith.constant 0 : index
    %9 = vector.load %arg5[%c0_7, %c0_8] : memref<128x128xf32, #tpu.memory_space<vmem>>, vector<128x128xf32>
    %c0_9 = arith.constant 0 : index
    %c0_10 = arith.constant 0 : index
    %c0_11 = arith.constant 0 : index
    %10 = vector.load %arg6[%c0_9, %c0_10, %c0_11] : memref<1x1x128xf32, #tpu.memory_space<vmem>>, vector<1x1x128xf32>
    %11 = vector.shape_cast %10 : vector<1x1x128xf32> to vector<1x128xf32>
    %12 = vector.broadcast %11 : vector<1x128xf32> to vector<128x128xf32>
    %13 = arith.addf %9, %12 : vector<128x128xf32>
    %14 = vector.extract_strided_slice %8 {offsets = [0, 0], sizes = [128, 8], strides = [1, 1]} : vector<128x96xf32> to vector<128x8xf32>
    %15 = arith.truncf %14 : vector<128x8xf32> to vector<128x8xbf16>
    %16 = vector.extract_strided_slice %8 {offsets = [0, 32], sizes = [128, 8], strides = [1, 1]} : vector<128x96xf32> to vector<128x8xf32>
    %17 = arith.truncf %16 : vector<128x8xf32> to vector<128x8xbf16>
    %18 = vector.extract_strided_slice %8 {offsets = [0, 64], sizes = [128, 8], strides = [1, 1]} : vector<128x96xf32> to vector<128x8xf32>
    %19 = arith.truncf %18 : vector<128x8xf32> to vector<128x8xbf16>
    %cst_12 = arith.constant dense<0.000000e+00> : vector<128x128xf32>
    %20 = tpu.matmul %15, %17, %cst_12 {dimension_numbers = #tpu.dot_dimension_numbers<[1], [1], [0], [0], [0, 0, 1, 0], [], []>} : vector<128x8xbf16>, vector<128x8xbf16>, vector<128x128xf32> -> vector<128x128xf32>
    %21 = arith.addf %20, %13 : vector<128x128xf32>
    %cst_13 = arith.constant dense<0xFF800000> : vector<128xf32>
    %22 = vector.multi_reduction <maximumf>, %21, %cst_13 [1] : vector<128x128xf32> to vector<128xf32>
    %23 = vector.shape_cast %22 : vector<128xf32> to vector<128x1xf32>
    %24 = vector.broadcast %23 : vector<128x1xf32> to vector<128x128xf32>
    %25 = arith.subf %21, %24 : vector<128x128xf32>
    %26 = math.exp %25 : vector<128x128xf32>
    %cst_14 = arith.constant dense<0.000000e+00> : vector<128xf32>
    %27 = vector.multi_reduction <add>, %26, %cst_14 [1] : vector<128x128xf32> to vector<128xf32>
    %28 = vector.shape_cast %27 : vector<128xf32> to vector<128x1xf32>
    %29 = tpu.reciprocal %28 {approx = true} : vector<128x1xf32> -> vector<128x1xf32>
    %30 = arith.mulf %28, %29 : vector<128x1xf32>
    %cst_15 = arith.constant 2.000000e+00 : f32
    %31 = vector.broadcast %cst_15 : f32 to vector<128x1xf32>
    %32 = arith.subf %31, %30 : vector<128x1xf32>
    %33 = arith.mulf %29, %32 : vector<128x1xf32>
    %34 = arith.truncf %26 : vector<128x128xf32> to vector<128x128xbf16>
    %cst_16 = arith.constant dense<0.000000e+00> : vector<128x8xf32>
    %35 = tpu.matmul %34, %19, %cst_16 {dimension_numbers = #tpu.dot_dimension_numbers<[1], [0], [0], [1], [0, 0, 1, 1], [], []>} : vector<128x128xbf16>, vector<128x8xbf16>, vector<128x8xf32> -> vector<128x8xf32>
    %36 = vector.broadcast %33 : vector<128x1xf32> to vector<128x8xf32>
    %37 = arith.mulf %35, %36 : vector<128x8xf32>
    %c0_17 = arith.constant 0 : index
    %c0_18 = arith.constant 0 : index
    %38 = vector.load %arg8[%c0_17, %c0_18] : memref<128x32xf32, #tpu.memory_space<vmem>>, vector<128x8xf32>
    tpu.vector_store %arg8[%c0_17, %c0_18], %37 {strides = array<i32>} : memref<128x32xf32, #tpu.memory_space<vmem>>, vector<128x8xf32>,
    %39 = vector.extract_strided_slice %8 {offsets = [0, 8], sizes = [128, 8], strides = [1, 1]} : vector<128x96xf32> to vector<128x8xf32>
    %40 = arith.truncf %39 : vector<128x8xf32> to vector<128x8xbf16>
    %41 = vector.extract_strided_slice %8 {offsets = [0, 40], sizes = [128, 8], strides = [1, 1]} : vector<128x96xf32> to vector<128x8xf32>
    %42 = arith.truncf %41 : vector<128x8xf32> to vector<128x8xbf16>
    %43 = vector.extract_strided_slice %8 {offsets = [0, 72], sizes = [128, 8], strides = [1, 1]} : vector<128x96xf32> to vector<128x8xf32>
    %44 = arith.truncf %43 : vector<128x8xf32> to vector<128x8xbf16>
    %cst_19 = arith.constant dense<0.000000e+00> : vector<128x128xf32>
    %45 = tpu.matmul %40, %42, %cst_19 {dimension_numbers = #tpu.dot_dimension_numbers<[1], [1], [0], [0], [0, 0, 1, 0], [], []>} : vector<128x8xbf16>, vector<128x8xbf16>, vector<128x128xf32> -> vector<128x128xf32>
    %46 = arith.addf %45, %13 : vector<128x128xf32>
    %cst_20 = arith.constant dense<0xFF800000> : vector<128xf32>
    %47 = vector.multi_reduction <maximumf>, %46, %cst_20 [1] : vector<128x128xf32> to vector<128xf32>
    %48 = vector.shape_cast %47 : vector<128xf32> to vector<128x1xf32>
    %49 = vector.broadcast %48 : vector<128x1xf32> to vector<128x128xf32>
    %50 = arith.subf %46, %49 : vector<128x128xf32>
    %51 = math.exp %50 : vector<128x128xf32>
    %cst_21 = arith.constant dense<0.000000e+00> : vector<128xf32>
    %52 = vector.multi_reduction <add>, %51, %cst_21 [1] : vector<128x128xf32> to vector<128xf32>
    %53 = vector.shape_cast %52 : vector<128xf32> to vector<128x1xf32>
    %54 = tpu.reciprocal %53 {approx = true} : vector<128x1xf32> -> vector<128x1xf32>
    %55 = arith.mulf %53, %54 : vector<128x1xf32>
    %cst_22 = arith.constant 2.000000e+00 : f32
    %56 = vector.broadcast %cst_22 : f32 to vector<128x1xf32>
    %57 = arith.subf %56, %55 : vector<128x1xf32>
    %58 = arith.mulf %54, %57 : vector<128x1xf32>
    %59 = arith.truncf %51 : vector<128x128xf32> to vector<128x128xbf16>
    %cst_23 = arith.constant dense<0.000000e+00> : vector<128x8xf32>
    %60 = tpu.matmul %59, %44, %cst_23 {dimension_numbers = #tpu.dot_dimension_numbers<[1], [0], [0], [1], [0, 0, 1, 1], [], []>} : vector<128x128xbf16>, vector<128x8xbf16>, vector<128x8xf32> -> vector<128x8xf32>
    %61 = vector.broadcast %58 : vector<128x1xf32> to vector<128x8xf32>
    %62 = arith.mulf %60, %61 : vector<128x8xf32>
    %c0_24 = arith.constant 0 : index
    %c8 = arith.constant 8 : index
    %63 = vector.load %arg8[%c0_24, %c8] : memref<128x32xf32, #tpu.memory_space<vmem>>, vector<128x8xf32>
    tpu.vector_store %arg8[%c0_24, %c8], %62 {strides = array<i32>} : memref<128x32xf32, #tpu.memory_space<vmem>>, vector<128x8xf32>,
    %64 = vector.extract_strided_slice %8 {offsets = [0, 16], sizes = [128, 8], strides = [1, 1]} : vector<128x96xf32> to vector<128x8xf32>
    %65 = arith.truncf %64 : vector<128x8xf32> to vector<128x8xbf16>
    %66 = vector.extract_strided_slice %8 {offsets = [0, 48], sizes = [128, 8], strides = [1, 1]} : vector<128x96xf32> to vector<128x8xf32>
    %67 = arith.truncf %66 : vector<128x8xf32> to vector<128x8xbf16>
    %68 = vector.extract_strided_slice %8 {offsets = [0, 80], sizes = [128, 8], strides = [1, 1]} : vector<128x96xf32> to vector<128x8xf32>
    %69 = arith.truncf %68 : vector<128x8xf32> to vector<128x8xbf16>
    %cst_25 = arith.constant dense<0.000000e+00> : vector<128x128xf32>
    %70 = tpu.matmul %65, %67, %cst_25 {dimension_numbers = #tpu.dot_dimension_numbers<[1], [1], [0], [0], [0, 0, 1, 0], [], []>} : vector<128x8xbf16>, vector<128x8xbf16>, vector<128x128xf32> -> vector<128x128xf32>
    %71 = arith.addf %70, %13 : vector<128x128xf32>
    %cst_26 = arith.constant dense<0xFF800000> : vector<128xf32>
    %72 = vector.multi_reduction <maximumf>, %71, %cst_26 [1] : vector<128x128xf32> to vector<128xf32>
    %73 = vector.shape_cast %72 : vector<128xf32> to vector<128x1xf32>
    %74 = vector.broadcast %73 : vector<128x1xf32> to vector<128x128xf32>
    %75 = arith.subf %71, %74 : vector<128x128xf32>
    %76 = math.exp %75 : vector<128x128xf32>
    %cst_27 = arith.constant dense<0.000000e+00> : vector<128xf32>
    %77 = vector.multi_reduction <add>, %76, %cst_27 [1] : vector<128x128xf32> to vector<128xf32>
    %78 = vector.shape_cast %77 : vector<128xf32> to vector<128x1xf32>
    %79 = tpu.reciprocal %78 {approx = true} : vector<128x1xf32> -> vector<128x1xf32>
    %80 = arith.mulf %78, %79 : vector<128x1xf32>
    %cst_28 = arith.constant 2.000000e+00 : f32
    %81 = vector.broadcast %cst_28 : f32 to vector<128x1xf32>
    %82 = arith.subf %81, %80 : vector<128x1xf32>
    %83 = arith.mulf %79, %82 : vector<128x1xf32>
    %84 = arith.truncf %76 : vector<128x128xf32> to vector<128x128xbf16>
    %cst_29 = arith.constant dense<0.000000e+00> : vector<128x8xf32>
    %85 = tpu.matmul %84, %69, %cst_29 {dimension_numbers = #tpu.dot_dimension_numbers<[1], [0], [0], [1], [0, 0, 1, 1], [], []>} : vector<128x128xbf16>, vector<128x8xbf16>, vector<128x8xf32> -> vector<128x8xf32>
    %86 = vector.broadcast %83 : vector<128x1xf32> to vector<128x8xf32>
    %87 = arith.mulf %85, %86 : vector<128x8xf32>
    %c0_30 = arith.constant 0 : index
    %c16 = arith.constant 16 : index
    %88 = vector.load %arg8[%c0_30, %c16] : memref<128x32xf32, #tpu.memory_space<vmem>>, vector<128x8xf32>
    tpu.vector_store %arg8[%c0_30, %c16], %87 {strides = array<i32>} : memref<128x32xf32, #tpu.memory_space<vmem>>, vector<128x8xf32>,
    %89 = vector.extract_strided_slice %8 {offsets = [0, 24], sizes = [128, 8], strides = [1, 1]} : vector<128x96xf32> to vector<128x8xf32>
    %90 = arith.truncf %89 : vector<128x8xf32> to vector<128x8xbf16>
    %91 = vector.extract_strided_slice %8 {offsets = [0, 56], sizes = [128, 8], strides = [1, 1]} : vector<128x96xf32> to vector<128x8xf32>
    %92 = arith.truncf %91 : vector<128x8xf32> to vector<128x8xbf16>
    %93 = vector.extract_strided_slice %8 {offsets = [0, 88], sizes = [128, 8], strides = [1, 1]} : vector<128x96xf32> to vector<128x8xf32>
    %94 = arith.truncf %93 : vector<128x8xf32> to vector<128x8xbf16>
    %cst_31 = arith.constant dense<0.000000e+00> : vector<128x128xf32>
    %95 = tpu.matmul %90, %92, %cst_31 {dimension_numbers = #tpu.dot_dimension_numbers<[1], [1], [0], [0], [0, 0, 1, 0], [], []>} : vector<128x8xbf16>, vector<128x8xbf16>, vector<128x128xf32> -> vector<128x128xf32>
    %96 = arith.addf %95, %13 : vector<128x128xf32>
    %cst_32 = arith.constant dense<0xFF800000> : vector<128xf32>
    %97 = vector.multi_reduction <maximumf>, %96, %cst_32 [1] : vector<128x128xf32> to vector<128xf32>
    %98 = vector.shape_cast %97 : vector<128xf32> to vector<128x1xf32>
    %99 = vector.broadcast %98 : vector<128x1xf32> to vector<128x128xf32>
    %100 = arith.subf %96, %99 : vector<128x128xf32>
    %101 = math.exp %100 : vector<128x128xf32>
    %cst_33 = arith.constant dense<0.000000e+00> : vector<128xf32>
    %102 = vector.multi_reduction <add>, %101, %cst_33 [1] : vector<128x128xf32> to vector<128xf32>
    %103 = vector.shape_cast %102 : vector<128xf32> to vector<128x1xf32>
    %104 = tpu.reciprocal %103 {approx = true} : vector<128x1xf32> -> vector<128x1xf32>
    %105 = arith.mulf %103, %104 : vector<128x1xf32>
    %cst_34 = arith.constant 2.000000e+00 : f32
    %106 = vector.broadcast %cst_34 : f32 to vector<128x1xf32>
    %107 = arith.subf %106, %105 : vector<128x1xf32>
    %108 = arith.mulf %104, %107 : vector<128x1xf32>
    %109 = arith.truncf %101 : vector<128x128xf32> to vector<128x128xbf16>
    %cst_35 = arith.constant dense<0.000000e+00> : vector<128x8xf32>
    %110 = tpu.matmul %109, %94, %cst_35 {dimension_numbers = #tpu.dot_dimension_numbers<[1], [0], [0], [1], [0, 0, 1, 1], [], []>} : vector<128x128xbf16>, vector<128x8xbf16>, vector<128x8xf32> -> vector<128x8xf32>
    %111 = vector.broadcast %108 : vector<128x1xf32> to vector<128x8xf32>
    %112 = arith.mulf %110, %111 : vector<128x8xf32>
    %c0_36 = arith.constant 0 : index
    %c24 = arith.constant 24 : index
    %113 = vector.load %arg8[%c0_36, %c24] : memref<128x32xf32, #tpu.memory_space<vmem>>, vector<128x8xf32>
    tpu.vector_store %arg8[%c0_36, %c24], %112 {strides = array<i32>} : memref<128x32xf32, #tpu.memory_space<vmem>>, vector<128x8xf32>,
    %c0_37 = arith.constant 0 : index
    %c0_38 = arith.constant 0 : index
    %114 = vector.load %arg8[%c0_37, %c0_38] : memref<128x32xf32, #tpu.memory_space<vmem>>, vector<128x32xf32>
    %115 = vector.shape_cast %114 : vector<128x32xf32> to vector<8x16x32xf32>
    %c0_39 = arith.constant 0 : index
    %c0_40 = arith.constant 0 : index
    %c0_41 = arith.constant 0 : index
    %c0_42 = arith.constant 0 : index
    %116 = vector.load %arg7[%c0_39, %c0_40, %c0_41, %c0_42] : memref<1x8x16x32xf32, #tpu.memory_space<vmem>>, vector<1x8x16x32xf32>
    %117 = vector.shape_cast %116 : vector<1x8x16x32xf32> to vector<8x16x32xf32>
    %118 = vector.shape_cast %115 : vector<8x16x32xf32> to vector<1x8x16x32xf32>
    tpu.vector_store %arg7[%c0_39, %c0_40, %c0_41, %c0_42], %118 {strides = array<i32>} : memref<1x8x16x32xf32, #tpu.memory_space<vmem>>, vector<1x8x16x32xf32>,
    return
  }
  func.func @transform_0(%arg0: i32, %arg1: i32) -> (i32, i32, i32, i32) {
    %c0_i32 = arith.constant 0 : i32
    %c0_i32_0 = arith.constant 0 : i32
    %c0_i32_1 = arith.constant 0 : i32
    return %arg0, %c0_i32, %arg1, %c0_i32_0 : i32, i32, i32, i32
  }
  func.func @transform_1(%arg0: i32, %arg1: i32) -> (i32, i32) {
    %c0_i32 = arith.constant 0 : i32
    %c0_i32_0 = arith.constant 0 : i32
    %c0_i32_1 = arith.constant 0 : i32
    return %c0_i32, %c0_i32_0 : i32, i32
  }
  func.func @transform_2(%arg0: i32, %arg1: i32) -> (i32, i32) {
    %c0_i32 = arith.constant 0 : i32
    %c0_i32_0 = arith.constant 0 : i32
    %c0_i32_1 = arith.constant 0 : i32
    return %c0_i32, %c0_i32_0 : i32, i32
  }
  func.func @transform_3(%arg0: i32, %arg1: i32) -> (i32, i32) {
    %c0_i32 = arith.constant 0 : i32
    %c0_i32_0 = arith.constant 0 : i32
    %c0_i32_1 = arith.constant 0 : i32
    return %c0_i32, %c0_i32_0 : i32, i32
  }
  func.func @transform_4(%arg0: i32, %arg1: i32) -> (i32, i32, i32) {
    %c0_i32 = arith.constant 0 : i32
    %c0_i32_0 = arith.constant 0 : i32
    %c0_i32_1 = arith.constant 0 : i32
    return %arg0, %c0_i32, %c0_i32_0 : i32, i32, i32
  }
  func.func @transform_5(%arg0: i32, %arg1: i32) -> (i32, i32, i32, i32) {
    %c0_i32 = arith.constant 0 : i32
    %c0_i32_0 = arith.constant 0 : i32
    %c0_i32_1 = arith.constant 0 : i32
    return %arg0, %c0_i32, %arg1, %c0_i32_0 : i32, i32, i32, i32
  }
}

</mosaic_0001>

<bundles_post_ra>
// kernel: tpu_custom_call.1
= control target key start
LH: loop header
LB: loop body
LE: loop exit
PB: predicated region body
PF: predicated region fallthrough
CT: control target
= control target key end

     0   :  { %s5575_s0 = inlined_call_operand.hbm [shape: f32[2,8,16,32], index: 0, kind: input, shape index: {}]   ;;  %s5576_s1 = inlined_call_operand.hbm [shape: bf16[32,96], index: 1, kind: input, shape index: {}]   ;;  %s5577_s2 = inlined_call_operand.vmem [shape: f32[1,96], index: 2, kind: input, shape index: {}]   ;;  %s5578_s3 = inlined_call_operand.hbm [shape: f32[128,128], index: 3, kind: input, shape index: {}]   ;;  %s5579_s4 = inlined_call_operand.vmem [shape: f32[2,1,128], index: 4, kind: input, shape index: {}]   ;;  %s5580_s5 = inlined_call_operand.hbm [shape: f32[2,8,16,32], index: 5, kind: output, shape index: {}]  }
   0x1   :  { %5605 = sst [smem:[#allocation74_spill]] %s5576_s1 }
   0x2   :  { %10 = vsyncpa [#allocation4], 0 }
   0x3   :  { %12 = vsyncpa [#allocation4 + $0x1], 0 }
   0x4   :  { %13 = vsyncpa [#allocation7], 0 }
   0x5   :  { %14 = vsyncpa [#allocation5], 0 }
   0x6   :  { %16 = vsyncpa [#allocation5 + $0x1], 0  ;;  %s4020_s18 = smov 0   ;;  %s4022_s19 = smov 0  }
   0x7   :  { %s4024_s20 = smov 0   ;;  %s4026_s21 = smov 0  }
   0x8   :  { %s4028_s22 = smov 0   ;;  %s4030_s23 = smov 0  }
   0x9 LB: > { %s2930_s24 = sadd.s32 4294967295, %s3965_s23   ;;  %s2931_s25 = sadd.s32 4294967294, %s3965_s23   ;;  %s3965_s23 = sphi %s4030_s23, %s22_s23   ;;  %s3961_s22 = sphi %s4028_s22, %s5747_s22   ;;  %s3957_s21 = sphi %s4026_s21, %s5746_s21   ;;  %s3953_s20 = sphi %s4024_s20, %s5745_s20   ;;  %s3949_s19 = sphi %s4022_s19, %s5744_s19   ;;  %s3945_s18 = sphi %s4020_s18, %s5743_s18  }
   0xa   : > { %p56_p0 = scmp.ne.s32.totalorder %s3949_s19, %s3945_s18  ;;  %p4054_p1 = scmp.eq.s32.totalorder %s2930_s24, 0 }
   0xb   : > { %p4058_p2 = scmp.eq.s32.totalorder %s2930_s24, 1  ;;  %p177_p3 = scmp.eq.s32.totalorder %s2931_s25, 1 }
   0xc   : > { %s5606_s26 = scalar_select %p4054_p1, 1, 0 }
   0xd   : > { %p4064_p4 = por %p4054_p1, %p56_p0  ;;  %p2932_p5 = scmp.ge.s32.totalorder %s3965_s23, 1 }
   0xe   : > { %p4069_p6 = por %p177_p3, %p56_p0  ;;  %p184_p7 = scmp.lt.s32.totalorder %s3965_s23, 3 }
   0xf   : > { %s5608_s28 = scalar_select %p4064_p4, 1, 0 }
  0x10   : > { %s5609_s29 = scalar_select %p4069_p6, 1, 0 }
  0x11   : > { %p4074_p8 = pnand %p2932_p5, %p184_p7  ;;  %s3967_s6 = smov [#allocation6]  }
  0x12   : > { %s196_s7 = sshll.u32 %s3967_s6, 4  ;;  %s3968_s9 = smov [#allocation8]   ;;  %s197_s7 = int_to_ptr.vmem [resolvable:$true] %s196_s7 }
  0x13   : > { %p3453_p9 = pneg %p4074_p8  ;;  %s212_s10 = sshll.u32 %s3968_s9, 4  ;;  %s213_s10 = int_to_ptr.vmem [resolvable:$true] %s212_s10 }
  0x14   : > { %s3812_s11 = scalar_lea.vmem %s197_s7, 256  ;;  %p3820_p5 = scmp.lt.s32.totalorder %s197_s7, %s197_s7 }
  0x15   : > { %p4083_p11 = pnand %p3453_p9, %p4054_p1  ;;  %p3813_p13 = scmp.ne.s32.totalorder %s197_s7, %s3812_s11 }
  0x16   : > { %p3821_p7 = scmp.lt.s32.totalorder %s3812_s11, %s3812_s11 }
  0x17   : > { %p3803_p12 = pneg %p4083_p11 }
  0x18   : > { %p3822_p10 = por %p3821_p7, %p3820_p5 }
  0x19   : > { %p3815_p0 = pnand %p3813_p13, %p3803_p12 }
  0x1b   : > { %p3816_p3 = pneg %p3815_p0 }
  0x1d   : > { %p3823_p9 = pnand %p3822_p10, %p3816_p3 }
  0x1f   : > { %3826 = shalt.err (!%p3823_p9)
}
  0x20   : > { %s3969_s12 = smov 64   ;;  %s3970_s13 = smov 4  }
  0x21   : > { %s5612_s1 = sld [smem:[#allocation74_spill]]  ;;  %s3838_s16 = scalar_lea.vmem %s213_s10, 2048 }
  0x22   : > { %p3839_p6 = scmp.ne.s32.totalorder %s213_s10, %s3838_s16  ;;  %p3846_p1 = scmp.lt.s32.totalorder %s213_s10, %s213_s10 }
  0x23   : > { %p3847_p4 = scmp.lt.s32.totalorder %s3838_s16, %s3838_s16 }
  0x24   : > { %p3841_p13 = pnand %p3839_p6, %p3803_p12 }
  0x25   : > { %p3848_p5 = por %p3847_p4, %p3846_p1 }
  0x26   : > { %p3842_p0 = pneg %p3841_p13 }
  0x27   : > { %3456 = dma.hbm_to_vmem [thread:$0]  (!%p4083_p11), %s5612_s1, 256, %s197_s7, [#allocation7], %s3969_s12, %s3969_s12, %s3970_s13  }
  0x28   : > { %p3849_p10 = pnand %p3848_p5, %p3842_p0 }
  0x2a   : > { %3852 = shalt.err (!%p3849_p10)
}
  0x2b   : > { %s5584_s17 = smov 128   ;;  %s5585_s24 = smov 8  }
  0x2c   : > { %3459 = dma.hbm_to_vmem [thread:$0]  (!%p4083_p11), %s5578_s3, 2048, %s213_s10, [#allocation7], %s5584_s17, %s5584_s17, %s5585_s24  }
  0x2d   : > { %s34_s7 = sadd.s32 1, %s3961_s22  ;;  %s43_s9 = sadd.s32 1, %s3953_s20 }
  0x2e   : > { %p36_p1 = scmp.ge.s32.totalorder %s34_s7, 2  ;;  %p50_p4 = scmp.ne.s32.totalorder %s3953_s20, %s3949_s19 }
  0x2f   : > { %p51_p6 = scmp.eq.s32.totalorder %s3965_s23, 0  ;;  %p3470_p12 = scmp.lt.s32.totalorder %s3965_s23, 2 }
  0x30   : > { %s5749_s7 = smov (%p36_p1, %s34_s7), 0  ;;  %p4118_p7 = por %p4058_p2, %p50_p4 }
  0x31   : > { %p52_p3 = por %p51_p6, %p50_p4  ;;  %s38_s11 = ssub.s32 %s3961_s22, %s5749_s7 }
  0x32   : > { %s226_s12 = sand.u32 1, %s3953_s20   ;;  %p41_p9 = scmp.eq.s32.totalorder %s38_s11, 0 }
  0x33   : > { %s2936_s10 = sshll.u32 %s226_s12, 7  ;;  %s2993_s13 = sshll.u32 %s3961_s22, 11 }
  0x34   : > { %s4127_s14 = scalar_select %p41_p9, %s3953_s20, %s43_s9  }
  0x35   : > { %s238_s25 = scalar_lea.hbm %s5575_s0, %s2993_s13  ;;  %s230_s6 = scalar_lea.vmem [#allocation3], %s2936_s10 }
  0x36   : > { %s239_s17 = sshll.u32 %s230_s6, 4  ;;  %p4134_p11 = pnand %p3470_p12, %p52_p3  ;;  %s240_s17 = int_to_ptr.vmem [resolvable:$true] %s239_s17 }
  0x37   : > { %s227_s24 = scalar_lea.sflag [#allocation4], %s226_s12  ;;  %s3866_s11 = scalar_lea.vmem %s240_s17, 2048 }
  0x38   : > { %p3855_p2 = pneg %p4134_p11  ;;  %p3867_p13 = scmp.ne.s32.totalorder %s240_s17, %s3866_s11 }
  0x39   : > { %s3973_s9 = smov [#allocation3]  }
  0x3a   : > { %p3869_p0 = pnand %p3867_p13, %p3855_p2  ;;  %s3871_s1 = sshll.u32 %s3973_s9, 4  ;;  %s3872_s1 = int_to_ptr.vmem [resolvable:$false] %s3871_s1 }
  0x3b   : > { %s3873_s13 = scalar_lea.vmem %s3872_s1, 4096  ;;  %p3874_p10 = scmp.lt.s32.totalorder %s240_s17, %s3872_s1 }
  0x3c   : > { %p3870_p5 = pneg %p3869_p0  ;;  %p3875_p1 = scmp.lt.s32.totalorder %s3873_s13, %s3866_s11 }
  0x3e   : > { %p3876_p4 = por %p3875_p1, %p3874_p10 }
  0x40   : > { %p3877_p6 = pnand %p3876_p4, %p3870_p5 }
  0x42   : > { %3880 = shalt.err (!%p3877_p6)
}
  0x43   : > { %s5615_s10 = smov 8   ;;  %s5616_s15 = smov 128  }
  0x44   : > { %3463 = dma.hbm_to_vmem [thread:$0]  (!%p4134_p11), %s238_s25, 2048, %s240_s17, %s227_s24, %s5616_s15, %s5616_s15, %s5615_s10  }
  0x45   : > { %257 = sbr.rel (%p4074_p8) target bundleno = 2616 (0xa38), region = 40 }
  0x4a   : > { %s4148_s12 = sand.u32 1, %s3949_s19   ;;  %p5617_p12 = scmp.ne.s32.totalorder %s5608_s28, 0 }
  0x4b   : > { %s2940_s1 = sshll.u32 %s4148_s12, 7  ;;  %s260_s16 = scalar_lea.sflag [#allocation4], %s4148_s12 }
  0x4c   : > { %s4154_s6 = scalar_lea.vmem [#allocation3], %s2940_s1 }
  0x4d   : > { %3932 = dma.done.wait (%p5617_p12), %s260_s16, 2048  }
  0x4e   : > { %3934 = vsyncadd (%p5617_p12), %s260_s16, 4294965248  ;;  %p5618_p3 = scmp.ne.s32.totalorder %s5606_s26, 0 }
  0x50   : > { %3936 = dma.done.wait (%p5618_p3), [#allocation7], 2304  }
  0x51   : > { %3938 = vsyncadd (%p5618_p3), [#allocation7], 4294964992  ;;  %v3543_v0 = vld [vmem:[#allocation6 + $0x8] sm:$0xff]   ;;  %v3544_v1 = vld [vmem:[#allocation6] sm:$0xff]   ;;  %vm354_vm0 = vcmask 261120   ;;  %vm547_vm1 = vcmask 64512  }
  0x52   : > { %3133 = vmatprep.subr.bf16.mxu0 %v3543_v0  ;;  %v307_v2 = vld [vmem:[%s4154_s6] sm:$0xff]  ;;  %v308_v3 = vld [vmem:[%s4154_s6 + $0x8] sm:$0xff]  ;;  %v309_v5 = vld [vmem:[%s4154_s6 + $0x10] sm:$0xff]  ;;  %s3974_s30 = smov 96   ;;  %s3975_s17 = smov 64   ;;  %vm1592_vm2 = vcmask 130112  }
  0x53   : > { %3134 = vmatpush3.bf16.msra.mxu0 %v3543_v0  ;;  %v323_v4 = vpack.c.bf16 %v308_v3, %v307_v2  ;;  %v310_v6 = vld [vmem:[%s4154_s6 + $0x18] sm:$0xff]  ;;  %v311_v7 = vld [vmem:[%s4154_s6 + $0x20] sm:$0xff]  ;;  %v312_v8 = vld [vmem:[%s4154_s6 + $0x28] sm:$0xff]  ;;  %s3976_s24 = smov 88   ;;  %p302_p8 = scmp.lt.s32.totalorder %s3957_s21, 1  ;;  %vm2171_vm3 = vcmask 195712  }
  0x54   : > { %3135 = vmatprep.subr.bf16.mxu0 %v3544_v1  ;;  %v324_v9 = vpack.c.bf16 %v310_v6, %v309_v5  ;;  %v325_v10 = vpack.c.bf16 %v312_v8, %v311_v7  ;;  %v313_v11 = vld [vmem:[%s4154_s6 + $0x30] sm:$0xff]  ;;  %v314_v12 = vld [vmem:[%s4154_s6 + $0x38] sm:$0xff]  ;;  %v315_v13 = vld [vmem:[%s4154_s6 + $0x40] sm:$0xff]  ;;  %s3977_s13 = smov 120   ;;  %s3978_s10 = smov 56   ;;  %vm2750_vm4 = vcmask 261312  }
  0x55   : > { %3137 = vmatprep.mubr.msk.bf16.mxu0 %vm354_vm0, %v323_v4  ;;  %v316_v14 = vld [vmem:[%s4154_s6 + $0x48] sm:$0xff]  ;;  %v326_v15 = vpack.c.bf16 %v314_v12, %v313_v11  ;;  %v317_v17 = vld [vmem:[%s4154_s6 + $0x50] sm:$0xff]  ;;  %v318_v18 = vld [vmem:[%s4154_s6 + $0x58] sm:$0xff]  ;;  %s303_s25 = scalar_select %p302_p8, %s3957_s21, 1 }
  0x56   : > { %v327_v16 = vpack.c.bf16 %v316_v14, %v315_v13  ;;  %v319_v19 = vld [vmem:[%s4154_s6 + $0x60] sm:$0xff]  ;;  %v320_v20 = vld [vmem:[%s4154_s6 + $0x68] sm:$0xff]  ;;  %v328_v21 = vpack.c.bf16 %v318_v18, %v317_v17  ;;  %v321_v23 = vld [vmem:[%s4154_s6 + $0x70] sm:$0xff]  ;;  %s3979_s15 = smov 80   ;;  %s3980_s16 = smov 112  }
  0x57   : > { %3136 = vmatpush3.bf16.msra.mxu0 %v3544_v1  ;;  %v329_v22 = vpack.c.bf16 %v320_v20, %v319_v19  ;;  %v322_v24 = vld [vmem:[%s4154_s6 + $0x78] sm:$0xff]  ;;  %v2944_v29 = vld [vmem:[%s5577_s2] ss:$0 sm:$0xff]  ;;  %s304_s9 = scalar_lea.vmem %s5579_s4, %s303_s25  ;;  %s3981_s6 = smov 48  }
  0x58   : > { %v330_v25 = vpack.c.bf16 %v322_v24, %v321_v23  ;;  %s3982_s26 = smov 72   ;;  %s3983_s28 = smov 104  }
  0x59   : > { %s3987_s25 = smov 24   ;;  %s5471_s27 = scalar_lea.vmem [#allocation9], %s2940_s1 }
  0x5a   : > { %3138 = vmatmul.mubr.msk.bf16.vlgmr.msra.gmra.mxu0 %vm354_vm0, %v324_v9  ;;  %s2994_s1 = sshll.u32 %s3957_s21, 11  ;;  %s2815_s11 = sshll.u32 %s5471_s27, 4  ;;  %s5524_s11 = int_to_ptr.vmem [resolvable:$true] %s2815_s11 }
  0x5b   : > { %3141 = vmatprep.mubr.msk.bf16.mxu0 %vm354_vm0, %v325_v10  ;;  %s3988_s21 = smov [#allocation9]  }
  0x62   : > { %3142 = vmatmul.mubr.msk.bf16.gmra.mxu0 %vm354_vm0, %v326_v15 }
  0x63   : > { %3145 = vmatprep.mubr.msk.bf16.mxu0 %vm354_vm0, %v327_v16 }
  0x6a   : > { %3146 = vmatmul.mubr.msk.bf16.gmra.mxu0 %vm354_vm0, %v328_v21 }
  0x6b   : > { %3149 = vmatprep.mubr.msk.bf16.mxu0 %vm354_vm0, %v329_v22 }
  0x72   : > { %3150 = vmatmul.mubr.msk.bf16.gmra.mxu0 %vm354_vm0, %v330_v25 }
 0x11a   : > { %v3139_v26 = vpop.f32.mrf.mxu0 }
 0x11b   : > { %v422_v1 = vadd.f32 %v3139_v26, %v2944_v29 }
 0x11c   : > { %v413_v27 = vpop.f32.mrf.mxu0 }
 0x11d   : > { %v414_v31 = vadd.f32 %v2944_v29, %v413_v27 }
 0x11e   : > { %v3140_v28 = vpop.f32.mrf.mxu0 }
 0x11f   : > { %v425_v63 = vadd.f32 %v3140_v28, %v2944_v29 }
 0x120   : > { %v416_v30 = vpop.f32.mrf.mxu0 }
 0x121   : > { %v417_v32 = vadd.f32 %v2944_v29, %v416_v30  ;;  %v4215_v2 = vpack.c.bf16 %v425_v63, %v422_v1  ;;  %v4274_v30 = vld [vmem:[%s304_s9] ss:$0 sm:$0xff] }
 0x122   : > { %v3143_v33 = vpop.f32.mrf.mxu0 }
 0x123   : > { %v4191_v34 = vpack.c.bf16 %v417_v32, %v414_v31  ;;  %v438_v62 = vadd.f32 %v3143_v33, %v2944_v29  ;;  %v476_v31 = vld [vmem:[#allocation8] sm:$0xff]  ;;  %v479_v33 = vld [vmem:[#allocation8 + $0x18] sm:$0xff] }
 0x124   : > { %v429_v35 = vpop.f32.mrf.mxu0 }
 0x125   : > { %3169 = vmatprep.mubr.msk.bf16.mxu1 %vm547_vm1, %v4191_v34  ;;  %v430_v52 = vadd.f32 %v2944_v29, %v429_v35  ;;  %v4280_v35 = vadd.f32 %v4274_v30, %v476_v31 }
 0x126   : > { %v3144_v36 = vpop.f32.mrf.mxu0 }
 0x127   : > { %v441_v60 = vadd.f32 %v3144_v36, %v2944_v29 }
 0x128   : > { %v432_v37 = vpop.f32.mrf.mxu0 }
 0x129   : > { %v433_v49 = vadd.f32 %v2944_v29, %v432_v37  ;;  %v4211_v0 = vpack.c.bf16 %v441_v60, %v438_v62 }
 0x12a   : > { %v3147_v38 = vpop.f32.mrf.mxu0 }
 0x12b   : > { %v454_v41 = vadd.f32 %v3147_v38, %v2944_v29  ;;  %v4201_v56 = vpack.c.bf16 %v433_v49, %v430_v52  ;;  %v4286_v38 = vadd.f32 %v4274_v30, %v479_v33  ;;  %v480_v49 = vld [vmem:[#allocation8 + $0x20] sm:$0xff]  ;;  %v481_v52 = vld [vmem:[#allocation8 + $0x28] sm:$0xff]  ;;  %v491_v33 = vld [vmem:[#allocation8 + $0x78] sm:$0xff] }
 0x12c   : > { %v445_v39 = vpop.f32.mrf.mxu0  ;;  %v4315_v60 = vadd.f32 %v4274_v30, %v481_v52 }
 0x12d   : > { %v446_v47 = vadd.f32 %v2944_v29, %v445_v39 }
 0x12e   : > { %v3148_v40 = vpop.f32.mrf.mxu0 }
 0x12f   : > { %v457_v42 = vadd.f32 %v3148_v40, %v2944_v29  ;;  %v477_v40 = vld [vmem:[#allocation8 + $0x8] sm:$0xff] }
 0x130   : > { %v448_v43 = vpop.f32.mrf.mxu0 }
 0x131   : > { %v4195_v44 = vpack.c.bf16 %v457_v42, %v454_v41  ;;  %v449_v45 = vadd.f32 %v2944_v29, %v448_v43  ;;  %v482_v41 = vld [vmem:[#allocation8 + $0x30] sm:$0xff] }
 0x132   : > { %v3151_v46 = vpop.f32.mrf.mxu0 }
 0x133   : > { %541 = vrot.lane.b32.xlu1 %v4195_v44, %s3974_s30  ;;  %v4198_v50 = vpack.c.bf16 %v449_v45, %v446_v47  ;;  %v470_v53 = vadd.f32 %v3151_v46, %v2944_v29  ;;  %v4297_v46 = vadd.f32 %v4274_v30, %v477_v40  ;;  %v4300_v47 = vadd.f32 %v4274_v30, %v482_v41 }
 0x134   : > { %v461_v48 = vpop.f32.mrf.mxu0 }
 0x135   : > { %v462_v59 = vadd.f32 %v2944_v29, %v461_v48 }
 0x136   : > { %v3152_v51 = vpop.f32.mrf.mxu0 }
 0x137   : > { %v473_v54 = vadd.f32 %v3152_v51, %v2944_v29  ;;  %539 = vrot.lane.b32.xlu1 %v4198_v50, %s3974_s30 }
 0x138   : > { %v464_v55 = vpop.f32.mrf.mxu0 }
 0x139   : > { %v4203_v57 = vpack.c.bf16 %v473_v54, %v470_v53  ;;  %v465_v58 = vadd.f32 %v2944_v29, %v464_v55  ;;  %v478_v29 = vld [vmem:[#allocation8 + $0x10] sm:$0xff]  ;;  %v4310_v55 = vadd.f32 %v4274_v30, %v480_v49 }
 0x13a   : > { %v4277_v32 = vadd.f32 %v4274_v30, %v478_v29 }
 0x13b   : > { %545 = vrot.lane.b32.xlu0 %v4203_v57, %s3974_s30  ;;  %535 = vrot.lane.b32.xlu1 %v4201_v56, %s3974_s30  ;;  %v4207_v61 = vpack.c.bf16 %v465_v58, %v462_v59  ;;  %v483_v59 = vld [vmem:[#allocation8 + $0x38] sm:$0xff] }
 0x13c   : > { %v4321_v1 = vadd.f32 %v4274_v30, %v483_v59 }
 0x13f   : > { %543 = vrot.lane.b32.xlu0 %v4207_v61, %s3974_s30  ;;  %531 = vrot.lane.b32.xlu1 %v4191_v34, %s3974_s30 }
 0x143   : > { %537 = vrot.lane.b32.xlu0 %v4211_v0, %s3974_s30  ;;  %881 = vrot.lane.b32.xlu1 %v4201_v56, %s3975_s17 }
 0x147   : > { %533 = vrot.lane.b32.xlu0 %v4215_v2, %s3974_s30  ;;  %877 = vrot.lane.b32.xlu1 %v4191_v34, %s3975_s17  ;;  %s3984_s30 = smov 40  }
 0x14b   : > { %891 = vrot.lane.b32.xlu0 %v4203_v57, %s3975_s17  ;;  %1056 = vrot.lane.b32.xlu1 %v4195_v44, %s3976_s24 }
 0x14f   : > { %887 = vrot.lane.b32.xlu0 %v4195_v44, %s3975_s17  ;;  %889 = vrot.lane.b32.xlu1 %v4207_v61, %s3975_s17 }
 0x153   : > { %885 = vrot.lane.b32.xlu0 %v4198_v50, %s3975_s17 }
 0x157   : > { %883 = vrot.lane.b32.xlu0 %v4211_v0, %s3975_s17 }
 0x15b   : > { %879 = vrot.lane.b32.xlu0 %v4215_v2, %s3975_s17  ;;  %s3985_s17 = smov 8  }
 0x15f   : > { %1060 = vrot.lane.b32.xlu0 %v4203_v57, %s3976_s24 }
 0x163   : > { %1054 = vrot.lane.b32.xlu0 %v4198_v50, %s3976_s24 }
 0x167   : > { %1058 = vrot.lane.b32.xlu0 %v4207_v61, %s3976_s24 }
 0x1a5   : > { %v542_v3 = vpop.permute.xlu1 %541 }
 0x1a6   : > { %v588_v17 = vsel %vm547_vm1, %v542_v3, 0 }
 0x1a9   : > { %v540_v4 = vpop.permute.xlu1 %539 }
 0x1aa   : > { %v585_v21 = vsel %vm547_vm1, %v540_v4, 0 }
 0x1ad   : > { %v546_v5 = vpop.permute.xlu0 %545  ;;  %v536_v6 = vpop.permute.xlu1 %535 }
 0x1ae   : > { %3409 = vmatprep.subr.msk.bf16.mxu1 %vm547_vm1, %v546_v5  ;;  %v594_v7 = vsel %vm547_vm1, %v546_v5, 0  ;;  %v579_v25 = vsel %vm547_vm1, %v536_v6, 0 }
 0x1af   : > { %3154 = vmatpush3.bf16.xpose.msra.mxu1 %v594_v7 }
 0x1b1   : > { %v544_v8 = vpop.permute.xlu0 %543  ;;  %v532_v9 = vpop.permute.xlu1 %531 }
 0x1b2   : > { %3410 = vmatprep.subr.msk.bf16.mxu1 %vm547_vm1, %v544_v8  ;;  %v591_v12 = vsel %vm547_vm1, %v544_v8, 0  ;;  %v573_v28 = vsel %vm547_vm1, %v532_v9, 0 }
 0x1b5   : > { %v538_v10 = vpop.permute.xlu0 %537  ;;  %v882_v11 = vpop.permute.xlu1 %881 }
 0x1b6   : > { %v582_v23 = vsel %vm547_vm1, %v538_v10, 0 }
 0x1b7   : > { %3156 = vmatpush3.bf16.xpose.msra.mxu1 %v591_v12 }
 0x1b8   : > { %3411 = vmatprep.subr.msk.bf16.mxu1 %vm547_vm1, %v542_v3 }
 0x1b9   : > { %v534_v13 = vpop.permute.xlu0 %533  ;;  %v878_v14 = vpop.permute.xlu1 %877 }
 0x1ba   : > { %v576_v27 = vsel %vm547_vm1, %v534_v13, 0 }
 0x1bd   : > { %v892_v15 = vpop.permute.xlu0 %891  ;;  %v4238_v16 = vpop.permute.xlu1 %1056 }
 0x1be   : > { %3185 = vmatprep.subr.bf16.mxu0 %v892_v15 }
 0x1bf   : > { %3158 = vmatpush3.bf16.xpose.msra.mxu1 %v588_v17  ;;  %3186 = vmatpush3.bf16.msra.mxu0 %v892_v15 }
 0x1c0   : > { %3412 = vmatprep.subr.msk.bf16.mxu1 %vm547_vm1, %v540_v4  ;;  %v486_v4 = vld [vmem:[#allocation8 + $0x50] sm:$0xff] }
 0x1c1   : > { %v888_v18 = vpop.permute.xlu0 %887  ;;  %v890_v19 = vpop.permute.xlu1 %889  ;;  %v4331_v7 = vadd.f32 %v4274_v30, %v486_v4 }
 0x1c2   : > { %3187 = vmatprep.subr.bf16.mxu0 %v890_v19 }
 0x1c3   : > { %3188 = vmatpush3.bf16.msra.mxu0 %v890_v19 }
 0x1c4   : > { %3189 = vmatprep.subr.bf16.mxu0 %v888_v18 }
 0x1c5   : > { %v886_v20 = vpop.permute.xlu0 %885 }
 0x1c7   : > { %3160 = vmatpush3.bf16.xpose.msra.mxu1 %v585_v21  ;;  %3190 = vmatpush3.bf16.msra.mxu0 %v888_v18  ;;  %v485_v18 = vld [vmem:[#allocation8 + $0x48] sm:$0xff] }
 0x1c8   : > { %3413 = vmatprep.subr.msk.bf16.mxu1 %vm547_vm1, %v538_v10  ;;  %3191 = vmatprep.subr.bf16.mxu0 %v886_v20 }
 0x1c9   : > { %v884_v22 = vpop.permute.xlu0 %883 }
 0x1cb   : > { %3192 = vmatpush3.bf16.msra.mxu0 %v886_v20  ;;  %v4353_v20 = vadd.f32 %v4274_v30, %v485_v18 }
 0x1cc   : > { %3193 = vmatprep.subr.bf16.mxu0 %v884_v22 }
 0x1cd   : > { %v880_v24 = vpop.permute.xlu0 %879 }
 0x1cf   : > { %3162 = vmatpush3.bf16.xpose.msra.mxu1 %v582_v23  ;;  %3194 = vmatpush3.bf16.msra.mxu0 %v884_v22  ;;  %v490_v23 = vld [vmem:[#allocation8 + $0x70] sm:$0xff] }
 0x1d0   : > { %3414 = vmatprep.subr.msk.bf16.mxu1 %vm547_vm1, %v536_v6  ;;  %3195 = vmatprep.subr.bf16.mxu0 %v882_v11 }
 0x1d1   : > { %v4248_v26 = vpop.permute.xlu0 %1060 }
 0x1d3   : > { %3196 = vmatpush3.bf16.msra.mxu0 %v882_v11 }
 0x1d4   : > { %3197 = vmatprep.subr.bf16.mxu0 %v880_v24 }
 0x1d7   : > { %3164 = vmatpush3.bf16.xpose.msra.mxu1 %v579_v25  ;;  %3198 = vmatpush3.bf16.msra.mxu0 %v880_v24  ;;  %v4365_v24 = vadd.f32 %v4274_v30, %v490_v23 }
 0x1d8   : > { %3415 = vmatprep.subr.msk.bf16.mxu1 %vm547_vm1, %v534_v13  ;;  %3199 = vmatprep.subr.bf16.mxu0 %v878_v14  ;;  %v487_v13 = vld [vmem:[#allocation8 + $0x58] sm:$0xff] }
 0x1d9   : > { %v4346_v15 = vadd.f32 %v4274_v30, %v487_v13 }
 0x1db   : > { %3200 = vmatpush3.bf16.msra.mxu0 %v878_v14 }
 0x1dc   : > { %3417 = vmatprep.subr.msk.bf16.mxu0 %vm547_vm1, %v4248_v26 }
 0x1df   : > { %3166 = vmatpush3.bf16.xpose.msra.mxu1 %v576_v27  ;;  %v488_v27 = vld [vmem:[#allocation8 + $0x60] sm:$0xff] }
 0x1e0   : > { %3416 = vmatprep.subr.msk.bf16.mxu1 %vm547_vm1, %v532_v9  ;;  %v484_v9 = vld [vmem:[#allocation8 + $0x40] sm:$0xff]  ;;  %v4371_v29 = vadd.f32 %v4274_v30, %v488_v27 }
 0x1e1   : > { %v4339_v11 = vadd.f32 %v4274_v30, %v484_v9 }
 0x1e7   : > { %3168 = vmatpush3.bf16.xpose.msra.mxu1 %v573_v28 }
 0x1ee   : > { %3170 = vmatmul.mubr.msk.bf16.vlgmr.msra.gmra.mxu1 %vm547_vm1, %v4215_v2 }
 0x1ef   : > { %3173 = vmatprep.mubr.msk.bf16.mxu1 %vm547_vm1, %v4201_v56 }
 0x1f6   : > { %3174 = vmatmul.mubr.msk.bf16.gmra.mxu1 %vm547_vm1, %v4211_v0 }
 0x1f7   : > { %3177 = vmatprep.mubr.msk.bf16.mxu1 %vm547_vm1, %v4198_v50 }
 0x1fe   : > { %3178 = vmatmul.mubr.msk.bf16.gmra.mxu1 %vm547_vm1, %v4195_v44 }
 0x1ff   : > { %3181 = vmatprep.mubr.msk.bf16.mxu1 %vm547_vm1, %v4207_v61 }
 0x206   : > { %3182 = vmatmul.mubr.msk.bf16.gmra.mxu1 %vm547_vm1, %v4203_v57 }
 0x2ae   : > { %v3171_v36 = vpop.f32.mrf.mxu1 }
 0x2af   : > { %v4283_v37 = vadd.f32 %v3171_v36, %v4277_v32 }
 0x2b0   : > { %v630_v39 = vpop.f32.mrf.mxu1 }
 0x2b1   : > { %v4289_v42 = vadd.f32 %v630_v39, %v4280_v35  ;;  %697 = vmax.xlane.f32.xlu1 %v4283_v37  ;;  %v4378_v39 = vadd.f32 %v4274_v30, %v491_v33 }
 0x2b2   : > { %v3172_v43 = vpop.f32.mrf.mxu1 }
 0x2b3   : > { %v4293_v45 = vadd.f32 %v3172_v43, %v4286_v38  ;;  %693 = vmax.xlane.f32.xlu0 %v4289_v42  ;;  %v489_v43 = vld [vmem:[#allocation8 + $0x68] sm:$0xff] }
 0x2b4   : > { %v633_v48 = vpop.f32.mrf.mxu1 }
 0x2b5   : > { %699 = vmax.xlane.f32.xlu1 %v4293_v45  ;;  %v4304_v53 = vadd.f32 %v633_v48, %v4297_v46  ;;  %v4386_v48 = vadd.f32 %v4274_v30, %v489_v43  ;;  %v4409_v30 = vpop.permute.xlu0 %1054 }
 0x2b6   : > { %v3175_v51 = vpop.f32.mrf.mxu1 }
 0x2b7   : > { %v4307_v54 = vadd.f32 %v3175_v51, %v4300_v47 }
 0x2b8   : > { %v646_v58 = vpop.f32.mrf.mxu1 }
 0x2b9   : > { %695 = vmax.xlane.f32.xlu1 %v4304_v53  ;;  %705 = vmax.xlane.f32.xlu0 %v4307_v54  ;;  %v4318_v63 = vadd.f32 %v646_v58, %v4310_v55  ;;  %v4416_v52 = vpop.permute.xlu0 %1058 }
 0x2ba   : > { %v3176_v62 = vpop.f32.mrf.mxu1 }
 0x2bb   : > { %v4328_v6 = vadd.f32 %v3176_v62, %v4321_v1 }
 0x2bc   : > { %v649_v3 = vpop.f32.mrf.mxu1 }
 0x2bd   : > { %v4324_v5 = vadd.f32 %v649_v3, %v4315_v60  ;;  %701 = vmax.xlane.f32.xlu1 %v4318_v63 }
 0x2be   : > { %v3179_v8 = vpop.f32.mrf.mxu1 }
 0x2bf   : > { %703 = vmax.xlane.f32.xlu0 %v4324_v5  ;;  %v4336_v10 = vadd.f32 %v3179_v8, %v4331_v7 }
 0x2c0   : > { %v662_v12 = vpop.f32.mrf.mxu1 }
 0x2c1   : > { %707 = vmax.xlane.f32.xlu1 %v4328_v6  ;;  %v4343_v14 = vadd.f32 %v662_v12, %v4339_v11 }
 0x2c2   : > { %v3180_v17 = vpop.f32.mrf.mxu1 }
 0x2c3   : > { %v4350_v19 = vadd.f32 %v3180_v17, %v4346_v15 }
 0x2c4   : > { %v665_v21 = vpop.f32.mrf.mxu1 }
 0x2c5   : > { %713 = vmax.xlane.f32.xlu1 %v4336_v10  ;;  %v4357_v22 = vadd.f32 %v665_v21, %v4353_v20 }
 0x2c6   : > { %v3183_v25 = vpop.f32.mrf.mxu1 }
 0x2c7   : > { %v4368_v28 = vadd.f32 %v3183_v25, %v4365_v24 }
 0x2c8   : > { %v678_v31 = vpop.f32.mrf.mxu1 }
 0x2c9   : > { %709 = vmax.xlane.f32.xlu1 %v4343_v14  ;;  %v4375_v36 = vadd.f32 %v678_v31, %v4371_v29 }
 0x2ca   : > { %v3184_v40 = vpop.f32.mrf.mxu1 }
 0x2cb   : > { %v4382_v41 = vadd.f32 %v3184_v40, %v4378_v39 }
 0x2cc   : > { %v681_v49 = vpop.f32.mrf.mxu1 }
 0x2cd   : > { %715 = vmax.xlane.f32.xlu1 %v4350_v19  ;;  %v4389_v51 = vadd.f32 %v681_v49, %v4386_v48 }
 0x2d1   : > { %711 = vmax.xlane.f32.xlu1 %v4357_v22 }
 0x2d5   : > { %1050 = vrot.lane.b32.xlu0 %v4201_v56, %s3976_s24 }
 0x2e2   : > { %1052 = vrot.lane.b32.xlu1 %v4211_v0, %s3976_s24 }
 0x2f4   : > { %721 = vmax.xlane.f32.xlu0 %v4368_v28 }
 0x2f8   : > { %717 = vmax.xlane.f32.xlu0 %v4375_v36 }
 0x2fc   : > { %723 = vmax.xlane.f32.xlu0 %v4382_v41 }
 0x306   : > { %719 = vmax.xlane.f32.xlu1 %v4389_v51 }
 0x312   : > { %1048 = vrot.lane.b32.xlu0 %v4215_v2, %s3976_s24 }
 0x316   : > { %1030 = vrot.lane.b32.xlu0 %v4191_v34, %s3977_s13 }
 0x317   : > { %1046 = vrot.lane.b32.xlu1 %v4191_v34, %s3976_s24  ;;  %s3986_s24 = smov 16  }
 0x31a   : > { %1034 = vrot.lane.b32.xlu0 %v4201_v56, %s3977_s13 }
 0x31b   : > { %1032 = vrot.lane.b32.xlu1 %v4215_v2, %s3977_s13 }
 0x31e   : > { %1038 = vrot.lane.b32.xlu0 %v4198_v50, %s3977_s13 }
 0x31f   : > { %1036 = vrot.lane.b32.xlu1 %v4211_v0, %s3977_s13 }
 0x322   : > { %1042 = vrot.lane.b32.xlu0 %v4207_v61, %s3977_s13 }
 0x323   : > { %1040 = vrot.lane.b32.xlu1 %v4195_v44, %s3977_s13 }
 0x326   : > { %1405 = vrot.lane.b32.xlu0 %v4203_v57, %s3978_s10 }
 0x327   : > { %1044 = vrot.lane.b32.xlu1 %v4203_v57, %s3977_s13 }
 0x32a   : > { %1401 = vrot.lane.b32.xlu0 %v4195_v44, %s3978_s10 }
 0x32b   : > { %1403 = vrot.lane.b32.xlu1 %v4207_v61, %s3978_s10 }
 0x32e   : > { %1399 = vrot.lane.b32.xlu0 %v4198_v50, %s3978_s10 }
 0x32f   : > { %1395 = vrot.lane.b32.xlu1 %v4201_v56, %s3978_s10 }
 0x332   : > { %1397 = vrot.lane.b32.xlu0 %v4211_v0, %s3978_s10 }
 0x333   : > { %1391 = vrot.lane.b32.xlu1 %v4191_v34, %s3978_s10 }
 0x336   : > { %1393 = vrot.lane.b32.xlu0 %v4215_v2, %s3978_s10  ;;  %s5522_s10 = scalar_lea.hbm %s5580_s5, %s2994_s1 }
 0x337   : > { %1635 = vrot.lane.b32.xlu1 %v4195_v44, %s3979_s15 }
 0x33a   : > { %v698_v58 = vpop.xlane.xlu1 %697  ;;  %1639 = vrot.lane.b32.xlu0 %v4203_v57, %s3979_s15 }
 0x33b   : > { %v727_v8 = vsub.f32 %v4283_v37, %v698_v58 }
 0x33c   : > { %v694_v59 = vpop.xlane.xlu0 %693 }
 0x33d   : > { %v725_v62 = vsub.f32 %v4289_v42, %v694_v59  ;;  %v745_v21 = vmul.f32 1.442695, %v727_v8 }
 0x33e   : > { %v700_v3 = vpop.xlane.xlu1 %699  ;;  %1637 = vrot.lane.b32.xlu0 %v4207_v61, %s3979_s15 }
 0x33f   : > { %v728_v4 = vsub.f32 %v4293_v45, %v700_v3  ;;  %v741_v9 = vmul.f32 1.442695, %v725_v62 }
 0x341   : > { %v747_v12 = vmul.f32 1.442695, %v728_v4  ;;  %3545 = vpow2.f32 %v741_v9 }
 0x342   : > { %v696_v13 = vpop.xlane.xlu1 %695  ;;  %1633 = vrot.lane.b32.xlu0 %v4198_v50, %s3979_s15  ;;  %v706_v18 = vpop.xlane.xlu0 %705 }
 0x343   : > { %v726_v17 = vsub.f32 %v4304_v53, %v696_v13  ;;  %3547 = vpow2.f32 %v747_v12  ;;  %v731_v23 = vsub.f32 %v4307_v54, %v706_v18  ;;  %v1108_v13 = vsel %vm547_vm1, %v4248_v26, 0 }
 0x345   : > { %v743_v42 = vmul.f32 1.442695, %v726_v17  ;;  %v753_v33 = vmul.f32 1.442695, %v731_v23 }
 0x346   : > { %v702_v25 = vpop.xlane.xlu1 %701 }
 0x347   : > { %3549 = vpow2.f32 %v743_v42  ;;  %v729_v45 = vsub.f32 %v4318_v63, %v702_v25 }
 0x348   : > { %3551 = vpow2.f32 %v745_v21  ;;  %v704_v37 = vpop.xlane.xlu0 %703 }
 0x349   : > { %v749_v27 = vmul.f32 1.442695, %v729_v45  ;;  %v730_v31 = vsub.f32 %v4324_v5, %v704_v37 }
 0x34a   : > { %v708_v40 = vpop.xlane.xlu1 %707 }
 0x34b   : > { %v751_v43 = vmul.f32 1.442695, %v730_v31  ;;  %v732_v53 = vsub.f32 %v4328_v6, %v708_v40  ;;  %3553 = vpow2.f32 %v749_v27  ;;  %v1105_v27 = vsel %vm547_vm1, %v4416_v52, 0 }
 0x34d   : > { %3555 = vpow2.f32 %v751_v43  ;;  %v755_v49 = vmul.f32 1.442695, %v732_v53 }
 0x34e   : > { %3557 = vpow2.f32 %v753_v33  ;;  %v714_v58 = vpop.xlane.xlu1 %713  ;;  %v4432_v54 = vpop.eup %3545 }
 0x34f   : > { %3559 = vpow2.f32 %v755_v49  ;;  %5619 = vst [vmem:[#allocation13_spill] sm:$0xff] %v4432_v54  ;;  %v735_v12 = vsub.f32 %v4336_v10, %v714_v58 }
 0x350   : > { %v4434_v63 = vpop.eup %3547 }
 0x351   : > { %5620 = vst [vmem:[#allocation14_spill] sm:$0xff] %v4434_v63  ;;  %v761_v26 = vmul.f32 1.442695, %v735_v12 }
 0x352   : > { %v710_v59 = vpop.xlane.xlu1 %709 }
 0x353   : > { %v733_v5 = vsub.f32 %v4343_v14, %v710_v59  ;;  %v1051_v59 = vpop.permute.xlu0 %1050 }
 0x354   : > { %v4436_v62 = vpop.eup %3549 }
 0x355   : > { %5621 = vst [vmem:[#allocation15_spill] sm:$0xff] %v4436_v62  ;;  %v4438_v3 = vpop.eup %3551  ;;  %v869_v6 = vpack.c.bf16 %v4436_v62, %v4432_v54  ;;  %v757_v18 = vmul.f32 1.442695, %v733_v5 }
 0x356   : > { %5622 = vst [vmem:[#allocation16_spill] sm:$0xff] %v4438_v3  ;;  %v716_v4 = vpop.xlane.xlu1 %715  ;;  %v870_v8 = vpack.c.bf16 %v4434_v63, %v4438_v3 }
 0x357   : > { %v736_v9 = vsub.f32 %v4350_v19, %v716_v4  ;;  %3201 = vmatprep.mubr.bf16.mxu0 %v869_v6  ;;  %3561 = vpow2.f32 %v757_v18  ;;  %v1093_v6 = vsel %vm547_vm1, %v1051_v59, 0 }
 0x358   : > { %3202 = vmatmul.mubr.bf16.vlgmr.msra.gmra.mxu0 %v870_v8  ;;  %v4449_v17 = vpop.eup %3553 }
 0x359   : > { %5623 = vst [vmem:[#allocation17_spill] sm:$0xff] %v4449_v17  ;;  %3218 = vmatpush3.bf16.xpose.msra.mxu0 %v1108_v13  ;;  %v763_v21 = vmul.f32 1.442695, %v736_v9 }
 0x35a   : > { %v4451_v14 = vpop.eup %3555  ;;  %3418 = vmatprep.subr.msk.bf16.mxu0 %vm547_vm1, %v4416_v52  ;;  %v712_v42 = vpop.xlane.xlu1 %711 }
 0x35b   : > { %5624 = vst [vmem:[#allocation18_spill] sm:$0xff] %v4451_v14  ;;  %v4455_v23 = vpop.eup %3557  ;;  %v734_v19 = vsub.f32 %v4357_v22, %v712_v42  ;;  %v871_v10 = vpack.c.bf16 %v4451_v14, %v4449_v17  ;;  %3563 = vpow2.f32 %v763_v21  ;;  %v1102_v22 = vsel %vm547_vm1, %v4238_v16, 0 }
 0x35c   : > { %5625 = vst [vmem:[#allocation19_spill] sm:$0xff] %v4455_v23  ;;  %v4460_v25 = vpop.eup %3559 }
 0x35d   : > { %5626 = vst [vmem:[#allocation20_spill] sm:$0xff] %v4460_v25  ;;  %v759_v45 = vmul.f32 1.442695, %v734_v19  ;;  %3205 = vmatprep.mubr.bf16.mxu0 %v871_v10  ;;  %v872_v37 = vpack.c.bf16 %v4460_v25, %v4455_v23 }
 0x35e   : > { %v1053_v49 = vpop.permute.xlu1 %1052 }
 0x35f   : > { %3565 = vpow2.f32 %v759_v45  ;;  %v1096_v58 = vsel %vm547_vm1, %v1053_v49, 0 }
 0x360   : > { %3567 = vpow2.f32 %v761_v26  ;;  %3206 = vmatmul.mubr.bf16.gmra.mxu0 %v872_v37 }
 0x361   : > { %3220 = vmatpush3.bf16.xpose.msra.mxu0 %v1105_v27 }
 0x362   : > { %3419 = vmatprep.subr.msk.bf16.mxu0 %vm547_vm1, %v4238_v16  ;;  %v1099_v16 = vsel %vm547_vm1, %v4409_v30, 0 }
 0x364   : > { %v4470_v31 = vpop.eup %3561 }
 0x365   : > { %5627 = vst [vmem:[#allocation21_spill] sm:$0xff] %v4470_v31 }
 0x368   : > { %v4474_v33 = vpop.eup %3563 }
 0x369   : > { %3222 = vmatpush3.bf16.xpose.msra.mxu0 %v1102_v22  ;;  %5628 = vst [vmem:[#allocation22_spill] sm:$0xff] %v4474_v33 }
 0x36a   : > { %3420 = vmatprep.subr.msk.bf16.mxu0 %vm547_vm1, %v4409_v30 }
 0x36c   : > { %v4476_v40 = vpop.eup %3565 }
 0x36d   : > { %5629 = vst [vmem:[#allocation23_spill] sm:$0xff] %v4476_v40  ;;  %v4478_v43 = vpop.eup %3567  ;;  %v873_v52 = vpack.c.bf16 %v4476_v40, %v4470_v31 }
 0x36e   : > { %5630 = vst [vmem:[#allocation24_spill] sm:$0xff] %v4478_v43  ;;  %v874_v53 = vpack.c.bf16 %v4474_v33, %v4478_v43 }
 0x36f   : > { %3209 = vmatprep.mubr.bf16.mxu0 %v873_v52 }
 0x370   : > { %3210 = vmatmul.mubr.bf16.gmra.mxu0 %v874_v53 }
 0x371   : > { %3224 = vmatpush3.bf16.xpose.msra.mxu0 %v1099_v16 }
 0x372   : > { %3421 = vmatprep.subr.msk.bf16.mxu0 %vm547_vm1, %v1053_v49 }
 0x379   : > { %3226 = vmatpush3.bf16.xpose.msra.mxu0 %v1096_v58 }
 0x37a   : > { %3422 = vmatprep.subr.msk.bf16.mxu0 %vm547_vm1, %v1051_v59 }
 0x37d   : > { %v722_v5 = vpop.xlane.xlu0 %721 }
 0x37e   : > { %v739_v18 = vsub.f32 %v4368_v28, %v722_v5 }
 0x380   : > { %v769_v45 = vmul.f32 1.442695, %v739_v18 }
 0x381   : > { %3228 = vmatpush3.bf16.xpose.msra.mxu0 %v1093_v6  ;;  %v718_v4 = vpop.xlane.xlu0 %717 }
 0x382   : > { %v737_v12 = vsub.f32 %v4375_v36, %v718_v4 }
 0x384   : > { %v765_v42 = vmul.f32 1.442695, %v737_v12 }
 0x385   : > { %v724_v8 = vpop.xlane.xlu0 %723 }
 0x386   : > { %v740_v13 = vsub.f32 %v4382_v41, %v724_v8  ;;  %3569 = vpow2.f32 %v765_v42 }
 0x388   : > { %v771_v19 = vmul.f32 1.442695, %v740_v13 }
 0x389   : > { %v1049_v9 = vpop.permute.xlu0 %1048 }
 0x38a   : > { %3423 = vmatprep.subr.msk.bf16.mxu0 %vm547_vm1, %v1049_v9  ;;  %v1090_v30 = vsel %vm547_vm1, %v1049_v9, 0  ;;  %3571 = vpow2.f32 %v771_v19 }
 0x38b   : > { %3230 = vmatpush3.bf16.xpose.msra.mxu0 %v1090_v30 }
 0x38d   : > { %v1031_v21 = vpop.permute.xlu0 %1030 }
 0x38f   : > { %v720_v10 = vpop.xlane.xlu1 %719 }
 0x390   : > { %v738_v26 = vsub.f32 %v4389_v51, %v720_v10 }
 0x391   : > { %v1035_v37 = vpop.permute.xlu0 %1034 }
 0x392   : > { %v767_v27 = vmul.f32 1.442695, %v738_v26 }
 0x393   : > { %v1047_v36 = vpop.permute.xlu1 %1046  ;;  %v4498_v51 = vpop.eup %3569 }
 0x394   : > { %3573 = vpow2.f32 %v767_v27  ;;  %3424 = vmatprep.subr.msk.bf16.mxu0 %vm547_vm1, %v1047_v36  ;;  %v1087_v41 = vsel %vm547_vm1, %v1047_v36, 0  ;;  %5631 = vst [vmem:[#allocation25_spill] sm:$0xff] %v4498_v51 }
 0x395   : > { %3575 = vpow2.f32 %v769_v45  ;;  %3232 = vmatpush3.bf16.xpose.msra.mxu0 %v1087_v41  ;;  %v1039_v28 = vpop.permute.xlu0 %1038 }
 0x397   : > { %v1033_v22 = vpop.permute.xlu1 %1032  ;;  %v4500_v58 = vpop.eup %3571 }
 0x398   : > { %5632 = vst [vmem:[#allocation26_spill] sm:$0xff] %v4500_v58 }
 0x399   : > { %v1043_v52 = vpop.permute.xlu0 %1042 }
 0x39b   : > { %v1037_v53 = vpop.permute.xlu1 %1036 }
 0x39d   : > { %v1406_v16 = vpop.permute.xlu0 %1405 }
 0x39e   : > { %3249 = vmatprep.subr.bf16.mxu1 %v1406_v16 }
 0x39f   : > { %v1041_v49 = vpop.permute.xlu1 %1040  ;;  %3250 = vmatpush3.bf16.msra.mxu1 %v1406_v16 }
 0x3a1   : > { %v4502_v59 = vpop.eup %3573  ;;  %v1402_v9 = vpop.permute.xlu0 %1401 }
 0x3a2   : > { %5633 = vst [vmem:[#allocation27_spill] sm:$0xff] %v4502_v59  ;;  %v4504_v5 = vpop.eup %3575  ;;  %v875_v6 = vpack.c.bf16 %v4502_v59, %v4498_v51 }
 0x3a3   : > { %5634 = vst [vmem:[#allocation28_spill] sm:$0xff] %v4504_v5  ;;  %v1045_v4 = vpop.permute.xlu1 %1044  ;;  %v876_v8 = vpack.c.bf16 %v4500_v58, %v4504_v5 }
 0x3a4   : > { %3213 = vmatprep.mubr.bf16.mxu0 %v875_v6 }
 0x3a5   : > { %3214 = vmatmul.mubr.bf16.gmra.mxu0 %v876_v8  ;;  %v1400_v30 = vpop.permute.xlu0 %1399 }
 0x3a6   : > { %3233 = vmatprep.mubr.msk.bf16.mxu0 %vm547_vm1, %v1031_v21 }
 0x3a7   : > { %v1404_v12 = vpop.permute.xlu1 %1403 }
 0x3a8   : > { %3251 = vmatprep.subr.bf16.mxu1 %v1404_v12 }
 0x3a9   : > { %3252 = vmatpush3.bf16.msra.mxu1 %v1404_v12  ;;  %v1398_v13 = vpop.permute.xlu0 %1397 }
 0x3aa   : > { %3253 = vmatprep.subr.bf16.mxu1 %v1402_v9 }
 0x3ab   : > { %v1396_v18 = vpop.permute.xlu1 %1395 }
 0x3ad   : > { %3234 = vmatmul.mubr.msk.bf16.vlgmr.msra.gmra.mxu0 %vm547_vm1, %v1033_v22  ;;  %3254 = vmatpush3.bf16.msra.mxu1 %v1402_v9  ;;  %v1394_v21 = vpop.permute.xlu0 %1393 }
 0x3ae   : > { %3237 = vmatprep.mubr.msk.bf16.mxu0 %vm547_vm1, %v1035_v37  ;;  %3255 = vmatprep.subr.bf16.mxu1 %v1400_v30 }
 0x3af   : > { %v1392_v42 = vpop.permute.xlu1 %1391 }
 0x3b1   : > { %3256 = vmatpush3.bf16.msra.mxu1 %v1400_v30  ;;  %v4517_v19 = vpop.permute.xlu0 %1639 }
 0x3b2   : > { %3257 = vmatprep.subr.bf16.mxu1 %v1398_v13 }
 0x3b5   : > { %3238 = vmatmul.mubr.msk.bf16.gmra.mxu0 %vm547_vm1, %v1037_v53  ;;  %3258 = vmatpush3.bf16.msra.mxu1 %v1398_v13 }
 0x3b6   : > { %3241 = vmatprep.mubr.msk.bf16.mxu0 %vm547_vm1, %v1039_v28  ;;  %3259 = vmatprep.subr.bf16.mxu1 %v1396_v18 }
 0x3b9   : > { %3260 = vmatpush3.bf16.msra.mxu1 %v1396_v18 }
 0x3ba   : > { %3261 = vmatprep.subr.bf16.mxu1 %v1394_v21 }
 0x3bd   : > { %3242 = vmatmul.mubr.msk.bf16.gmra.mxu0 %vm547_vm1, %v1041_v49  ;;  %3262 = vmatpush3.bf16.msra.mxu1 %v1394_v21 }
 0x3be   : > { %3245 = vmatprep.mubr.msk.bf16.mxu0 %vm547_vm1, %v1043_v52  ;;  %3263 = vmatprep.subr.bf16.mxu1 %v1392_v42 }
 0x3c1   : > { %3264 = vmatpush3.bf16.msra.mxu1 %v1392_v42 }
 0x3c2   : > { %3425 = vmatprep.subr.msk.bf16.mxu1 %vm547_vm1, %v4517_v19 }
 0x3c5   : > { %3246 = vmatmul.mubr.msk.bf16.gmra.mxu0 %vm547_vm1, %v1045_v4 }
 0x418   : > { %v4522_v10 = vpop.f32.mrf.mxu0 }
 0x419   : > { %5635 = vst [vmem:[#allocation29_spill] sm:$0xff] %v4522_v10 }
 0x41a   : > { %v4524_v26 = vpop.f32.mrf.mxu0 }
 0x41b   : > { %5636 = vst [vmem:[#allocation30_spill] sm:$0xff] %v4524_v26 }
 0x41c   : > { %v4526_v45 = vpop.f32.mrf.mxu0 }
 0x41d   : > { %5637 = vst [vmem:[#allocation31_spill] sm:$0xff] %v4526_v45 }
 0x41e   : > { %v4528_v37 = vpop.f32.mrf.mxu0 }
 0x41f   : > { %5638 = vst [vmem:[#allocation32_spill] sm:$0xff] %v4528_v37 }
 0x420   : > { %v4530_v27 = vpop.f32.mrf.mxu0 }
 0x421   : > { %5639 = vst [vmem:[#allocation33_spill] sm:$0xff] %v4530_v27 }
 0x422   : > { %v4532_v36 = vpop.f32.mrf.mxu0 }
 0x423   : > { %5640 = vst [vmem:[#allocation34_spill] sm:$0xff] %v4532_v36 }
 0x424   : > { %v4534_v41 = vpop.f32.mrf.mxu0 }
 0x425   : > { %5641 = vst [vmem:[#allocation35_spill] sm:$0xff] %v4534_v41 }
 0x426   : > { %v4536_v28 = vpop.f32.mrf.mxu0 }
 0x427   : > { %5642 = vst [vmem:[#allocation36_spill] sm:$0xff] %v4536_v28 }
 0x430   : > { %v4538_v22 = vpop.f32.mrf.mxu0 }
 0x431   : > { %5643 = vst [vmem:[#allocation37_spill] sm:$0xff] %v4538_v22 }
 0x432   : > { %v4540_v52 = vpop.f32.mrf.mxu0 }
 0x433   : > { %5644 = vst [vmem:[#allocation38_spill] sm:$0xff] %v4540_v52 }
 0x434   : > { %v4542_v53 = vpop.f32.mrf.mxu0 }
 0x435   : > { %5645 = vst [vmem:[#allocation39_spill] sm:$0xff] %v4542_v53 }
 0x436   : > { %v4544_v16 = vpop.f32.mrf.mxu0 }
 0x437   : > { %5646 = vst [vmem:[#allocation40_spill] sm:$0xff] %v4544_v16 }
 0x465   : > { %v4546_v49 = vpop.f32.mrf.mxu0 }
 0x466   : > { %5647 = vst [vmem:[#allocation41_spill] sm:$0xff] %v4546_v49 }
 0x467   : > { %v4548_v6 = vpop.f32.mrf.mxu0 }
 0x468   : > { %5648 = vst [vmem:[#allocation42_spill] sm:$0xff] %v4548_v6 }
 0x469   : > { %v4550_v4 = vpop.f32.mrf.mxu0 }
 0x46a   : > { %5649 = vst [vmem:[#allocation43_spill] sm:$0xff] %v4550_v4 }
 0x46b   : > { %v4552_v8 = vpop.f32.mrf.mxu0 }
 0x46c   : > { %5650 = vst [vmem:[#allocation44_spill] sm:$0xff] %v4552_v8 }
 0x46d   : > { %v3235_v9 = vpop.f32.mrf.mxu0 }
 0x46e   : > { %v4555_v12 = vadd.f32 %v3235_v9, %v4277_v32 }
 0x46f   : > { %v1144_v30 = vpop.f32.mrf.mxu0 }
 0x470   : > { %v4558_v13 = vadd.f32 %v1144_v30, %v4280_v35  ;;  %1211 = vmax.xlane.f32.xlu1 %v4555_v12 }
 0x471   : > { %v3236_v18 = vpop.f32.mrf.mxu0 }
 0x472   : > { %v4562_v21 = vadd.f32 %v3236_v18, %v4286_v38  ;;  %1207 = vmax.xlane.f32.xlu0 %v4558_v13 }
 0x473   : > { %v1147_v42 = vpop.f32.mrf.mxu0 }
 0x474   : > { %1213 = vmax.xlane.f32.xlu1 %v4562_v21  ;;  %v4567_v8 = vadd.f32 %v1147_v42, %v4297_v46 }
 0x475   : > { %v3239_v4 = vpop.f32.mrf.mxu0 }
 0x476   : > { %v4570_v9 = vadd.f32 %v3239_v4, %v4300_v47 }
 0x477   : > { %v1160_v30 = vpop.f32.mrf.mxu0 }
 0x478   : > { %1209 = vmax.xlane.f32.xlu1 %v4567_v8  ;;  %1219 = vmax.xlane.f32.xlu0 %v4570_v9  ;;  %v4575_v18 = vadd.f32 %v1160_v30, %v4310_v55 }
 0x479   : > { %v3240_v49 = vpop.f32.mrf.mxu0 }
 0x47a   : > { %v4582_v42 = vadd.f32 %v3240_v49, %v4321_v1 }
 0x47b   : > { %v1163_v53 = vpop.f32.mrf.mxu0 }
 0x47c   : > { %v4578_v6 = vadd.f32 %v1163_v53, %v4315_v60  ;;  %1215 = vmax.xlane.f32.xlu1 %v4575_v18 }
 0x47d   : > { %v3243_v4 = vpop.f32.mrf.mxu0 }
 0x47e   : > { %1217 = vmax.xlane.f32.xlu0 %v4578_v6  ;;  %v4587_v16 = vadd.f32 %v3243_v4, %v4331_v7 }
 0x47f   : > { %v1176_v22 = vpop.f32.mrf.mxu0 }
 0x480   : > { %1221 = vmax.xlane.f32.xlu1 %v4582_v42  ;;  %v4591_v30 = vadd.f32 %v1176_v22, %v4339_v11 }
 0x481   : > { %v3244_v53 = vpop.f32.mrf.mxu0 }
 0x482   : > { %v4595_v49 = vadd.f32 %v3244_v53, %v4346_v15 }
 0x483   : > { %v1179_v41 = vpop.f32.mrf.mxu0 }
 0x484   : > { %1227 = vmax.xlane.f32.xlu1 %v4587_v16  ;;  %v4599_v52 = vadd.f32 %v1179_v41, %v4353_v20 }
 0x485   : > { %v3247_v22 = vpop.f32.mrf.mxu0 }
 0x486   : > { %v4607_v4 = vadd.f32 %v3247_v22, %v4365_v24  ;;  %v4643_v22 = vpop.permute.xlu1 %1635 }
 0x487   : > { %v1192_v53 = vpop.f32.mrf.mxu0 }
 0x488   : > { %1223 = vmax.xlane.f32.xlu1 %v4591_v30  ;;  %v4611_v28 = vadd.f32 %v1192_v53, %v4371_v29 }
 0x489   : > { %v3248_v41 = vpop.f32.mrf.mxu0 }
 0x48a   : > { %v4615_v27 = vadd.f32 %v3248_v41, %v4378_v39 }
 0x48b   : > { %v1195_v45 = vpop.f32.mrf.mxu0 }
 0x48c   : > { %1229 = vmax.xlane.f32.xlu1 %v4595_v49  ;;  %v4619_v36 = vadd.f32 %v1195_v45, %v4386_v48  ;;  %v4639_v45 = vpop.permute.xlu0 %1637 }
 0x490   : > { %1225 = vmax.xlane.f32.xlu1 %v4599_v52  ;;  %v4648_v53 = vpop.permute.xlu0 %1633 }
 0x494   : > { %1629 = vrot.lane.b32.xlu0 %v4201_v56, %s3979_s15 }
 0x4a1   : > { %1631 = vrot.lane.b32.xlu1 %v4211_v0, %s3979_s15 }
 0x4b3   : > { %1235 = vmax.xlane.f32.xlu0 %v4607_v4 }
 0x4b7   : > { %1231 = vmax.xlane.f32.xlu0 %v4611_v28 }
 0x4bb   : > { %1237 = vmax.xlane.f32.xlu0 %v4615_v27 }
 0x4c5   : > { %1233 = vmax.xlane.f32.xlu1 %v4619_v36 }
 0x4d1   : > { %1627 = vrot.lane.b32.xlu0 %v4215_v2, %s3979_s15 }
 0x4d5   : > { %1609 = vrot.lane.b32.xlu0 %v4191_v34, %s3980_s16 }
 0x4d6   : > { %1625 = vrot.lane.b32.xlu1 %v4191_v34, %s3979_s15  ;;  %s2800_s15 = scalar_lea.sflag [#allocation5], %s4148_s12 }
 0x4d9   : > { %1613 = vrot.lane.b32.xlu0 %v4201_v56, %s3980_s16 }
 0x4da   : > { %1611 = vrot.lane.b32.xlu1 %v4215_v2, %s3980_s16 }
 0x4dd   : > { %1617 = vrot.lane.b32.xlu0 %v4198_v50, %s3980_s16 }
 0x4de   : > { %1615 = vrot.lane.b32.xlu1 %v4211_v0, %s3980_s16 }
 0x4e1   : > { %1621 = vrot.lane.b32.xlu0 %v4207_v61, %s3980_s16 }
 0x4e2   : > { %1619 = vrot.lane.b32.xlu1 %v4195_v44, %s3980_s16 }
 0x4e5   : > { %1984 = vrot.lane.b32.xlu0 %v4203_v57, %s3981_s6 }
 0x4e6   : > { %1623 = vrot.lane.b32.xlu1 %v4203_v57, %s3980_s16  ;;  %s3881_s16 = scalar_lea.vmem %s5524_s11, 2048 }
 0x4e7   : > { %p3882_p9 = scmp.ne.s32.totalorder %s5524_s11, %s3881_s16 }
 0x4e9   : > { %1980 = vrot.lane.b32.xlu0 %v4195_v44, %s3981_s6  ;;  %p3883_p11 = pnand %p3882_p9, %p4118_p7 }
 0x4ea   : > { %1982 = vrot.lane.b32.xlu1 %v4207_v61, %s3981_s6 }
 0x4eb   : > { %p3884_p2 = pneg %p3883_p11 }
 0x4ed   : > { %1978 = vrot.lane.b32.xlu0 %v4198_v50, %s3981_s6 }
 0x4ee   : > { %1974 = vrot.lane.b32.xlu1 %v4201_v56, %s3981_s6 }
 0x4f1   : > { %1976 = vrot.lane.b32.xlu0 %v4211_v0, %s3981_s6 }
 0x4f2   : > { %1970 = vrot.lane.b32.xlu1 %v4191_v34, %s3981_s6 }
 0x4f5   : > { %1972 = vrot.lane.b32.xlu0 %v4215_v2, %s3981_s6  ;;  %s3885_s6 = sshll.u32 %s3988_s21, 4  ;;  %s3886_s6 = int_to_ptr.vmem [resolvable:$false] %s3885_s6 }
 0x4f6   : > { %2214 = vrot.lane.b32.xlu1 %v4195_v44, %s3982_s26  ;;  %p3888_p13 = scmp.lt.s32.totalorder %s5524_s11, %s3886_s6 }
 0x4f9   : > { %v1212_v41 = vpop.xlane.xlu1 %1211  ;;  %2218 = vrot.lane.b32.xlu0 %v4203_v57, %s3982_s26 }
 0x4fa   : > { %v1241_v59 = vsub.f32 %v4555_v12, %v1212_v41 }
 0x4fb   : > { %v1208_v37 = vpop.xlane.xlu0 %1207 }
 0x4fc   : > { %v1239_v10 = vsub.f32 %v4558_v13, %v1208_v37  ;;  %v1259_v25 = vmul.f32 1.442695, %v1241_v59 }
 0x4fd   : > { %v1214_v26 = vpop.xlane.xlu1 %1213  ;;  %2216 = vrot.lane.b32.xlu0 %v4207_v61, %s3982_s26 }
 0x4fe   : > { %v1242_v58 = vsub.f32 %v4562_v21, %v1214_v26  ;;  %v1255_v5 = vmul.f32 1.442695, %v1239_v10 }
 0x500   : > { %v1261_v33 = vmul.f32 1.442695, %v1242_v58  ;;  %3577 = vpow2.f32 %v1255_v5 }
 0x501   : > { %v1210_v51 = vpop.xlane.xlu1 %1209  ;;  %2212 = vrot.lane.b32.xlu0 %v4198_v50, %s3982_s26  ;;  %v1220_v43 = vpop.xlane.xlu0 %1219 }
 0x502   : > { %v1240_v40 = vsub.f32 %v4567_v8, %v1210_v51  ;;  %3579 = vpow2.f32 %v1261_v33  ;;  %v1245_v13 = vsub.f32 %v4570_v9, %v1220_v43 }
 0x504   : > { %v1257_v37 = vmul.f32 1.442695, %v1240_v40  ;;  %v1267_v21 = vmul.f32 1.442695, %v1245_v13 }
 0x505   : > { %v1216_v31 = vpop.xlane.xlu1 %1215 }
 0x506   : > { %3581 = vpow2.f32 %v1257_v37  ;;  %v1243_v26 = vsub.f32 %v4575_v18, %v1216_v31  ;;  %v1687_v37 = vsel %vm547_vm1, %v4517_v19, 0 }
 0x507   : > { %3583 = vpow2.f32 %v1259_v25  ;;  %v1218_v10 = vpop.xlane.xlu0 %1217 }
 0x508   : > { %v1263_v58 = vmul.f32 1.442695, %v1243_v26  ;;  %v1244_v12 = vsub.f32 %v4578_v6, %v1218_v10 }
 0x509   : > { %v1222_v41 = vpop.xlane.xlu1 %1221 }
 0x50a   : > { %v1265_v14 = vmul.f32 1.442695, %v1244_v12  ;;  %v1246_v51 = vsub.f32 %v4582_v42, %v1222_v41  ;;  %3585 = vpow2.f32 %v1263_v58 }
 0x50c   : > { %3587 = vpow2.f32 %v1265_v14  ;;  %v1269_v40 = vmul.f32 1.442695, %v1246_v51 }
 0x50d   : > { %3589 = vpow2.f32 %v1267_v21  ;;  %v1228_v33 = vpop.xlane.xlu1 %1227  ;;  %v4664_v43 = vpop.eup %3577 }
 0x50e   : > { %3591 = vpow2.f32 %v1269_v40  ;;  %v1249_v42 = vsub.f32 %v4587_v16, %v1228_v33  ;;  %v1684_v40 = vsel %vm547_vm1, %v4639_v45, 0 }
 0x50f   : > { %v4666_v31 = vpop.eup %3579 }
 0x510   : > { %v1275_v19 = vmul.f32 1.442695, %v1249_v42  ;;  %v1630_v42 = vpop.permute.xlu0 %1629 }
 0x511   : > { %v1224_v59 = vpop.xlane.xlu1 %1223 }
 0x512   : > { %v1247_v6 = vsub.f32 %v4591_v30, %v1224_v59 }
 0x513   : > { %v4668_v25 = vpop.eup %3581 }
 0x514   : > { %v4670_v5 = vpop.eup %3583  ;;  %v1383_v8 = vpack.c.bf16 %v4668_v25, %v4664_v43  ;;  %v1271_v26 = vmul.f32 1.442695, %v1247_v6 }
 0x515   : > { %v1230_v9 = vpop.xlane.xlu1 %1229  ;;  %v1384_v14 = vpack.c.bf16 %v4666_v31, %v4670_v5 }
 0x516   : > { %v1250_v18 = vsub.f32 %v4595_v49, %v1230_v9  ;;  %3265 = vmatprep.mubr.bf16.mxu1 %v1383_v8  ;;  %3593 = vpow2.f32 %v1271_v26  ;;  %v1672_v26 = vsel %vm547_vm1, %v1630_v42, 0 }
 0x517   : > { %3266 = vmatmul.mubr.bf16.vlgmr.msra.gmra.mxu1 %v1384_v14  ;;  %v4681_v13 = vpop.eup %3585 }
 0x518   : > { %3282 = vmatpush3.bf16.xpose.msra.mxu1 %v1687_v37  ;;  %v1277_v10 = vmul.f32 1.442695, %v1250_v18 }
 0x519   : > { %v4683_v30 = vpop.eup %3587  ;;  %3426 = vmatprep.subr.msk.bf16.mxu1 %vm547_vm1, %v4639_v45  ;;  %v1226_v58 = vpop.xlane.xlu1 %1225 }
 0x51a   : > { %v4687_v12 = vpop.eup %3589  ;;  %v1248_v49 = vsub.f32 %v4599_v52, %v1226_v58  ;;  %v1385_v16 = vpack.c.bf16 %v4683_v30, %v4681_v13  ;;  %3595 = vpow2.f32 %v1277_v10  ;;  %v1681_v52 = vsel %vm547_vm1, %v4643_v22, 0 }
 0x51b   : > { %v4692_v21 = vpop.eup %3591 }
 0x51c   : > { %v1273_v41 = vmul.f32 1.442695, %v1248_v49  ;;  %3269 = vmatprep.mubr.bf16.mxu1 %v1385_v16  ;;  %v1386_v51 = vpack.c.bf16 %v4692_v21, %v4687_v12 }
 0x51d   : > { %v1632_v14 = vpop.permute.xlu1 %1631 }
 0x51e   : > { %3597 = vpow2.f32 %v1273_v41  ;;  %v1675_v18 = vsel %vm547_vm1, %v1632_v14, 0 }
 0x51f   : > { %3599 = vpow2.f32 %v1275_v19  ;;  %3270 = vmatmul.mubr.bf16.gmra.mxu1 %v1386_v51 }
 0x520   : > { %3284 = vmatpush3.bf16.xpose.msra.mxu1 %v1684_v40 }
 0x521   : > { %3427 = vmatprep.subr.msk.bf16.mxu1 %vm547_vm1, %v4643_v22  ;;  %v1678_v22 = vsel %vm547_vm1, %v4648_v53, 0 }
 0x523   : > { %v4702_v33 = vpop.eup %3593 }
 0x527   : > { %v4706_v59 = vpop.eup %3595 }
 0x528   : > { %3286 = vmatpush3.bf16.xpose.msra.mxu1 %v1681_v52 }
 0x529   : > { %3428 = vmatprep.subr.msk.bf16.mxu1 %vm547_vm1, %v4648_v53 }
 0x52b   : > { %v4708_v6 = vpop.eup %3597 }
 0x52c   : > { %v4710_v8 = vpop.eup %3599  ;;  %v1387_v45 = vpack.c.bf16 %v4708_v6, %v4702_v33 }
 0x52d   : > { %v1388_v9 = vpack.c.bf16 %v4706_v59, %v4710_v8 }
 0x52e   : > { %3273 = vmatprep.mubr.bf16.mxu1 %v1387_v45 }
 0x52f   : > { %3274 = vmatmul.mubr.bf16.gmra.mxu1 %v1388_v9 }
 0x530   : > { %3288 = vmatpush3.bf16.xpose.msra.mxu1 %v1678_v22 }
 0x531   : > { %3429 = vmatprep.subr.msk.bf16.mxu1 %vm547_vm1, %v1632_v14 }
 0x538   : > { %3290 = vmatpush3.bf16.xpose.msra.mxu1 %v1675_v18 }
 0x539   : > { %3430 = vmatprep.subr.msk.bf16.mxu1 %vm547_vm1, %v1630_v42 }
 0x53c   : > { %v1236_v37 = vpop.xlane.xlu0 %1235 }
 0x53d   : > { %v1253_v41 = vsub.f32 %v4607_v4, %v1236_v37 }
 0x53f   : > { %v1283_v22 = vmul.f32 1.442695, %v1253_v41 }
 0x540   : > { %3292 = vmatpush3.bf16.xpose.msra.mxu1 %v1672_v26  ;;  %v1232_v10 = vpop.xlane.xlu0 %1231 }
 0x541   : > { %v1251_v16 = vsub.f32 %v4611_v28, %v1232_v10 }
 0x543   : > { %v1279_v40 = vmul.f32 1.442695, %v1251_v16 }
 0x544   : > { %v1238_v58 = vpop.xlane.xlu0 %1237 }
 0x545   : > { %v1254_v19 = vsub.f32 %v4615_v27, %v1238_v58  ;;  %3601 = vpow2.f32 %v1279_v40 }
 0x547   : > { %v1285_v52 = vmul.f32 1.442695, %v1254_v19 }
 0x548   : > { %v1628_v49 = vpop.permute.xlu0 %1627 }
 0x549   : > { %3431 = vmatprep.subr.msk.bf16.mxu1 %vm547_vm1, %v1628_v49  ;;  %v1669_v53 = vsel %vm547_vm1, %v1628_v49, 0  ;;  %3603 = vpow2.f32 %v1285_v52 }
 0x54a   : > { %3294 = vmatpush3.bf16.xpose.msra.mxu1 %v1669_v53 }
 0x54c   : > { %v1610_v51 = vpop.permute.xlu0 %1609 }
 0x54e   : > { %v1234_v45 = vpop.xlane.xlu1 %1233 }
 0x54f   : > { %v1252_v9 = vsub.f32 %v4619_v36, %v1234_v45 }
 0x550   : > { %v1614_v14 = vpop.permute.xlu0 %1613 }
 0x551   : > { %v1281_v18 = vmul.f32 1.442695, %v1252_v9 }
 0x552   : > { %v1626_v28 = vpop.permute.xlu1 %1625  ;;  %v4730_v36 = vpop.eup %3601 }
 0x553   : > { %3605 = vpow2.f32 %v1281_v18  ;;  %3432 = vmatprep.subr.msk.bf16.mxu1 %vm547_vm1, %v1626_v28  ;;  %v1666_v27 = vsel %vm547_vm1, %v1626_v28, 0 }
 0x554   : > { %3607 = vpow2.f32 %v1283_v22  ;;  %3296 = vmatpush3.bf16.xpose.msra.mxu1 %v1666_v27  ;;  %v1618_v4 = vpop.permute.xlu0 %1617 }
 0x556   : > { %v1612_v42 = vpop.permute.xlu1 %1611  ;;  %v4732_v49 = vpop.eup %3603 }
 0x557   : > { %5651 = vst [vmem:[#allocation45_spill] sm:$0xff] %v4732_v49 }
 0x558   : > { %v1622_v37 = vpop.permute.xlu0 %1621 }
 0x55a   : > { %v1616_v26 = vpop.permute.xlu1 %1615 }
 0x55c   : > { %v1985_v10 = vpop.permute.xlu0 %1984 }
 0x55d   : > { %3313 = vmatprep.subr.bf16.mxu0 %v1985_v10 }
 0x55e   : > { %v1620_v58 = vpop.permute.xlu1 %1619  ;;  %3314 = vmatpush3.bf16.msra.mxu0 %v1985_v10 }
 0x560   : > { %v4734_v16 = vpop.eup %3605  ;;  %v1981_v52 = vpop.permute.xlu0 %1980 }
 0x561   : > { %5652 = vst [vmem:[#allocation46_spill] sm:$0xff] %v4734_v16  ;;  %v4736_v53 = vpop.eup %3607  ;;  %v1389_v19 = vpack.c.bf16 %v4734_v16, %v4730_v36 }
 0x562   : > { %5653 = vst [vmem:[#allocation47_spill] sm:$0xff] %v4736_v53  ;;  %v1624_v41 = vpop.permute.xlu1 %1623  ;;  %v1390_v40 = vpack.c.bf16 %v4732_v49, %v4736_v53 }
 0x563   : > { %3277 = vmatprep.mubr.bf16.mxu1 %v1389_v19 }
 0x564   : > { %3278 = vmatmul.mubr.bf16.gmra.mxu1 %v1390_v40  ;;  %v1979_v9 = vpop.permute.xlu0 %1978 }
 0x565   : > { %3297 = vmatprep.mubr.msk.bf16.mxu1 %vm547_vm1, %v1610_v51 }
 0x566   : > { %v1983_v45 = vpop.permute.xlu1 %1982 }
 0x567   : > { %3315 = vmatprep.subr.bf16.mxu0 %v1983_v45 }
 0x568   : > { %3316 = vmatpush3.bf16.msra.mxu0 %v1983_v45  ;;  %v1977_v22 = vpop.permute.xlu0 %1976 }
 0x569   : > { %3317 = vmatprep.subr.bf16.mxu0 %v1981_v52 }
 0x56a   : > { %v1975_v18 = vpop.permute.xlu1 %1974 }
 0x56c   : > { %3298 = vmatmul.mubr.msk.bf16.vlgmr.msra.gmra.mxu1 %vm547_vm1, %v1612_v42  ;;  %3318 = vmatpush3.bf16.msra.mxu0 %v1981_v52  ;;  %v1973_v51 = vpop.permute.xlu0 %1972 }
 0x56d   : > { %3301 = vmatprep.mubr.msk.bf16.mxu1 %vm547_vm1, %v1614_v14  ;;  %3319 = vmatprep.subr.bf16.mxu0 %v1979_v9 }
 0x56e   : > { %v1971_v28 = vpop.permute.xlu1 %1970 }
 0x570   : > { %3320 = vmatpush3.bf16.msra.mxu0 %v1979_v9  ;;  %v4749_v14 = vpop.permute.xlu0 %2218 }
 0x571   : > { %3321 = vmatprep.subr.bf16.mxu0 %v1977_v22 }
 0x574   : > { %3302 = vmatmul.mubr.msk.bf16.gmra.mxu1 %vm547_vm1, %v1616_v26  ;;  %3322 = vmatpush3.bf16.msra.mxu0 %v1977_v22 }
 0x575   : > { %3305 = vmatprep.mubr.msk.bf16.mxu1 %vm547_vm1, %v1618_v4  ;;  %3323 = vmatprep.subr.bf16.mxu0 %v1975_v18 }
 0x578   : > { %3324 = vmatpush3.bf16.msra.mxu0 %v1975_v18 }
 0x579   : > { %3325 = vmatprep.subr.bf16.mxu0 %v1973_v51 }
 0x57c   : > { %3306 = vmatmul.mubr.msk.bf16.gmra.mxu1 %vm547_vm1, %v1620_v58  ;;  %3326 = vmatpush3.bf16.msra.mxu0 %v1973_v51 }
 0x57d   : > { %3309 = vmatprep.mubr.msk.bf16.mxu1 %vm547_vm1, %v1622_v37  ;;  %3327 = vmatprep.subr.bf16.mxu0 %v1971_v28 }
 0x580   : > { %3328 = vmatpush3.bf16.msra.mxu0 %v1971_v28 }
 0x581   : > { %3433 = vmatprep.subr.msk.bf16.mxu0 %vm547_vm1, %v4749_v14 }
 0x584   : > { %3310 = vmatmul.mubr.msk.bf16.gmra.mxu1 %vm547_vm1, %v1624_v41 }
 0x5d7   : > { %v4754_v27 = vpop.f32.mrf.mxu1 }
 0x5d8   : > { %5654 = vst [vmem:[#allocation48_spill] sm:$0xff] %v4754_v27 }
 0x5d9   : > { %v4756_v4 = vpop.f32.mrf.mxu1 }
 0x5da   : > { %5655 = vst [vmem:[#allocation49_spill] sm:$0xff] %v4756_v4 }
 0x5db   : > { %v4758_v42 = vpop.f32.mrf.mxu1 }
 0x5dc   : > { %5656 = vst [vmem:[#allocation50_spill] sm:$0xff] %v4758_v42 }
 0x5dd   : > { %v4760_v26 = vpop.f32.mrf.mxu1 }
 0x5de   : > { %5657 = vst [vmem:[#allocation51_spill] sm:$0xff] %v4760_v26 }
 0x5df   : > { %v4762_v10 = vpop.f32.mrf.mxu1 }
 0x5e0   : > { %5658 = vst [vmem:[#allocation52_spill] sm:$0xff] %v4762_v10 }
 0x5e1   : > { %v4764_v37 = vpop.f32.mrf.mxu1 }
 0x5e2   : > { %5659 = vst [vmem:[#allocation53_spill] sm:$0xff] %v4764_v37 }
 0x5e3   : > { %v4766_v58 = vpop.f32.mrf.mxu1 }
 0x5e4   : > { %5660 = vst [vmem:[#allocation54_spill] sm:$0xff] %v4766_v58 }
 0x5e5   : > { %v4768_v19 = vpop.f32.mrf.mxu1 }
 0x5e6   : > { %5661 = vst [vmem:[#allocation55_spill] sm:$0xff] %v4768_v19 }
 0x5ef   : > { %v4770_v40 = vpop.f32.mrf.mxu1 }
 0x5f0   : > { %5662 = vst [vmem:[#allocation56_spill] sm:$0xff] %v4770_v40 }
 0x5f1   : > { %v4772_v52 = vpop.f32.mrf.mxu1 }
 0x5f2   : > { %5663 = vst [vmem:[#allocation57_spill] sm:$0xff] %v4772_v52 }
 0x5f3   : > { %v4774_v41 = vpop.f32.mrf.mxu1 }
 0x5f4   : > { %5664 = vst [vmem:[#allocation58_spill] sm:$0xff] %v4774_v41 }
 0x5f5   : > { %v4776_v45 = vpop.f32.mrf.mxu1 }
 0x5f6   : > { %5665 = vst [vmem:[#allocation59_spill] sm:$0xff] %v4776_v45 }
 0x624   : > { %v4778_v9 = vpop.f32.mrf.mxu1 }
 0x625   : > { %5666 = vst [vmem:[#allocation60_spill] sm:$0xff] %v4778_v9 }
 0x626   : > { %v4780_v22 = vpop.f32.mrf.mxu1 }
 0x627   : > { %5667 = vst [vmem:[#allocation61_spill] sm:$0xff] %v4780_v22 }
 0x628   : > { %v4782_v18 = vpop.f32.mrf.mxu1 }
 0x629   : > { %5668 = vst [vmem:[#allocation62_spill] sm:$0xff] %v4782_v18 }
 0x62a   : > { %v4784_v51 = vpop.f32.mrf.mxu1 }
 0x62b   : > { %5669 = vst [vmem:[#allocation63_spill] sm:$0xff] %v4784_v51 }
 0x62c   : > { %v3299_v28 = vpop.f32.mrf.mxu1 }
 0x62d   : > { %v4787_v58 = vadd.f32 %v3299_v28, %v4277_v32 }
 0x62e   : > { %v1723_v19 = vpop.f32.mrf.mxu1 }
 0x62f   : > { %v4790_v40 = vadd.f32 %v1723_v19, %v4280_v35  ;;  %1790 = vmax.xlane.f32.xlu1 %v4787_v58 }
 0x630   : > { %v3300_v41 = vpop.f32.mrf.mxu1 }
 0x631   : > { %v4794_v45 = vadd.f32 %v3300_v41, %v4286_v38  ;;  %1786 = vmax.xlane.f32.xlu0 %v4790_v40 }
 0x632   : > { %v1726_v9 = vpop.f32.mrf.mxu1 }
 0x633   : > { %1792 = vmax.xlane.f32.xlu1 %v4794_v45  ;;  %v4799_v51 = vadd.f32 %v1726_v9, %v4297_v46 }
 0x634   : > { %v3303_v18 = vpop.f32.mrf.mxu1 }
 0x635   : > { %v4802_v28 = vadd.f32 %v3303_v18, %v4300_v47 }
 0x636   : > { %v1739_v19 = vpop.f32.mrf.mxu1 }
 0x637   : > { %1788 = vmax.xlane.f32.xlu1 %v4799_v51  ;;  %1798 = vmax.xlane.f32.xlu0 %v4802_v28  ;;  %v4807_v41 = vadd.f32 %v1739_v19, %v4310_v55 }
 0x638   : > { %v3304_v22 = vpop.f32.mrf.mxu1 }
 0x639   : > { %v4814_v9 = vadd.f32 %v3304_v22, %v4321_v1 }
 0x63a   : > { %v1742_v52 = vpop.f32.mrf.mxu1 }
 0x63b   : > { %v4810_v10 = vadd.f32 %v1742_v52, %v4315_v60  ;;  %1794 = vmax.xlane.f32.xlu1 %v4807_v41 }
 0x63c   : > { %v3307_v18 = vpop.f32.mrf.mxu1 }
 0x63d   : > { %1796 = vmax.xlane.f32.xlu0 %v4810_v10  ;;  %v4819_v42 = vadd.f32 %v3307_v18, %v4331_v7 }
 0x63e   : > { %v1755_v37 = vpop.f32.mrf.mxu1 }
 0x63f   : > { %1800 = vmax.xlane.f32.xlu1 %v4814_v9  ;;  %v4823_v19 = vadd.f32 %v1755_v37, %v4339_v11 }
 0x640   : > { %v3308_v52 = vpop.f32.mrf.mxu1 }
 0x641   : > { %v4827_v22 = vadd.f32 %v3308_v52, %v4346_v15 }
 0x642   : > { %v1758_v26 = vpop.f32.mrf.mxu1 }
 0x643   : > { %1806 = vmax.xlane.f32.xlu1 %v4819_v42  ;;  %v4831_v27 = vadd.f32 %v1758_v26, %v4353_v20 }
 0x644   : > { %v3311_v37 = vpop.f32.mrf.mxu1 }
 0x645   : > { %v4839_v18 = vadd.f32 %v3311_v37, %v4365_v24  ;;  %v4875_v37 = vpop.permute.xlu1 %2214 }
 0x646   : > { %v1771_v52 = vpop.f32.mrf.mxu1 }
 0x647   : > { %1802 = vmax.xlane.f32.xlu1 %v4823_v19  ;;  %v4843_v4 = vadd.f32 %v1771_v52, %v4371_v29 }
 0x648   : > { %v3312_v26 = vpop.f32.mrf.mxu1 }
 0x649   : > { %v4847_v23 = vadd.f32 %v3312_v26, %v4378_v39 }
 0x64a   : > { %v1774_v63 = vpop.f32.mrf.mxu1 }
 0x64b   : > { %1808 = vmax.xlane.f32.xlu1 %v4827_v22  ;;  %v4851_v17 = vadd.f32 %v1774_v63, %v4386_v48  ;;  %v4871_v63 = vpop.permute.xlu0 %2216 }
 0x64f   : > { %1804 = vmax.xlane.f32.xlu1 %v4831_v27 }
 0x653   : > { %2208 = vrot.lane.b32.xlu0 %v4201_v56, %s3982_s26 }
 0x660   : > { %2210 = vrot.lane.b32.xlu1 %v4211_v0, %s3982_s26 }
 0x672   : > { %1814 = vmax.xlane.f32.xlu0 %v4839_v18 }
 0x676   : > { %1810 = vmax.xlane.f32.xlu0 %v4843_v4 }
 0x67a   : > { %1816 = vmax.xlane.f32.xlu0 %v4847_v23 }
 0x684   : > { %1812 = vmax.xlane.f32.xlu1 %v4851_v17 }
 0x690   : > { %2206 = vrot.lane.b32.xlu0 %v4215_v2, %s3982_s26 }
 0x694   : > { %2188 = vrot.lane.b32.xlu0 %v4191_v34, %s3983_s28 }
 0x695   : > { %2204 = vrot.lane.b32.xlu1 %v4191_v34, %s3982_s26  ;;  %s3887_s26 = scalar_lea.vmem %s3886_s6, 4096 }
 0x696   : > { %p3889_p0 = scmp.lt.s32.totalorder %s3887_s26, %s3881_s16 }
 0x698   : > { %2192 = vrot.lane.b32.xlu0 %v4201_v56, %s3983_s28  ;;  %p3890_p5 = por %p3889_p0, %p3888_p13 }
 0x699   : > { %2190 = vrot.lane.b32.xlu1 %v4215_v2, %s3983_s28 }
 0x69a   : > { %p3891_p10 = pnand %p3890_p5, %p3884_p2 }
 0x69c   : > { %2196 = vrot.lane.b32.xlu0 %v4198_v50, %s3983_s28 }
 0x69d   : > { %2194 = vrot.lane.b32.xlu1 %v4211_v0, %s3983_s28 }
 0x6a0   : > { %2200 = vrot.lane.b32.xlu0 %v4207_v61, %s3983_s28 }
 0x6a1   : > { %2198 = vrot.lane.b32.xlu1 %v4195_v44, %s3983_s28 }
 0x6a4   : > { %2561 = vrot.lane.b32.xlu0 %v4207_v61, %s3984_s30  ;;  %v4878_v61 = vpop.permute.xlu0 %2212 }
 0x6a5   : > { %2202 = vrot.lane.b32.xlu1 %v4203_v57, %s3983_s28 }
 0x6a8   : > { %2557 = vrot.lane.b32.xlu0 %v4198_v50, %s3984_s30 }
 0x6a9   : > { %2563 = vrot.lane.b32.xlu1 %v4203_v57, %s3984_s30 }
 0x6ac   : > { %2553 = vrot.lane.b32.xlu0 %v4201_v56, %s3984_s30 }
 0x6ad   : > { %2559 = vrot.lane.b32.xlu1 %v4195_v44, %s3984_s30 }
 0x6b0   : > { %2549 = vrot.lane.b32.xlu0 %v4191_v34, %s3984_s30 }
 0x6b1   : > { %2555 = vrot.lane.b32.xlu1 %v4211_v0, %s3984_s30 }
 0x6b5   : > { %2551 = vrot.lane.b32.xlu1 %v4215_v2, %s3984_s30 }
 0x6b8   : > { %v1791_v52 = vpop.xlane.xlu1 %1790 }
 0x6b9   : > { %v1820_v44 = vsub.f32 %v4787_v58, %v1791_v52 }
 0x6ba   : > { %v1787_v50 = vpop.xlane.xlu0 %1786 }
 0x6bb   : > { %v1818_v57 = vsub.f32 %v4790_v40, %v1787_v50  ;;  %v1838_v49 = vmul.f32 1.442695, %v1820_v44 }
 0x6bc   : > { %v1793_v26 = vpop.xlane.xlu1 %1792 }
 0x6bd   : > { %v1821_v56 = vsub.f32 %v4794_v45, %v1793_v26  ;;  %v1834_v62 = vmul.f32 1.442695, %v1818_v57 }
 0x6bf   : > { %v1840_v3 = vmul.f32 1.442695, %v1821_v56  ;;  %3609 = vpow2.f32 %v1834_v62 }
 0x6c0   : > { %v1789_v34 = vpop.xlane.xlu1 %1788  ;;  %v1799_v54 = vpop.xlane.xlu0 %1798 }
 0x6c1   : > { %v1819_v0 = vsub.f32 %v4799_v51, %v1789_v34  ;;  %3611 = vpow2.f32 %v1840_v3  ;;  %v1824_v16 = vsub.f32 %v4802_v28, %v1799_v54 }
 0x6c3   : > { %v1836_v2 = vmul.f32 1.442695, %v1819_v0  ;;  %v1846_v52 = vmul.f32 1.442695, %v1824_v16  ;;  %v2266_v0 = vsel %vm547_vm1, %v4749_v14, 0 }
 0x6c4   : > { %v1795_v53 = vpop.xlane.xlu1 %1794 }
 0x6c5   : > { %3613 = vpow2.f32 %v1836_v2  ;;  %v1822_v40 = vsub.f32 %v4807_v41, %v1795_v53 }
 0x6c6   : > { %3615 = vpow2.f32 %v1838_v49  ;;  %v1797_v45 = vpop.xlane.xlu0 %1796 }
 0x6c7   : > { %v1842_v50 = vmul.f32 1.442695, %v1822_v40  ;;  %v1823_v58 = vsub.f32 %v4810_v10, %v1797_v45 }
 0x6c8   : > { %v1801_v57 = vpop.xlane.xlu1 %1800 }
 0x6c9   : > { %v1844_v26 = vmul.f32 1.442695, %v1823_v58  ;;  %v1825_v51 = vsub.f32 %v4814_v9, %v1801_v57  ;;  %3617 = vpow2.f32 %v1842_v50 }
 0x6cb   : > { %3619 = vpow2.f32 %v1844_v26  ;;  %v1848_v62 = vmul.f32 1.442695, %v1825_v51 }
 0x6cc   : > { %3621 = vpow2.f32 %v1846_v52  ;;  %v1807_v3 = vpop.xlane.xlu1 %1806  ;;  %v4888_v54 = vpop.eup %3609 }
 0x6cd   : > { %3623 = vpow2.f32 %v1848_v62  ;;  %v1828_v34 = vsub.f32 %v4819_v42, %v1807_v3 }
 0x6ce   : > { %v4890_v53 = vpop.eup %3611 }
 0x6cf   : > { %v1854_v52 = vmul.f32 1.442695, %v1828_v34 }
 0x6d0   : > { %v1803_v28 = vpop.xlane.xlu1 %1802 }
 0x6d1   : > { %v1826_v16 = vsub.f32 %v4823_v19, %v1803_v28 }
 0x6d2   : > { %v4892_v49 = vpop.eup %3613 }
 0x6d3   : > { %v4894_v41 = vpop.eup %3615  ;;  %v1962_v10 = vpack.c.bf16 %v4892_v49, %v4888_v54  ;;  %v1850_v40 = vmul.f32 1.442695, %v1826_v16 }
 0x6d4   : > { %v1809_v9 = vpop.xlane.xlu1 %1808  ;;  %v1963_v56 = vpack.c.bf16 %v4890_v53, %v4894_v41 }
 0x6d5   : > { %v1829_v44 = vsub.f32 %v4827_v22, %v1809_v9  ;;  %3329 = vmatprep.mubr.bf16.mxu0 %v1962_v10  ;;  %3625 = vpow2.f32 %v1850_v40 }
 0x6d6   : > { %3330 = vmatmul.mubr.bf16.vlgmr.msra.gmra.mxu0 %v1963_v56  ;;  %v4905_v2 = vpop.eup %3617  ;;  %v2209_v56 = vpop.permute.xlu0 %2208 }
 0x6d7   : > { %3346 = vmatpush3.bf16.xpose.msra.mxu0 %v2266_v0  ;;  %v1856_v45 = vmul.f32 1.442695, %v1829_v44  ;;  %v2251_v34 = vsel %vm547_vm1, %v2209_v56, 0 }
 0x6d8   : > { %v4907_v19 = vpop.eup %3619  ;;  %3434 = vmatprep.subr.msk.bf16.mxu0 %vm547_vm1, %v4871_v63  ;;  %v1805_v50 = vpop.xlane.xlu1 %1804 }
 0x6d9   : > { %v4911_v58 = vpop.eup %3621  ;;  %v1827_v22 = vsub.f32 %v4831_v27, %v1805_v50  ;;  %1287 = vadd.xlane.f32.xlu1 %v4664_v43  ;;  %v1964_v14 = vpack.c.bf16 %v4907_v19, %v4905_v2  ;;  %3627 = vpow2.f32 %v1856_v45  ;;  %v2263_v27 = vsel %vm547_vm1, %v4871_v63, 0 }
 0x6da   : > { %v4917_v42 = vpop.eup %3623  ;;  %v2260_v43 = vsel %vm547_vm1, %v4875_v37, 0 }
 0x6db   : > { %v1852_v57 = vmul.f32 1.442695, %v1827_v22  ;;  %3333 = vmatprep.mubr.bf16.mxu0 %v1964_v14  ;;  %v1965_v26 = vpack.c.bf16 %v4917_v42, %v4911_v58 }
 0x6dc   : > { %v2211_v10 = vpop.permute.xlu1 %2210 }
 0x6dd   : > { %3629 = vpow2.f32 %v1852_v57  ;;  %v2254_v9 = vsel %vm547_vm1, %v2211_v10, 0 }
 0x6de   : > { %3631 = vpow2.f32 %v1854_v52  ;;  %3334 = vmatmul.mubr.bf16.gmra.mxu0 %v1965_v26 }
 0x6df   : > { %3348 = vmatpush3.bf16.xpose.msra.mxu0 %v2263_v27 }
 0x6e0   : > { %3435 = vmatprep.subr.msk.bf16.mxu0 %vm547_vm1, %v4875_v37  ;;  %v2257_v37 = vsel %vm547_vm1, %v4878_v61, 0 }
 0x6e2   : > { %v4927_v51 = vpop.eup %3625 }
 0x6e6   : > { %v4931_v62 = vpop.eup %3627 }
 0x6e7   : > { %3350 = vmatpush3.bf16.xpose.msra.mxu0 %v2260_v43 }
 0x6e8   : > { %3436 = vmatprep.subr.msk.bf16.mxu0 %vm547_vm1, %v4878_v61 }
 0x6ea   : > { %v4933_v3 = vpop.eup %3629 }
 0x6eb   : > { %v4935_v28 = vpop.eup %3631  ;;  %v1966_v63 = vpack.c.bf16 %v4933_v3, %v4927_v51 }
 0x6ec   : > { %v1967_v16 = vpack.c.bf16 %v4931_v62, %v4935_v28 }
 0x6ed   : > { %3337 = vmatprep.mubr.bf16.mxu0 %v1966_v63 }
 0x6ee   : > { %3338 = vmatmul.mubr.bf16.gmra.mxu0 %v1967_v16 }
 0x6ef   : > { %3352 = vmatpush3.bf16.xpose.msra.mxu0 %v2257_v37 }
 0x6f0   : > { %3437 = vmatprep.subr.msk.bf16.mxu0 %vm547_vm1, %v2211_v10 }
 0x6f7   : > { %3354 = vmatpush3.bf16.xpose.msra.mxu0 %v2254_v9 }
 0x6f8   : > { %3438 = vmatprep.subr.msk.bf16.mxu0 %vm547_vm1, %v2209_v56 }
 0x6fb   : > { %v1815_v44 = vpop.xlane.xlu0 %1814 }
 0x6fc   : > { %v1832_v14 = vsub.f32 %v4839_v18, %v1815_v44 }
 0x6fe   : > { %v1862_v43 = vmul.f32 1.442695, %v1832_v14 }
 0x6ff   : > { %3356 = vmatpush3.bf16.xpose.msra.mxu0 %v2251_v34  ;;  %v1811_v0 = vpop.xlane.xlu0 %1810 }
 0x700   : > { %v1830_v50 = vsub.f32 %v4843_v4, %v1811_v0 }
 0x702   : > { %v1858_v52 = vmul.f32 1.442695, %v1830_v50 }
 0x703   : > { %v1817_v40 = vpop.xlane.xlu0 %1816 }
 0x704   : > { %v1833_v22 = vsub.f32 %v4847_v23, %v1817_v40  ;;  %3633 = vpow2.f32 %v1858_v52 }
 0x706   : > { %v1864_v57 = vmul.f32 1.442695, %v1833_v22 }
 0x707   : > { %v2207_v45 = vpop.permute.xlu0 %2206 }
 0x708   : > { %3439 = vmatprep.subr.msk.bf16.mxu0 %vm547_vm1, %v2207_v45  ;;  %v2248_v61 = vsel %vm547_vm1, %v2207_v45, 0  ;;  %3635 = vpow2.f32 %v1864_v57 }
 0x709   : > { %3358 = vmatpush3.bf16.xpose.msra.mxu0 %v2248_v61 }
 0x70b   : > { %v2189_v63 = vpop.permute.xlu0 %2188 }
 0x70d   : > { %v1813_v26 = vpop.xlane.xlu1 %1812 }
 0x70e   : > { %v1831_v27 = vsub.f32 %v4851_v17, %v1813_v26 }
 0x70f   : > { %v2193_v23 = vpop.permute.xlu0 %2192 }
 0x710   : > { %v1860_v16 = vmul.f32 1.442695, %v1831_v27 }
 0x711   : > { %v2205_v4 = vpop.permute.xlu1 %2204  ;;  %v4955_v56 = vpop.eup %3633 }
 0x712   : > { %3637 = vpow2.f32 %v1860_v16  ;;  %3440 = vmatprep.subr.msk.bf16.mxu0 %vm547_vm1, %v2205_v4  ;;  %v2245_v37 = vsel %vm547_vm1, %v2205_v4, 0 }
 0x713   : > { %3639 = vpow2.f32 %v1862_v43  ;;  %3360 = vmatpush3.bf16.xpose.msra.mxu0 %v2245_v37  ;;  %v2197_v9 = vpop.permute.xlu0 %2196 }
 0x715   : > { %v2191_v18 = vpop.permute.xlu1 %2190  ;;  %v4957_v44 = vpop.eup %3635 }
 0x717   : > { %v2201_v45 = vpop.permute.xlu0 %2200 }
 0x719   : > { %v2195_v10 = vpop.permute.xlu1 %2194 }
 0x71b   : > { %v2562_v14 = vpop.permute.xlu0 %2561 }
 0x71d   : > { %v2199_v17 = vpop.permute.xlu1 %2198 }
 0x71f   : > { %v4959_v34 = vpop.eup %3637  ;;  %v2558_v57 = vpop.permute.xlu0 %2557 }
 0x720   : > { %v4961_v0 = vpop.eup %3639  ;;  %v1968_v40 = vpack.c.bf16 %v4959_v34, %v4955_v56 }
 0x721   : > { %v2203_v50 = vpop.permute.xlu1 %2202  ;;  %v1969_v61 = vpack.c.bf16 %v4957_v44, %v4961_v0 }
 0x722   : > { %3341 = vmatprep.mubr.bf16.mxu0 %v1968_v40 }
 0x723   : > { %3342 = vmatmul.mubr.bf16.gmra.mxu0 %v1969_v61  ;;  %v2554_v27 = vpop.permute.xlu0 %2553 }
 0x724   : > { %3361 = vmatprep.mubr.msk.bf16.mxu0 %vm547_vm1, %v2189_v63 }
 0x725   : > { %v2564_v22 = vpop.permute.xlu1 %2563 }
 0x726   : > { %3377 = vmatprep.subr.bf16.mxu1 %v2564_v22 }
 0x727   : > { %3378 = vmatpush3.bf16.msra.mxu1 %v2564_v22  ;;  %v2550_v63 = vpop.permute.xlu0 %2549 }
 0x728   : > { %3379 = vmatprep.subr.bf16.mxu1 %v2562_v14 }
 0x729   : > { %v2560_v52 = vpop.permute.xlu1 %2559 }
 0x72b   : > { %3362 = vmatmul.mubr.msk.bf16.vlgmr.msra.gmra.mxu0 %vm547_vm1, %v2191_v18  ;;  %3380 = vmatpush3.bf16.msra.mxu1 %v2562_v14 }
 0x72c   : > { %3365 = vmatprep.mubr.msk.bf16.mxu0 %vm547_vm1, %v2193_v23  ;;  %3381 = vmatprep.subr.bf16.mxu1 %v2560_v52 }
 0x72d   : > { %v2556_v26 = vpop.permute.xlu1 %2555 }
 0x72f   : > { %3382 = vmatpush3.bf16.msra.mxu1 %v2560_v52 }
 0x730   : > { %3383 = vmatprep.subr.bf16.mxu1 %v2558_v57 }
 0x731   : > { %v2552_v43 = vpop.permute.xlu1 %2551 }
 0x733   : > { %3366 = vmatmul.mubr.msk.bf16.gmra.mxu0 %vm547_vm1, %v2195_v10  ;;  %3384 = vmatpush3.bf16.msra.mxu1 %v2558_v57 }
 0x734   : > { %3369 = vmatprep.mubr.msk.bf16.mxu0 %vm547_vm1, %v2197_v9  ;;  %3385 = vmatprep.subr.bf16.mxu1 %v2556_v26 }
 0x737   : > { %3386 = vmatpush3.bf16.msra.mxu1 %v2556_v26 }
 0x738   : > { %3387 = vmatprep.subr.bf16.mxu1 %v2554_v27 }
 0x73b   : > { %3370 = vmatmul.mubr.msk.bf16.gmra.mxu0 %vm547_vm1, %v2199_v17  ;;  %3388 = vmatpush3.bf16.msra.mxu1 %v2554_v27 }
 0x73c   : > { %3373 = vmatprep.mubr.msk.bf16.mxu0 %vm547_vm1, %v2201_v45  ;;  %3389 = vmatprep.subr.bf16.mxu1 %v2552_v43 }
 0x73f   : > { %3390 = vmatpush3.bf16.msra.mxu1 %v2552_v43 }
 0x740   : > { %3391 = vmatprep.subr.bf16.mxu1 %v2550_v63 }
 0x743   : > { %3374 = vmatmul.mubr.msk.bf16.gmra.mxu0 %vm547_vm1, %v2203_v50  ;;  %3392 = vmatpush3.bf16.msra.mxu1 %v2550_v63 }
 0x796   : > { %v4975_v16 = vpop.f32.mrf.mxu0 }
 0x798   : > { %v4977_v4 = vpop.f32.mrf.mxu0 }
 0x79a   : > { %v4979_v37 = vpop.f32.mrf.mxu0 }
 0x79c   : > { %v4981_v23 = vpop.f32.mrf.mxu0 }
 0x79e   : > { %v4983_v18 = vpop.f32.mrf.mxu0 }
 0x7a0   : > { %v4985_v10 = vpop.f32.mrf.mxu0 }
 0x7a2   : > { %v4987_v9 = vpop.f32.mrf.mxu0 }
 0x7a3   : > { %5670 = vst [vmem:[#allocation64_spill] sm:$0xff] %v4987_v9 }
 0x7a4   : > { %v4989_v17 = vpop.f32.mrf.mxu0 }
 0x7a5   : > { %5671 = vst [vmem:[#allocation65_spill] sm:$0xff] %v4989_v17 }
 0x7ae   : > { %v4991_v40 = vpop.f32.mrf.mxu0 }
 0x7af   : > { %5672 = vst [vmem:[#allocation66_spill] sm:$0xff] %v4991_v40 }
 0x7b0   : > { %v4993_v45 = vpop.f32.mrf.mxu0 }
 0x7b1   : > { %5673 = vst [vmem:[#allocation67_spill] sm:$0xff] %v4993_v45 }
 0x7b2   : > { %v4995_v50 = vpop.f32.mrf.mxu0 }
 0x7b3   : > { %5674 = vst [vmem:[#allocation68_spill] sm:$0xff] %v4995_v50 }
 0x7b4   : > { %v4997_v61 = vpop.f32.mrf.mxu0 }
 0x7b5   : > { %5675 = vst [vmem:[#allocation69_spill] sm:$0xff] %v4997_v61 }
 0x7e3   : > { %v4999_v22 = vpop.f32.mrf.mxu0 }
 0x7e4   : > { %5676 = vst [vmem:[#allocation70_spill] sm:$0xff] %v4999_v22 }
 0x7e5   : > { %v5001_v14 = vpop.f32.mrf.mxu0 }
 0x7e6   : > { %5677 = vst [vmem:[#allocation71_spill] sm:$0xff] %v5001_v14 }
 0x7e7   : > { %v5003_v52 = vpop.f32.mrf.mxu0 }
 0x7e8   : > { %5678 = vst [vmem:[#allocation72_spill] sm:$0xff] %v5003_v52 }
 0x7e9   : > { %v5005_v57 = vpop.f32.mrf.mxu0 }
 0x7ea   : > { %5679 = vst [vmem:[#allocation73_spill] sm:$0xff] %v5005_v57 }
 0x7eb   : > { %v3363_v26 = vpop.f32.mrf.mxu0 }
 0x7ec   : > { %v5008_v27 = vadd.f32 %v3363_v26, %v4277_v32 }
 0x7ed   : > { %v2302_v43 = vpop.f32.mrf.mxu0 }
 0x7ee   : > { %2369 = vmax.xlane.f32.xlu0 %v5008_v27  ;;  %v5012_v50 = vadd.f32 %v2302_v43, %v4280_v35 }
 0x7ef   : > { %v3364_v63 = vpop.f32.mrf.mxu0 }
 0x7f0   : > { %v5019_v57 = vadd.f32 %v3364_v63, %v4286_v38 }
 0x7f1   : > { %v2305_v61 = vpop.f32.mrf.mxu0 }
 0x7f2   : > { %v5015_v22 = vadd.f32 %v2305_v61, %v4297_v46  ;;  %2365 = vmax.xlane.f32.xlu0 %v5012_v50 }
 0x7f3   : > { %v3367_v52 = vpop.f32.mrf.mxu0 }
 0x7f4   : > { %2367 = vmax.xlane.f32.xlu1 %v5015_v22  ;;  %v5023_v26 = vadd.f32 %v3367_v52, %v4300_v47 }
 0x7f5   : > { %v2318_v32 = vpop.f32.mrf.mxu0 }
 0x7f6   : > { %2371 = vmax.xlane.f32.xlu0 %v5019_v57  ;;  %v5031_v61 = vadd.f32 %v2318_v32, %v4310_v55 }
 0x7f7   : > { %v3368_v35 = vpop.f32.mrf.mxu0 }
 0x7f8   : > { %v5027_v43 = vadd.f32 %v3368_v35, %v4321_v1  ;;  %2377 = vmax.xlane.f32.xlu1 %v5023_v26 }
 0x7f9   : > { %v2321_v46 = vpop.f32.mrf.mxu0 }
 0x7fa   : > { %2379 = vmax.xlane.f32.xlu0 %v5027_v43  ;;  %v5035_v63 = vadd.f32 %v2321_v46, %v4315_v60 }
 0x7fb   : > { %v3371_v38 = vpop.f32.mrf.mxu0 }
 0x7fc   : > { %2373 = vmax.xlane.f32.xlu1 %v5031_v61  ;;  %v5039_v52 = vadd.f32 %v3371_v38, %v4331_v7 }
 0x7fd   : > { %v2334_v47 = vpop.f32.mrf.mxu0 }
 0x7fe   : > { %2375 = vmax.xlane.f32.xlu0 %v5035_v63  ;;  %v5047_v32 = vadd.f32 %v2334_v47, %v4339_v11 }
 0x7ff   : > { %v3372_v1 = vpop.f32.mrf.mxu0 }
 0x800   : > { %v5043_v35 = vadd.f32 %v3372_v1, %v4346_v15  ;;  %2385 = vmax.xlane.f32.xlu1 %v5039_v52 }
 0x801   : > { %v2337_v55 = vpop.f32.mrf.mxu0 }
 0x802   : > { %2387 = vmax.xlane.f32.xlu0 %v5043_v35  ;;  %v5051_v46 = vadd.f32 %v2337_v55, %v4353_v20 }
 0x803   : > { %v3375_v60 = vpop.f32.mrf.mxu0 }
 0x804   : > { %2381 = vmax.xlane.f32.xlu1 %v5047_v32  ;;  %v5055_v38 = vadd.f32 %v3375_v60, %v4365_v24  ;;  %v5680_v24 = vld [vmem:[#allocation47_spill] sm:$0xff] }
 0x805   : > { %v2350_v7 = vpop.f32.mrf.mxu0 }
 0x806   : > { %2383 = vmax.xlane.f32.xlu0 %v5051_v46  ;;  %v5063_v47 = vadd.f32 %v2350_v7, %v4371_v29  ;;  %v5681_v29 = vld [vmem:[#allocation46_spill] sm:$0xff] }
 0x807   : > { %v3376_v15 = vpop.f32.mrf.mxu0 }
 0x808   : > { %v5059_v1 = vadd.f32 %v3376_v15, %v4378_v39  ;;  %2393 = vmax.xlane.f32.xlu1 %v5055_v38  ;;  %v5682_v39 = vld [vmem:[#allocation45_spill] sm:$0xff] }
 0x809   : > { %v2353_v11 = vpop.f32.mrf.mxu0 }
 0x80a   : > { %2395 = vmax.xlane.f32.xlu0 %v5059_v1  ;;  %v5067_v20 = vadd.f32 %v2353_v11, %v4386_v48  ;;  %v5683_v48 = vld [vmem:[#allocation13_spill] sm:$0xff] }
 0x80c   : > { %2389 = vmax.xlane.f32.xlu1 %v5063_v47 }
 0x80e   : > { %2391 = vmax.xlane.f32.xlu0 %v5067_v20 }
 0x810   : > { %1291 = vadd.xlane.f32.xlu1 %v4670_v5  ;;  %v5686_v5 = vld [vmem:[#allocation17_spill] sm:$0xff] }
 0x812   : > { %1289 = vadd.xlane.f32.xlu0 %v4668_v25  ;;  %v5685_v25 = vld [vmem:[#allocation15_spill] sm:$0xff] }
 0x814   : > { %1295 = vadd.xlane.f32.xlu1 %v4681_v13  ;;  %v5687_v13 = vld [vmem:[#allocation14_spill] sm:$0xff] }
 0x816   : > { %1293 = vadd.xlane.f32.xlu0 %v4666_v31  ;;  %v5684_v31 = vld [vmem:[#allocation16_spill] sm:$0xff] }
 0x818   : > { %1299 = vadd.xlane.f32.xlu1 %v4687_v12  ;;  %v5688_v12 = vld [vmem:[#allocation19_spill] sm:$0xff] }
 0x81a   : > { %1297 = vadd.xlane.f32.xlu0 %v4683_v30  ;;  %v1288_v30 = vpop.xlane.xlu1 %1287 }
 0x81b   : > { %3641 = vrcp.f32 %v1288_v30 }
 0x81c   : > { %1303 = vadd.xlane.f32.xlu1 %v4702_v33  ;;  %v5690_v33 = vld [vmem:[#allocation21_spill] sm:$0xff] }
 0x81e   : > { %1301 = vadd.xlane.f32.xlu0 %v4692_v21  ;;  %v5689_v21 = vld [vmem:[#allocation18_spill] sm:$0xff] }
 0x820   : > { %1307 = vadd.xlane.f32.xlu1 %v4710_v8  ;;  %v5693_v8 = vld [vmem:[#allocation23_spill] sm:$0xff] }
 0x822   : > { %1305 = vadd.xlane.f32.xlu0 %v4708_v6  ;;  %v5692_v6 = vld [vmem:[#allocation24_spill] sm:$0xff] }
 0x824   : > { %1311 = vadd.xlane.f32.xlu1 %v4730_v36  ;;  %v5694_v36 = vld [vmem:[#allocation25_spill] sm:$0xff] }
 0x826   : > { %1309 = vadd.xlane.f32.xlu0 %v4706_v59  ;;  %v5691_v59 = vld [vmem:[#allocation20_spill] sm:$0xff] }
 0x828   : > { %1315 = vadd.xlane.f32.xlu1 %v5680_v24 }
 0x82a   : > { %1313 = vadd.xlane.f32.xlu0 %v5681_v29 }
 0x82c   : > { %1866 = vadd.xlane.f32.xlu1 %v4888_v54  ;;  %v5695_v54 = vld [vmem:[#allocation22_spill] sm:$0xff] }
 0x82e   : > { %1317 = vadd.xlane.f32.xlu0 %v5682_v39 }
 0x830   : > { %1870 = vadd.xlane.f32.xlu1 %v4894_v41  ;;  %v5697_v41 = vld [vmem:[#allocation27_spill] sm:$0xff] }
 0x832   : > { %1868 = vadd.xlane.f32.xlu0 %v4892_v49  ;;  %v5696_v49 = vld [vmem:[#allocation28_spill] sm:$0xff] }
 0x834   : > { %1874 = vadd.xlane.f32.xlu1 %v4905_v2 }
 0x836   : > { %1872 = vadd.xlane.f32.xlu0 %v4890_v53  ;;  %v3642_v53 = vpop.eup %3641 }
 0x837   : > { %v1335_v2 = vmul.f32 %v3642_v53, %v1288_v30 }
 0x838   : > { %1878 = vadd.xlane.f32.xlu1 %v4911_v58 }
 0x839   : > { %v1351_v58 = vsub.f32 2.0, %v1335_v2 }
 0x83a   : > { %1876 = vadd.xlane.f32.xlu0 %v4907_v19  ;;  %v5698_v19 = vld [vmem:[#allocation26_spill] sm:$0xff] }
 0x83c   : > { %1882 = vadd.xlane.f32.xlu1 %v4927_v51 }
 0x83e   : > { %1880 = vadd.xlane.f32.xlu0 %v4917_v42  ;;  %v1367_v42 = vmul.f32 %v3642_v53, %v1351_v58 }
 0x840   : > { %1886 = vadd.xlane.f32.xlu1 %v4935_v28 }
 0x842   : > { %1884 = vadd.xlane.f32.xlu0 %v4933_v3 }
 0x844   : > { %1890 = vadd.xlane.f32.xlu1 %v4955_v56 }
 0x846   : > { %1888 = vadd.xlane.f32.xlu0 %v4931_v62  ;;  %v5699_v62 = vld [vmem:[#allocation49_spill] sm:$0xff] }
 0x847   : > { %v1512_v3 = vmul.f32 %v5699_v62, %v1367_v42 }
 0x848   : > { %1894 = vadd.xlane.f32.xlu1 %v4961_v0 }
 0x84a   : > { %1892 = vadd.xlane.f32.xlu0 %v4959_v34 }
 0x84c   : > { %773 = vadd.xlane.f32.xlu1 %v5683_v48 }
 0x84e   : > { %1896 = vadd.xlane.f32.xlu0 %v4957_v44 }
 0x850   : > { %777 = vadd.xlane.f32.xlu1 %v5684_v31 }
 0x852   : > { %775 = vadd.xlane.f32.xlu0 %v5685_v25 }
 0x854   : > { %781 = vadd.xlane.f32.xlu1 %v5686_v5 }
 0x856   : > { %779 = vadd.xlane.f32.xlu0 %v5687_v13 }
 0x858   : > { %785 = vadd.xlane.f32.xlu1 %v5688_v12 }
 0x85a   : > { %783 = vadd.xlane.f32.xlu0 %v5689_v21 }
 0x85c   : > { %789 = vadd.xlane.f32.xlu1 %v5690_v33 }
 0x85e   : > { %787 = vadd.xlane.f32.xlu0 %v5691_v59 }
 0x860   : > { %793 = vadd.xlane.f32.xlu1 %v5692_v6 }
 0x862   : > { %791 = vadd.xlane.f32.xlu0 %v5693_v8 }
 0x864   : > { %797 = vadd.xlane.f32.xlu1 %v5694_v36 }
 0x866   : > { %795 = vadd.xlane.f32.xlu0 %v5695_v54 }
 0x868   : > { %801 = vadd.xlane.f32.xlu1 %v5696_v49 }
 0x86a   : > { %799 = vadd.xlane.f32.xlu0 %v5697_v41 }
 0x86e   : > { %803 = vadd.xlane.f32.xlu0 %v5698_v19 }
 0x877   : > { %v2370_v51 = vpop.xlane.xlu0 %2369 }
 0x878   : > { %v2399_v28 = vsub.f32 %v5008_v27, %v2370_v51 }
 0x879   : > { %1544 = vrot.lane.b32.xlu1 %v1512_v3, %s3985_s17 }
 0x87a   : > { %v2417_v60 = vmul.f32 1.442695, %v2399_v28 }
 0x87b   : > { %v2366_v56 = vpop.xlane.xlu0 %2365 }
 0x87c   : > { %v2397_v44 = vsub.f32 %v5012_v50, %v2366_v56 }
 0x87d   : > { %v2368_v34 = vpop.xlane.xlu1 %2367 }
 0x87e   : > { %v2413_v0 = vmul.f32 1.442695, %v2397_v44  ;;  %v2398_v55 = vsub.f32 %v5015_v22, %v2368_v34 }
 0x87f   : > { %v2372_v7 = vpop.xlane.xlu0 %2371 }
 0x880   : > { %v2415_v15 = vmul.f32 1.442695, %v2398_v55  ;;  %v2400_v11 = vsub.f32 %v5019_v57, %v2372_v7  ;;  %3643 = vpow2.f32 %v2413_v0 }
 0x881   : > { %v2378_v24 = vpop.xlane.xlu1 %2377 }
 0x882   : > { %3645 = vpow2.f32 %v2415_v15  ;;  %v2419_v29 = vmul.f32 1.442695, %v2400_v11  ;;  %v2403_v50 = vsub.f32 %v5023_v26, %v2378_v24 }
 0x883   : > { %3647 = vpow2.f32 %v2417_v60  ;;  %v2380_v39 = vpop.xlane.xlu0 %2379 }
 0x884   : > { %3649 = vpow2.f32 %v2419_v29  ;;  %v2404_v27 = vsub.f32 %v5027_v43, %v2380_v39  ;;  %v2425_v57 = vmul.f32 1.442695, %v2403_v50 }
 0x885   : > { %v2374_v48 = vpop.xlane.xlu1 %2373 }
 0x886   : > { %v2427_v31 = vmul.f32 1.442695, %v2404_v27  ;;  %v2401_v22 = vsub.f32 %v5031_v61, %v2374_v48 }
 0x887   : > { %v2376_v25 = vpop.xlane.xlu0 %2375 }
 0x888   : > { %v2421_v5 = vmul.f32 1.442695, %v2401_v22  ;;  %v2402_v13 = vsub.f32 %v5035_v63, %v2376_v25  ;;  %3651 = vpow2.f32 %v2427_v31 }
 0x889   : > { %v2386_v30 = vpop.xlane.xlu1 %2385 }
 0x88a   : > { %v2423_v12 = vmul.f32 1.442695, %v2402_v13  ;;  %3653 = vpow2.f32 %v2421_v5  ;;  %v2407_v26 = vsub.f32 %v5039_v52, %v2386_v30 }
 0x88b   : > { %v2388_v21 = vpop.xlane.xlu0 %2387 }
 0x88c   : > { %3655 = vpow2.f32 %v2423_v12  ;;  %v2408_v33 = vsub.f32 %v5043_v35, %v2388_v21  ;;  %v2433_v52 = vmul.f32 1.442695, %v2407_v26 }
 0x88d   : > { %3657 = vpow2.f32 %v2425_v57  ;;  %v2382_v43 = vpop.xlane.xlu1 %2381  ;;  %v5130_v59 = vpop.eup %3643 }
 0x88e   : > { %v2435_v61 = vmul.f32 1.442695, %v2408_v33  ;;  %v2405_v6 = vsub.f32 %v5047_v32, %v2382_v43 }
 0x88f   : > { %v5133_v8 = vpop.eup %3645  ;;  %v2384_v63 = vpop.xlane.xlu0 %2383 }
 0x890   : > { %v5135_v36 = vpop.eup %3647  ;;  %v2429_v54 = vmul.f32 1.442695, %v2405_v6  ;;  %v2406_v53 = vsub.f32 %v5051_v46, %v2384_v63  ;;  %v2541_v35 = vpack.c.bf16 %v5133_v8, %v5130_v59  ;;  %3659 = vpow2.f32 %v2435_v61 }
 0x891   : > { %v5140_v49 = vpop.eup %3649  ;;  %v2394_v41 = vpop.xlane.xlu1 %2393 }
 0x892   : > { %v2431_v2 = vmul.f32 1.442695, %v2406_v53  ;;  %v2411_v19 = vsub.f32 %v5055_v38, %v2394_v41  ;;  %3393 = vmatprep.mubr.bf16.mxu1 %v2541_v35  ;;  %v2542_v32 = vpack.c.bf16 %v5140_v49, %v5135_v36  ;;  %3661 = vpow2.f32 %v2429_v54 }
 0x893   : > { %v2396_v58 = vpop.xlane.xlu0 %2395 }
 0x894   : > { %3663 = vpow2.f32 %v2431_v2  ;;  %v2441_v42 = vmul.f32 1.442695, %v2411_v19  ;;  %v2412_v46 = vsub.f32 %v5059_v1, %v2396_v58  ;;  %3394 = vmatmul.mubr.bf16.vlgmr.msra.gmra.mxu1 %v2542_v32 }
 0x895   : > { %3665 = vpow2.f32 %v2433_v52  ;;  %v2390_v51 = vpop.xlane.xlu1 %2389  ;;  %v5147_v28 = vpop.eup %3651 }
 0x896   : > { %v2443_v62 = vmul.f32 1.442695, %v2412_v46  ;;  %v2409_v3 = vsub.f32 %v5063_v47, %v2390_v51  ;;  %3667 = vpow2.f32 %v2441_v42 }
 0x897   : > { %v2392_v56 = vpop.xlane.xlu0 %2391  ;;  %v5149_v38 = vpop.eup %3653 }
 0x898   : > { %v2437_v44 = vmul.f32 1.442695, %v2409_v3  ;;  %v2410_v34 = vsub.f32 %v5067_v20, %v2392_v56  ;;  %3669 = vpow2.f32 %v2443_v62  ;;  %v5700_v3 = vld [vmem:[#allocation48_spill] sm:$0xff] }
 0x899   : > { %v5152_v0 = vpop.eup %3655  ;;  %v1292_v55 = vpop.xlane.xlu1 %1291 }
 0x89a   : > { %v5154_v1 = vpop.eup %3657  ;;  %3671 = vpow2.f32 %v2437_v44  ;;  %v2439_v60 = vmul.f32 1.442695, %v2410_v34  ;;  %v2543_v47 = vpack.c.bf16 %v5152_v0, %v5149_v38 }
 0x89b   : > { %3673 = vrcp.f32 %v1292_v55  ;;  %v1290_v7 = vpop.xlane.xlu0 %1289  ;;  %v2544_v15 = vpack.c.bf16 %v5147_v28, %v5154_v1 }
 0x89c   : > { %3675 = vpow2.f32 %v2439_v60  ;;  %3397 = vmatprep.mubr.bf16.mxu1 %v2543_v47 }
 0x89d   : > { %3677 = vrcp.f32 %v1290_v7  ;;  %v1296_v20 = vpop.xlane.xlu1 %1295  ;;  %3398 = vmatmul.mubr.bf16.gmra.mxu1 %v2544_v15  ;;  %v5160_v11 = vpop.eup %3659 }
 0x89e   : > { %3679 = vrcp.f32 %v1296_v20 }
 0x89f   : > { %v1294_v24 = vpop.xlane.xlu0 %1293  ;;  %v5162_v29 = vpop.eup %3661 }
 0x8a0   : > { %3681 = vrcp.f32 %v1294_v24 }
 0x8a1   : > { %v5164_v39 = vpop.eup %3663  ;;  %v1300_v27 = vpop.xlane.xlu1 %1299 }
 0x8a2   : > { %v5166_v50 = vpop.eup %3665  ;;  %3683 = vrcp.f32 %v1300_v27  ;;  %v2545_v48 = vpack.c.bf16 %v5164_v39, %v5162_v29 }
 0x8a3   : > { %v1298_v31 = vpop.xlane.xlu0 %1297  ;;  %v2546_v22 = vpack.c.bf16 %v5160_v11, %v5166_v50  ;;  %v5172_v25 = vpop.eup %3667 }
 0x8a4   : > { %3685 = vrcp.f32 %v1298_v31  ;;  %3401 = vmatprep.mubr.bf16.mxu1 %v2545_v48 }
 0x8a5   : > { %v1304_v5 = vpop.xlane.xlu1 %1303  ;;  %3402 = vmatmul.mubr.bf16.gmra.mxu1 %v2546_v22  ;;  %v5174_v13 = vpop.eup %3669 }
 0x8a6   : > { %3687 = vrcp.f32 %v1304_v5  ;;  %v2548_v35 = vpack.c.bf16 %v5174_v13, %v5172_v25 }
 0x8a7   : > { %v5176_v57 = vpop.eup %3671  ;;  %v1302_v30 = vpop.xlane.xlu0 %1301 }
 0x8a8   : > { %v3674_v12 = vpop.eup %3673  ;;  %3689 = vrcp.f32 %v1302_v30 }
 0x8a9   : > { %v5178_v21 = vpop.eup %3675  ;;  %v1337_v33 = vmul.f32 %v3674_v12, %v1292_v55  ;;  %v1308_v26 = vpop.xlane.xlu1 %1307 }
 0x8aa   : > { %v3678_v43 = vpop.eup %3677  ;;  %3691 = vrcp.f32 %v1308_v26  ;;  %v2547_v61 = vpack.c.bf16 %v5178_v21, %v5176_v57 }
 0x8ab   : > { %v3680_v6 = vpop.eup %3679  ;;  %v1353_v63 = vsub.f32 2.0, %v1337_v33  ;;  %v1336_v54 = vmul.f32 %v3678_v43, %v1290_v7  ;;  %v1306_v53 = vpop.xlane.xlu0 %1305  ;;  %v5701_v7 = vld [vmem:[#allocation51_spill] sm:$0xff] }
 0x8ac   : > { %v1339_v52 = vmul.f32 %v3680_v6, %v1296_v20  ;;  %3693 = vrcp.f32 %v1306_v53  ;;  %3405 = vmatprep.mubr.bf16.mxu1 %v2547_v61 }
 0x8ad   : > { %v3682_v41 = vpop.eup %3681  ;;  %v1369_v2 = vmul.f32 %v3674_v12, %v1353_v63  ;;  %v1352_v19 = vsub.f32 2.0, %v1336_v54  ;;  %v1312_v32 = vpop.xlane.xlu1 %1311  ;;  %3406 = vmatmul.mubr.bf16.gmra.mxu1 %v2548_v35  ;;  %v5703_v35 = vld [vmem:[#allocation50_spill] sm:$0xff] }
 0x8ae   : > { %v1355_v58 = vsub.f32 2.0, %v1339_v52  ;;  %v1338_v42 = vmul.f32 %v3682_v41, %v1294_v24  ;;  %3695 = vrcp.f32 %v1312_v32 }
 0x8af   : > { %v3684_v46 = vpop.eup %3683  ;;  %v1368_v51 = vmul.f32 %v3678_v43, %v1352_v19  ;;  %v1310_v62 = vpop.xlane.xlu0 %1309  ;;  %v1514_v56 = vmul.f32 %v5700_v3, %v1369_v2 }
 0x8b0   : > { %v1354_v44 = vsub.f32 2.0, %v1338_v42  ;;  %v1341_v34 = vmul.f32 %v3684_v46, %v1300_v27  ;;  %3697 = vrcp.f32 %v1310_v62  ;;  %v1371_v60 = vmul.f32 %v3680_v6, %v1355_v58  ;;  %v5702_v6 = vld [vmem:[#allocation53_spill] sm:$0xff] }
 0x8b1   : > { %v3686_v55 = vpop.eup %3685  ;;  %1548 = vrot.lane.b32.xlu1 %v1514_v56, %s3985_s17  ;;  %v5186_v47 = vpop.xlane.xlu1 %1315  ;;  %v1513_v15 = vmul.f32 %v5701_v7, %v1368_v51  ;;  %v5704_v56 = vld [vmem:[#allocation52_spill] sm:$0xff] }
 0x8b2   : > { %v1370_v20 = vmul.f32 %v3682_v41, %v1354_v44  ;;  %v1357_v48 = vsub.f32 2.0, %v1341_v34  ;;  %v1340_v24 = vmul.f32 %v3686_v55, %v1298_v31  ;;  %v1516_v54 = vmul.f32 %v5702_v6, %v1371_v60  ;;  %v5705_v34 = vld [vmem:[#allocation55_spill] sm:$0xff]  ;;  %v5707_v6 = vld [vmem:[#allocation54_spill] sm:$0xff] }
 0x8b3   : > { %v3688_v22 = vpop.eup %3687  ;;  %1546 = vrot.lane.b32.xlu0 %v1513_v15, %s3985_s17  ;;  %v1314_v12 = vpop.xlane.xlu0 %1313 }
 0x8b4   : > { %v1356_v33 = vsub.f32 2.0, %v1340_v24  ;;  %v1343_v43 = vmul.f32 %v3688_v22, %v1304_v5  ;;  %3699 = vrcp.f32 %v1314_v12  ;;  %v1373_v61 = vmul.f32 %v3684_v46, %v1357_v48 }
 0x8b5   : > { %v3690_v27 = vpop.eup %3689  ;;  %v5190_v63 = vpop.xlane.xlu1 %1866  ;;  %v1515_v52 = vmul.f32 %v5703_v35, %v1370_v20 }
 0x8b6   : > { %v1372_v2 = vmul.f32 %v3686_v55, %v1356_v33  ;;  %v1359_v19 = vsub.f32 2.0, %v1343_v43  ;;  %v1342_v41 = vmul.f32 %v3690_v27, %v1302_v30  ;;  %v1518_v44 = vmul.f32 %v5704_v56, %v1373_v61  ;;  %v5706_v43 = vld [vmem:[#allocation57_spill] sm:$0xff] }
 0x8b7   : > { %v3692_v58 = vpop.eup %3691  ;;  %1552 = vrot.lane.b32.xlu0 %v1516_v54, %s3985_s17  ;;  %1550 = vrot.lane.b32.xlu1 %v1515_v52, %s3985_s17  ;;  %v5196_v31 = vpop.xlane.xlu0 %1317 }
 0x8b8   : > { %v1358_v5 = vsub.f32 2.0, %v1342_v41  ;;  %v1345_v42 = vmul.f32 %v3692_v58, %v1308_v26  ;;  %v1375_v46 = vmul.f32 %v3688_v22, %v1359_v19  ;;  %v1517_v60 = vmul.f32 %v5705_v34, %v1372_v2 }
 0x8b9   : > { %v3694_v51 = vpop.eup %3693  ;;  %v5198_v3 = vpop.xlane.xlu1 %1870 }
 0x8ba   : > { %v1374_v55 = vmul.f32 %v3690_v27, %v1358_v5  ;;  %v1361_v7 = vsub.f32 2.0, %v1345_v42  ;;  %v1344_v30 = vmul.f32 %v3694_v51, %v1306_v53  ;;  %v1520_v61 = vmul.f32 %v5706_v43, %v1375_v46  ;;  %v5709_v42 = vld [vmem:[#allocation59_spill] sm:$0xff] }
 0x8bb   : > { %v3696_v15 = vpop.eup %3695  ;;  %1556 = vrot.lane.b32.xlu0 %v1518_v44, %s3985_s17  ;;  %1554 = vrot.lane.b32.xlu1 %v1517_v60, %s3985_s17  ;;  %v5204_v20 = vpop.xlane.xlu0 %1868  ;;  %v5710_v60 = vld [vmem:[#allocation61_spill] sm:$0xff] }
 0x8bc   : > { %v1360_v48 = vsub.f32 2.0, %v1344_v30  ;;  %v1347_v26 = vmul.f32 %v3696_v15, %v1312_v32  ;;  %v1377_v22 = vmul.f32 %v3692_v58, %v1361_v7  ;;  %v1519_v54 = vmul.f32 %v5707_v6, %v1374_v55  ;;  %v5708_v58 = vld [vmem:[#allocation56_spill] sm:$0xff]  ;;  %v5711_v7 = vld [vmem:[#allocation58_spill] sm:$0xff] }
 0x8bd   : > { %v3698_v24 = vpop.eup %3697  ;;  %v5206_v33 = vpop.xlane.xlu1 %1874 }
 0x8be   : > { %v1376_v27 = vmul.f32 %v3694_v51, %v1360_v48  ;;  %v1363_v35 = vsub.f32 2.0, %v1347_v26  ;;  %v1346_v53 = vmul.f32 %v3698_v24, %v1310_v62  ;;  %v1522_v5 = vmul.f32 %v5708_v58, %v1377_v22 }
 0x8bf   : > { %1560 = vrot.lane.b32.xlu0 %v1520_v61, %s3985_s17  ;;  %1558 = vrot.lane.b32.xlu1 %v1519_v54, %s3985_s17  ;;  %v5212_v52 = vpop.xlane.xlu0 %1872 }
 0x8c0   : > { %v1362_v2 = vsub.f32 2.0, %v1346_v53  ;;  %v1379_v32 = vmul.f32 %v3696_v15, %v1363_v35  ;;  %v1521_v46 = vmul.f32 %v5709_v42, %v1376_v27 }
 0x8c1   : > { %v3700_v19 = vpop.eup %3699  ;;  %v5214_v41 = vpop.xlane.xlu1 %1878 }
 0x8c2   : > { %v1378_v56 = vmul.f32 %v3698_v24, %v1362_v2  ;;  %v1348_v44 = vmul.f32 %v3700_v19, %v1314_v12  ;;  %v1524_v55 = vmul.f32 %v5710_v60, %v1379_v32  ;;  %v5712_v12 = vld [vmem:[#allocation63_spill] sm:$0xff] }
 0x8c3   : > { %1564 = vrot.lane.b32.xlu0 %v1522_v5, %s3985_s17  ;;  %1562 = vrot.lane.b32.xlu1 %v1521_v46, %s3985_s17  ;;  %v5220_v62 = vpop.xlane.xlu0 %1876 }
 0x8c4   : > { %v1364_v51 = vsub.f32 2.0, %v1348_v44  ;;  %v1523_v30 = vmul.f32 %v5711_v7, %v1378_v56 }
 0x8c5   : > { %v5222_v34 = vpop.xlane.xlu1 %1882 }
 0x8c6   : > { %v1380_v15 = vmul.f32 %v3700_v19, %v1364_v51 }
 0x8c7   : > { %1568 = vrot.lane.b32.xlu0 %v1524_v55, %s3985_s17  ;;  %1566 = vrot.lane.b32.xlu1 %v1523_v30, %s3985_s17  ;;  %v5228_v48 = vpop.xlane.xlu0 %1880 }
 0x8c8   : > { %v1525_v26 = vmul.f32 %v5712_v12, %v1380_v15  ;;  %v5713_v12 = vld [vmem:[#allocation30_spill] sm:$0xff] }
 0x8c9   : > { %v5231_v24 = vpop.xlane.xlu1 %1886 }
 0x8cb   : > { %1570 = vrot.lane.b32.xlu1 %v1525_v26, %s3985_s17  ;;  %v5234_v22 = vpop.xlane.xlu0 %1884 }
 0x8cd   : > { %v5236_v43 = vpop.xlane.xlu1 %1890 }
 0x8cf   : > { %v5238_v61 = vpop.xlane.xlu0 %1888 }
 0x8d1   : > { %v5240_v6 = vpop.xlane.xlu1 %1894 }
 0x8d3   : > { %v5242_v54 = vpop.xlane.xlu0 %1892 }
 0x8d5   : > { %v774_v27 = vpop.xlane.xlu1 %773 }
 0x8d6   : > { %3701 = vrcp.f32 %v774_v27 }
 0x8d7   : > { %v5244_v35 = vpop.xlane.xlu0 %1896 }
 0x8d9   : > { %v778_v53 = vpop.xlane.xlu1 %777 }
 0x8da   : > { %3703 = vrcp.f32 %v778_v53 }
 0x8db   : > { %v776_v2 = vpop.xlane.xlu0 %775 }
 0x8dc   : > { %3705 = vrcp.f32 %v776_v2 }
 0x8dd   : > { %v782_v19 = vpop.xlane.xlu1 %781 }
 0x8de   : > { %3707 = vrcp.f32 %v782_v19 }
 0x8df   : > { %v780_v32 = vpop.xlane.xlu0 %779 }
 0x8e0   : > { %3709 = vrcp.f32 %v780_v32 }
 0x8e1   : > { %v786_v58 = vpop.xlane.xlu1 %785 }
 0x8e2   : > { %3711 = vrcp.f32 %v786_v58 }
 0x8e3   : > { %v3702_v5 = vpop.eup %3701  ;;  %v784_v42 = vpop.xlane.xlu0 %783 }
 0x8e4   : > { %v821_v46 = vmul.f32 %v3702_v5, %v774_v27  ;;  %3713 = vrcp.f32 %v784_v42 }
 0x8e5   : > { %v790_v56 = vpop.xlane.xlu1 %789 }
 0x8e6   : > { %v837_v44 = vsub.f32 2.0, %v821_v46  ;;  %3715 = vrcp.f32 %v790_v56  ;;  %2451 = vadd.xlane.f32.xlu0 %v5140_v49 }
 0x8e7   : > { %v3704_v51 = vpop.eup %3703  ;;  %v788_v60 = vpop.xlane.xlu0 %787 }
 0x8e8   : > { %v853_v55 = vmul.f32 %v3702_v5, %v837_v44  ;;  %v823_v7 = vmul.f32 %v3704_v51, %v778_v53  ;;  %3717 = vrcp.f32 %v788_v60 }
 0x8e9   : > { %v3706_v30 = vpop.eup %3705  ;;  %v5247_v15 = vpop.xlane.xlu1 %793 }
 0x8ea   : > { %v998_v26 = vmul.f32 %v5713_v12, %v853_v55  ;;  %v839_v14 = vsub.f32 2.0, %v823_v7  ;;  %v822_v40 = vmul.f32 %v3706_v30, %v776_v2  ;;  %2447 = vadd.xlane.f32.xlu0 %v5133_v8  ;;  %3719 = vrcp.f32 %v5247_v15  ;;  %v5714_v55 = vld [vmem:[#allocation29_spill] sm:$0xff] }
 0x8eb   : > { %v3708_v27 = vpop.eup %3707  ;;  %v5252_v46 = vpop.xlane.xlu0 %791 }
 0x8ec   : > { %1014 = vst.msk [vmem:[#allocation2] sm:$0xff] %vm547_vm1, %v998_v26  ;;  %v855_v49 = vmul.f32 %v3704_v51, %v839_v14  ;;  %v838_v5 = vsub.f32 2.0, %v822_v40  ;;  %v825_v53 = vmul.f32 %v3708_v27, %v782_v19  ;;  %3721 = vrcp.f32 %v5252_v46  ;;  %v5715_v40 = vld [vmem:[#allocation32_spill] sm:$0xff] }
 0x8ed   : > { %v3710_v44 = vpop.eup %3709  ;;  %v5256_v9 = vpop.xlane.xlu1 %797 }
 0x8ee   : > { %v1000_v7 = vmul.f32 %v5714_v55, %v855_v49  ;;  %v854_v2 = vmul.f32 %v3706_v30, %v838_v5  ;;  %v841_v12 = vsub.f32 2.0, %v825_v53  ;;  %v824_v8 = vmul.f32 %v3710_v44, %v780_v32  ;;  %2459 = vadd.xlane.f32.xlu0 %v5147_v28  ;;  %v5716_v28 = vld [vmem:[#allocation34_spill] sm:$0xff] }
 0x8ef   : > { %v3712_v45 = vpop.eup %3711  ;;  %3723 = vrcp.f32 %v5256_v9  ;;  %2449 = vadd.xlane.f32.xlu1 %v5135_v36  ;;  %v5262_v14 = vpop.xlane.xlu0 %795 }
 0x8f0   : > { %1016 = vst.msk [vmem:[#allocation2 + $0x10] sm:$0xff] %vm547_vm1, %v1000_v7  ;;  %v999_v19 = vmul.f32 %v5715_v40, %v854_v2  ;;  %v857_v51 = vmul.f32 %v3708_v27, %v841_v12  ;;  %v840_v26 = vsub.f32 2.0, %v824_v8  ;;  %v827_v17 = vmul.f32 %v3712_v45, %v786_v58  ;;  %v5717_v27 = vld [vmem:[#allocation31_spill] sm:$0xff] }
 0x8f1   : > { %v3714_v49 = vpop.eup %3713  ;;  %3725 = vrcp.f32 %v5262_v14  ;;  %v5267_v32 = vpop.xlane.xlu1 %801 }
 0x8f2   : > { %1015 = vst.msk [vmem:[#allocation2 + $0x8] sm:$0xff] %vm547_vm1, %v999_v19  ;;  %v1002_v30 = vmul.f32 %v5716_v28, %v857_v51  ;;  %v856_v5 = vmul.f32 %v3710_v44, %v840_v26  ;;  %v843_v36 = vsub.f32 2.0, %v827_v17  ;;  %v826_v53 = vmul.f32 %v3714_v49, %v784_v42  ;;  %2455 = vadd.xlane.f32.xlu0 %v5152_v0  ;;  %v5718_v0 = vld [vmem:[#allocation33_spill] sm:$0xff] }
 0x8f3   : > { %v3716_v55 = vpop.eup %3715  ;;  %3727 = vrcp.f32 %v5267_v32  ;;  %2445 = vadd.xlane.f32.xlu1 %v5130_v59  ;;  %v5274_v58 = vpop.xlane.xlu0 %799 }
 0x8f4   : > { %1018 = vst.msk [vmem:[#allocation2 + $0x20] sm:$0xff] %vm547_vm1, %v1002_v30  ;;  %v1001_v7 = vmul.f32 %v5717_v27, %v856_v5  ;;  %v859_v2 = vmul.f32 %v3712_v45, %v843_v36  ;;  %v842_v12 = vsub.f32 2.0, %v826_v53  ;;  %v829_v8 = vmul.f32 %v3716_v55, %v790_v56  ;;  %v5719_v56 = vld [vmem:[#allocation36_spill] sm:$0xff] }
 0x8f5   : > { %v3718_v44 = vpop.eup %3717  ;;  %3729 = vrcp.f32 %v5274_v58  ;;  %v1545_v17 = vpop.permute.xlu1 %1544 }
 0x8f6   : > { %1017 = vst.msk [vmem:[#allocation2 + $0x18] sm:$0xff] %vm547_vm1, %v1001_v7  ;;  %v1004_v42 = vmul.f32 %v5718_v0, %v859_v2  ;;  %v858_v40 = vmul.f32 %v3714_v49, %v842_v12  ;;  %v845_v59 = vsub.f32 2.0, %v829_v8  ;;  %v828_v19 = vmul.f32 %v3718_v44, %v788_v60  ;;  %2467 = vadd.xlane.f32.xlu0 %v5160_v11  ;;  %v5720_v60 = vld [vmem:[#allocation38_spill] sm:$0xff] }
 0x8f7   : > { %1593 = vst.msk [vmem:[#allocation2] sm:$0xff] %vm1592_vm2, %v1545_v17  ;;  %2457 = vadd.xlane.f32.xlu1 %v5154_v1  ;;  %v804_v45 = vpop.xlane.xlu0 %803  ;;  %v3720_v51 = vpop.eup %3719 }
 0x8f8   : > { %1020 = vst.msk [vmem:[#allocation2 + $0x30] sm:$0xff] %vm547_vm1, %v1004_v42  ;;  %v1003_v26 = vmul.f32 %v5719_v56, %v858_v40  ;;  %v861_v28 = vmul.f32 %v3716_v55, %v845_v59  ;;  %v844_v30 = vsub.f32 2.0, %v828_v19  ;;  %3731 = vrcp.f32 %v804_v45 }
 0x8f9   : > { %v831_v5 = vmul.f32 %v3720_v51, %v5247_v15  ;;  %v3722_v49 = vpop.eup %3721  ;;  %3733 = vrcp.f32 %v5186_v47  ;;  %v5721_v15 = vld [vmem:[#allocation35_spill] sm:$0xff] }
 0x8fa   : > { %1019 = vst.msk [vmem:[#allocation2 + $0x28] sm:$0xff] %vm547_vm1, %v1003_v26  ;;  %v1006_v11 = vmul.f32 %v5720_v60, %v861_v28  ;;  %v860_v36 = vmul.f32 %v3718_v44, %v844_v30  ;;  %2463 = vadd.xlane.f32.xlu0 %v5164_v39  ;;  %v830_v53 = vmul.f32 %v3722_v49, %v5252_v46  ;;  %3735 = vrcp.f32 %v5190_v63 }
 0x8fb   : > { %v847_v1 = vsub.f32 2.0, %v831_v5  ;;  %2453 = vadd.xlane.f32.xlu1 %v5149_v38  ;;  %3737 = vrcp.f32 %v5196_v31  ;;  %v5722_v38 = vld [vmem:[#allocation37_spill] sm:$0xff] }
 0x8fc   : > { %v3724_v55 = vpop.eup %3723  ;;  %1022 = vst.msk [vmem:[#allocation2 + $0x40] sm:$0xff] %vm547_vm1, %v1006_v11  ;;  %v1005_v27 = vmul.f32 %v5721_v15, %v860_v36  ;;  %v846_v2 = vsub.f32 2.0, %v830_v53  ;;  %3739 = vrcp.f32 %v5198_v3  ;;  %v5726_v11 = vld [vmem:[#allocation41_spill] sm:$0xff]  ;;  %v5727_v53 = vld [vmem:[#allocation44_spill] sm:$0xff] }
 0x8fd   : > { %v863_v7 = vmul.f32 %v3720_v51, %v847_v1  ;;  %v833_v12 = vmul.f32 %v3724_v55, %v5256_v9  ;;  %3741 = vrcp.f32 %v5204_v20  ;;  %v5723_v9 = vld [vmem:[#allocation40_spill] sm:$0xff]  ;;  %v5724_v51 = vld [vmem:[#allocation42_spill] sm:$0xff] }
 0x8fe   : > { %v3726_v8 = vpop.eup %3725  ;;  %1021 = vst.msk [vmem:[#allocation2 + $0x38] sm:$0xff] %vm547_vm1, %v1005_v27  ;;  %2475 = vadd.xlane.f32.xlu0 %v5174_v13  ;;  %v862_v46 = vmul.f32 %v3722_v49, %v846_v2  ;;  %3743 = vrcp.f32 %v5206_v33  ;;  %v5728_v2 = vld [vmem:[#allocation43_spill] sm:$0xff] }
 0x8ff   : > { %v1008_v39 = vmul.f32 %v5722_v38, %v863_v7  ;;  %v849_v44 = vsub.f32 2.0, %v833_v12  ;;  %v832_v17 = vmul.f32 %v3726_v8, %v5262_v14  ;;  %2465 = vadd.xlane.f32.xlu1 %v5166_v50  ;;  %3745 = vrcp.f32 %v5212_v52 }
 0x900   : > { %v3728_v0 = vpop.eup %3727  ;;  %v1007_v42 = vmul.f32 %v5723_v9, %v862_v46  ;;  %3747 = vrcp.f32 %v5214_v41 }
 0x901   : > { %1024 = vst.msk [vmem:[#allocation2 + $0x50] sm:$0xff] %vm547_vm1, %v1008_v39  ;;  %v865_v40 = vmul.f32 %v3724_v55, %v849_v44  ;;  %v848_v59 = vsub.f32 2.0, %v832_v17  ;;  %v835_v19 = vmul.f32 %v3728_v0, %v5267_v32  ;;  %v5725_v32 = vld [vmem:[#allocation39_spill] sm:$0xff]  ;;  %3749 = vrcp.f32 %v5220_v62 }
 0x902   : > { %v3730_v13 = vpop.eup %3729  ;;  %2471 = vadd.xlane.f32.xlu0 %v5178_v21  ;;  %1023 = vst.msk [vmem:[#allocation2 + $0x48] sm:$0xff] %vm547_vm1, %v1007_v42  ;;  %3751 = vrcp.f32 %v5222_v34 }
 0x903   : > { %v1010_v14 = vmul.f32 %v5724_v51, %v865_v40  ;;  %v864_v56 = vmul.f32 %v3726_v8, %v848_v59  ;;  %v851_v50 = vsub.f32 2.0, %v835_v19  ;;  %v834_v26 = vmul.f32 %v3730_v13, %v5274_v58  ;;  %2461 = vadd.xlane.f32.xlu1 %v5162_v29 }
 0x904   : > { %3753 = vrcp.f32 %v5228_v48 }
 0x905   : > { %v3732_v28 = vpop.eup %3731  ;;  %1026 = vst.msk [vmem:[#allocation2 + $0x60] sm:$0xff] %vm547_vm1, %v1010_v14  ;;  %v1009_v30 = vmul.f32 %v5725_v32, %v864_v56  ;;  %v867_v21 = vmul.f32 %v3728_v0, %v851_v50  ;;  %v850_v5 = vsub.f32 2.0, %v834_v26  ;;  %3755 = vrcp.f32 %v5231_v24 }
 0x906   : > { %v836_v49 = vmul.f32 %v3732_v28, %v804_v45  ;;  %v3734_v60 = vpop.eup %3733  ;;  %3757 = vrcp.f32 %v5234_v22 }
 0x907   : > { %1025 = vst.msk [vmem:[#allocation2 + $0x58] sm:$0xff] %vm547_vm1, %v1009_v30  ;;  %v1012_v36 = vmul.f32 %v5726_v11, %v867_v21  ;;  %v866_v58 = vmul.f32 %v3730_v13, %v850_v5  ;;  %2473 = vadd.xlane.f32.xlu1 %v5172_v25  ;;  %v3736_v1 = vpop.eup %3735  ;;  %v1349_v27 = vmul.f32 %v3734_v60, %v5186_v47  ;;  %3759 = vrcp.f32 %v5236_v43  ;;  %v5729_v13 = vld [vmem:[#allocation60_spill] sm:$0xff] }
 0x908   : > { %v852_v29 = vsub.f32 2.0, %v836_v49  ;;  %v3738_v15 = vpop.eup %3737  ;;  %v1914_v25 = vmul.f32 %v3736_v1, %v5190_v63  ;;  %3761 = vrcp.f32 %v5238_v61 }
 0x909   : > { %1028 = vst.msk [vmem:[#allocation2 + $0x70] sm:$0xff] %vm547_vm1, %v1012_v36  ;;  %v1011_v55 = vmul.f32 %v5727_v53, %v866_v58  ;;  %v3740_v7 = vpop.eup %3739  ;;  %v1365_v38 = vsub.f32 2.0, %v1349_v27  ;;  %v1350_v39 = vmul.f32 %v3738_v15, %v5196_v31  ;;  %3763 = vrcp.f32 %v5240_v6 }
 0x90a   : > { %v868_v45 = vmul.f32 %v3732_v28, %v852_v29  ;;  %v3742_v8 = vpop.eup %3741  ;;  %v1930_v47 = vsub.f32 2.0, %v1914_v25  ;;  %v1916_v46 = vmul.f32 %v3740_v7, %v5198_v3  ;;  %3765 = vrcp.f32 %v5242_v54 }
 0x90b   : > { %1027 = vst.msk [vmem:[#allocation2 + $0x68] sm:$0xff] %vm547_vm1, %v1011_v55  ;;  %2469 = vadd.xlane.f32.xlu1 %v5176_v57  ;;  %v3744_v57 = vpop.eup %3743  ;;  %v1915_v63 = vmul.f32 %v3742_v8, %v5204_v20  ;;  %v1381_v17 = vmul.f32 %v3734_v60, %v1365_v38  ;;  %v1366_v0 = vsub.f32 2.0, %v1350_v39  ;;  %3767 = vrcp.f32 %v5244_v35  ;;  %v5731_v38 = vld [vmem:[#allocation65_spill] sm:$0xff] }
 0x90c   : > { %v1013_v12 = vmul.f32 %v5728_v2, %v868_v45  ;;  %v3746_v44 = vpop.eup %3745  ;;  %v1946_v9 = vmul.f32 %v3736_v1, %v1930_v47  ;;  %v1932_v42 = vsub.f32 2.0, %v1916_v46  ;;  %v1918_v40 = vmul.f32 %v3744_v57, %v5206_v33 }
 0x90d   : > { %v1931_v31 = vsub.f32 2.0, %v1915_v63  ;;  %v1917_v59 = vmul.f32 %v3746_v44, %v5212_v52  ;;  %v3748_v3 = vpop.eup %3747  ;;  %v1382_v19 = vmul.f32 %v3738_v15, %v1366_v0  ;;  %v1526_v20 = vmul.f32 %v5729_v13, %v1381_v17  ;;  %v5730_v52 = vld [vmem:[#allocation62_spill] sm:$0xff]  ;;  %v5732_v63 = vld [vmem:[#allocation67_spill] sm:$0xff] }
 0x90e   : > { %1029 = vst.msk [vmem:[#allocation2 + $0x78] sm:$0xff] %vm547_vm1, %v1013_v12  ;;  %v3750_v51 = vpop.eup %3749  ;;  %v2091_v14 = vmul.f32 %v4977_v4, %v1946_v9  ;;  %v1948_v56 = vmul.f32 %v3740_v7, %v1932_v42  ;;  %v1934_v26 = vsub.f32 2.0, %v1918_v40  ;;  %v1920_v30 = vmul.f32 %v3748_v3, %v5214_v41 }
 0x90f   : > { %v1947_v50 = vmul.f32 %v3742_v8, %v1931_v31  ;;  %v1933_v28 = vsub.f32 2.0, %v1917_v59  ;;  %v3752_v33 = vpop.eup %3751  ;;  %v1527_v32 = vmul.f32 %v5730_v52, %v1382_v19  ;;  %v1919_v21 = vmul.f32 %v3750_v51, %v5220_v62  ;;  %v5734_v19 = vld [vmem:[#allocation66_spill] sm:$0xff] }
 0x910   : > { %v2093_v4 = vmul.f32 %v4975_v16, %v1948_v56  ;;  %v1950_v11 = vmul.f32 %v3744_v57, %v1934_v26  ;;  %v1922_v58 = vmul.f32 %v3752_v33, %v5222_v34  ;;  %v1936_v29 = vsub.f32 2.0, %v1920_v30 }
 0x911   : > { %v3754_v5 = vpop.eup %3753  ;;  %v2092_v60 = vmul.f32 %v4981_v23, %v1947_v50  ;;  %v1949_v36 = vmul.f32 %v3746_v44, %v1933_v28  ;;  %v1935_v62 = vsub.f32 2.0, %v1919_v21  ;;  %v5737_v21 = vld [vmem:[#allocation68_spill] sm:$0xff] }
 0x912   : > { %v3756_v49 = vpop.eup %3755  ;;  %v1921_v1 = vmul.f32 %v3754_v5, %v5228_v48  ;;  %v2095_v16 = vmul.f32 %v4985_v10, %v1950_v11  ;;  %v1938_v53 = vsub.f32 2.0, %v1922_v58  ;;  %v1952_v27 = vmul.f32 %v3748_v3, %v1936_v29 }
 0x913   : > { %v3758_v41 = vpop.eup %3757  ;;  %v1924_v23 = vmul.f32 %v3756_v49, %v5231_v24  ;;  %v2094_v34 = vmul.f32 %v4979_v37, %v1949_v36  ;;  %v1951_v45 = vmul.f32 %v3750_v51, %v1935_v62  ;;  %v5738_v36 = vld [vmem:[#allocation70_spill] sm:$0xff] }
 0x914   : > { %v1923_v55 = vmul.f32 %v3758_v41, %v5234_v22  ;;  %v3760_v15 = vpop.eup %3759  ;;  %v1937_v7 = vsub.f32 2.0, %v1921_v1  ;;  %v1954_v10 = vmul.f32 %v3752_v33, %v1938_v53  ;;  %v2097_v37 = vmul.f32 %v4983_v18, %v1952_v27  ;;  %v5733_v18 = vld [vmem:[#allocation64_spill] sm:$0xff]  ;;  %v5736_v33 = vld [vmem:[#allocation71_spill] sm:$0xff] }
 0x915   : > { %v3762_v48 = vpop.eup %3761  ;;  %v1940_v2 = vsub.f32 2.0, %v1924_v23  ;;  %v1926_v24 = vmul.f32 %v3760_v15, %v5236_v43  ;;  %v2096_v39 = vmul.f32 %v5731_v38, %v1951_v45  ;;  %v5740_v53 = vld [vmem:[#allocation72_spill] sm:$0xff] }
 0x916   : > { %v1939_v12 = vsub.f32 2.0, %v1923_v55  ;;  %v3764_v8 = vpop.eup %3763  ;;  %v1953_v47 = vmul.f32 %v3754_v5, %v1937_v7  ;;  %v1925_v46 = vmul.f32 %v3762_v48, %v5238_v61  ;;  %v2099_v44 = vmul.f32 %v5732_v63, %v1954_v10 }
 0x917   : > { %v3766_v57 = vpop.eup %3765  ;;  %v1956_v17 = vmul.f32 %v3756_v49, %v1940_v2  ;;  %v1942_v0 = vsub.f32 2.0, %v1926_v24  ;;  %v1928_v59 = vmul.f32 %v3764_v8, %v5240_v6 }
 0x918   : > { %1572 = vrot.lane.b32.xlu0 %v1526_v20, %s3985_s17  ;;  %v1955_v43 = vmul.f32 %v3758_v41, %v1939_v12  ;;  %v2098_v31 = vmul.f32 %v5733_v18, %v1953_v47  ;;  %v1941_v40 = vsub.f32 2.0, %v1925_v46  ;;  %v1927_v61 = vmul.f32 %v3766_v57, %v5242_v54  ;;  %v3768_v3 = vpop.eup %3767  ;;  %v5735_v20 = vld [vmem:[#allocation69_spill] sm:$0xff] }
 0x919   : > { %v2101_v13 = vmul.f32 %v5734_v19, %v1956_v17  ;;  %v1944_v6 = vsub.f32 2.0, %v1928_v59  ;;  %v1929_v54 = vmul.f32 %v3768_v3, %v5244_v35  ;;  %v5739_v41 = vld [vmem:[#allocation73_spill] sm:$0xff] }
 0x91a   : > { %v2100_v51 = vmul.f32 %v5735_v20, %v1955_v43  ;;  %v1957_v26 = vmul.f32 %v3762_v48, %v1941_v40  ;;  %v1943_v28 = vsub.f32 2.0, %v1927_v61 }
 0x91c   : > { %2123 = vrot.lane.b32.xlu0 %v2091_v14, %s3986_s24  ;;  %1574 = vrot.lane.b32.xlu1 %v1527_v32, %s3985_s17  ;;  %v1958_v14 = vmul.f32 %v3760_v15, %v1942_v0  ;;  %v2102_v5 = vmul.f32 %v5737_v21, %v1957_v26  ;;  %v1959_v49 = vmul.f32 %v3766_v57, %v1943_v28 }
 0x91e   : > { %v2103_v52 = vmul.f32 %v5736_v33, %v1958_v14  ;;  %v2104_v29 = vmul.f32 %v5739_v41, %v1959_v49 }
 0x920   : > { %2127 = vrot.lane.b32.xlu0 %v2093_v4, %s3986_s24  ;;  %2125 = vrot.lane.b32.xlu1 %v2092_v60, %s3986_s24  ;;  %v1960_v4 = vmul.f32 %v3764_v8, %v1944_v6  ;;  %v1945_v60 = vsub.f32 2.0, %v1929_v54 }
 0x922   : > { %v2105_v58 = vmul.f32 %v5738_v36, %v1960_v4  ;;  %v1961_v62 = vmul.f32 %v3768_v3, %v1945_v60 }
 0x923   : > { %v1549_v25 = vpop.permute.xlu1 %1548 }
 0x924   : > { %1595 = vst.msk [vmem:[#allocation2 + $0x10] sm:$0xff] %vm1592_vm2, %v1549_v25  ;;  %2131 = vrot.lane.b32.xlu0 %v2095_v16, %s3986_s24  ;;  %2129 = vrot.lane.b32.xlu1 %v2094_v34, %s3986_s24  ;;  %v2106_v23 = vmul.f32 %v5740_v53, %v1961_v62 }
 0x925   : > { %v1547_v22 = vpop.permute.xlu0 %1546 }
 0x926   : > { %1594 = vst.msk [vmem:[#allocation2 + $0x8] sm:$0xff] %vm1592_vm2, %v1547_v22 }
 0x928   : > { %2135 = vrot.lane.b32.xlu0 %v2097_v37, %s3986_s24  ;;  %2133 = vrot.lane.b32.xlu1 %v2096_v39, %s3986_s24 }
 0x929   : > { %v1551_v9 = vpop.permute.xlu1 %1550  ;;  %v1553_v42 = vpop.permute.xlu0 %1552 }
 0x92a   : > { %1596 = vst.msk [vmem:[#allocation2 + $0x18] sm:$0xff] %vm1592_vm2, %v1551_v9  ;;  %1597 = vst.msk [vmem:[#allocation2 + $0x20] sm:$0xff] %vm1592_vm2, %v1553_v42 }
 0x92c   : > { %2139 = vrot.lane.b32.xlu0 %v2099_v44, %s3986_s24  ;;  %2137 = vrot.lane.b32.xlu1 %v2098_v31, %s3986_s24 }
 0x92d   : > { %v1555_v56 = vpop.permute.xlu1 %1554  ;;  %v1557_v50 = vpop.permute.xlu0 %1556 }
 0x92e   : > { %1598 = vst.msk [vmem:[#allocation2 + $0x28] sm:$0xff] %vm1592_vm2, %v1555_v56  ;;  %1599 = vst.msk [vmem:[#allocation2 + $0x30] sm:$0xff] %vm1592_vm2, %v1557_v50 }
 0x930   : > { %2143 = vrot.lane.b32.xlu0 %v2101_v13, %s3986_s24  ;;  %2141 = vrot.lane.b32.xlu1 %v2100_v51, %s3986_s24 }
 0x931   : > { %v1559_v32 = vpop.permute.xlu1 %1558  ;;  %v1561_v30 = vpop.permute.xlu0 %1560 }
 0x932   : > { %1600 = vst.msk [vmem:[#allocation2 + $0x38] sm:$0xff] %vm1592_vm2, %v1559_v32  ;;  %1601 = vst.msk [vmem:[#allocation2 + $0x40] sm:$0xff] %vm1592_vm2, %v1561_v30 }
 0x934   : > { %2147 = vrot.lane.b32.xlu0 %v2103_v52, %s3986_s24  ;;  %2145 = vrot.lane.b32.xlu1 %v2102_v5, %s3986_s24 }
 0x935   : > { %v1563_v35 = vpop.permute.xlu1 %1562  ;;  %v1565_v11 = vpop.permute.xlu0 %1564 }
 0x936   : > { %1602 = vst.msk [vmem:[#allocation2 + $0x48] sm:$0xff] %vm1592_vm2, %v1563_v35  ;;  %1603 = vst.msk [vmem:[#allocation2 + $0x50] sm:$0xff] %vm1592_vm2, %v1565_v11 }
 0x938   : > { %2151 = vrot.lane.b32.xlu0 %v2105_v58, %s3986_s24  ;;  %2149 = vrot.lane.b32.xlu1 %v2104_v29, %s3986_s24 }
 0x939   : > { %v1567_v1 = vpop.permute.xlu1 %1566  ;;  %v1569_v16 = vpop.permute.xlu0 %1568 }
 0x93a   : > { %1604 = vst.msk [vmem:[#allocation2 + $0x58] sm:$0xff] %vm1592_vm2, %v1567_v1  ;;  %1605 = vst.msk [vmem:[#allocation2 + $0x60] sm:$0xff] %vm1592_vm2, %v1569_v16 }
 0x93c   : > { %2153 = vrot.lane.b32.xlu1 %v2106_v23, %s3986_s24 }
 0x93d   : > { %v1571_v55 = vpop.permute.xlu1 %1570 }
 0x93e   : > { %1606 = vst.msk [vmem:[#allocation2 + $0x68] sm:$0xff] %vm1592_vm2, %v1571_v55 }
 0x954   : > { %v5404_v15 = vpop.f32.mrf.mxu1 }
 0x956   : > { %v5406_v34 = vpop.f32.mrf.mxu1 }
 0x958   : > { %v3396_v27 = vpop.f32.mrf.mxu1 }
 0x95a   : > { %v2610_v45 = vpop.f32.mrf.mxu1 }
 0x95d   : > { %v5408_v48 = vpop.f32.mrf.mxu1 }
 0x95f   : > { %v5410_v10 = vpop.f32.mrf.mxu1 }
 0x961   : > { %v3400_v24 = vpop.f32.mrf.mxu1 }
 0x963   : > { %v2626_v39 = vpop.f32.mrf.mxu1 }
 0x965   : > { %v5412_v43 = vpop.f32.mrf.mxu1 }
 0x967   : > { %v5415_v3 = vpop.f32.mrf.mxu1 }
 0x969   : > { %v3404_v54 = vpop.f32.mrf.mxu1 }
 0x96b   : > { %v2642_v58 = vpop.f32.mrf.mxu1 }
 0x96f   : > { %v2452_v7 = vpop.xlane.xlu0 %2451 }
 0x970   : > { %3769 = vrcp.f32 %v2452_v7 }
 0x973   : > { %v2448_v25 = vpop.xlane.xlu0 %2447 }
 0x974   : > { %3771 = vrcp.f32 %v2448_v25 }
 0x977   : > { %v2460_v2 = vpop.xlane.xlu0 %2459 }
 0x978   : > { %3773 = vrcp.f32 %v2460_v2  ;;  %v2450_v12 = vpop.xlane.xlu1 %2449 }
 0x979   : > { %3775 = vrcp.f32 %v2450_v12 }
 0x97b   : > { %v2456_v22 = vpop.xlane.xlu0 %2455 }
 0x97c   : > { %3777 = vrcp.f32 %v2456_v22  ;;  %v2446_v8 = vpop.xlane.xlu1 %2445 }
 0x97d   : > { %v3770_v37 = vpop.eup %3769  ;;  %3779 = vrcp.f32 %v2446_v8 }
 0x97e   : > { %v2496_v38 = vmul.f32 %v3770_v37, %v2452_v7 }
 0x97f   : > { %v2468_v47 = vpop.xlane.xlu0 %2467 }
 0x980   : > { %v2512_v46 = vsub.f32 2.0, %v2496_v38  ;;  %3781 = vrcp.f32 %v2468_v47  ;;  %v2458_v57 = vpop.xlane.xlu1 %2457 }
 0x981   : > { %v3772_v63 = vpop.eup %3771  ;;  %3783 = vrcp.f32 %v2458_v57 }
 0x982   : > { %v2528_v44 = vmul.f32 %v3770_v37, %v2512_v46  ;;  %v2494_v17 = vmul.f32 %v3772_v63, %v2448_v25  ;;  %v5430_v25 = vpop.f32.mrf.mxu1 }
 0x983   : > { %v2464_v0 = vpop.xlane.xlu0 %2463 }
 0x984   : > { %v2673_v9 = vmul.f32 %v3396_v27, %v2528_v44  ;;  %v2510_v42 = vsub.f32 2.0, %v2494_v17  ;;  %3785 = vrcp.f32 %v2464_v0  ;;  %v2454_v18 = vpop.xlane.xlu1 %2453 }
 0x985   : > { %v3774_v31 = vpop.eup %3773  ;;  %3787 = vrcp.f32 %v2454_v18 }
 0x986   : > { %v3776_v40 = vpop.eup %3775  ;;  %v2526_v59 = vmul.f32 %v3772_v63, %v2510_v42  ;;  %v2500_v61 = vmul.f32 %v3774_v31, %v2460_v2  ;;  %2708 = vrot.lane.b32.xlu1 %v2673_v9, %s3987_s25 }
 0x987   : > { %v2495_v19 = vmul.f32 %v3776_v40, %v2450_v12  ;;  %v5417_v13 = vpop.xlane.xlu0 %2475 }
 0x988   : > { %v2671_v20 = vmul.f32 %v2610_v45, %v2526_v59  ;;  %v2516_v51 = vsub.f32 2.0, %v2500_v61  ;;  %3789 = vrcp.f32 %v5417_v13  ;;  %v2466_v14 = vpop.xlane.xlu1 %2465 }
 0x989   : > { %v3778_v56 = vpop.eup %3777  ;;  %v2511_v50 = vsub.f32 2.0, %v2495_v19  ;;  %3791 = vrcp.f32 %v2466_v14 }
 0x98a   : > { %v3780_v26 = vpop.eup %3779  ;;  %v2532_v6 = vmul.f32 %v3774_v31, %v2516_v51  ;;  %v2498_v28 = vmul.f32 %v3778_v56, %v2456_v22  ;;  %2704 = vrot.lane.b32.xlu1 %v2671_v20, %s3987_s25 }
 0x98b   : > { %v2527_v33 = vmul.f32 %v3776_v40, %v2511_v50  ;;  %v2493_v52 = vmul.f32 %v3780_v26, %v2446_v8  ;;  %v2472_v32 = vpop.xlane.xlu0 %2471 }
 0x98c   : > { %v2677_v30 = vmul.f32 %v3400_v24, %v2532_v6  ;;  %v2514_v21 = vsub.f32 2.0, %v2498_v28  ;;  %3793 = vrcp.f32 %v2472_v32  ;;  %v2462_v5 = vpop.xlane.xlu1 %2461 }
 0x98d   : > { %v3782_v4 = vpop.eup %3781  ;;  %v2672_v49 = vmul.f32 %v5404_v15, %v2527_v33  ;;  %v2509_v60 = vsub.f32 2.0, %v2493_v52  ;;  %3795 = vrcp.f32 %v2462_v5 }
 0x98e   : > { %v3784_v35 = vpop.eup %3783  ;;  %v2530_v11 = vmul.f32 %v3778_v56, %v2514_v21  ;;  %v2504_v36 = vmul.f32 %v3782_v4, %v2468_v47  ;;  %2716 = vrot.lane.b32.xlu1 %v2677_v30, %s3987_s25 }
 0x98f   : > { %v2525_v41 = vmul.f32 %v3780_v26, %v2509_v60  ;;  %v2499_v29 = vmul.f32 %v3784_v35, %v2458_v57  ;;  %2706 = vrot.lane.b32.xlu0 %v2672_v49, %s3987_s25  ;;  %v1573_v62 = vpop.permute.xlu0 %1572  ;;  %v2655_v57 = vpop.f32.mrf.mxu1 }
 0x990   : > { %v2675_v1 = vmul.f32 %v2626_v39, %v2530_v11  ;;  %v2520_v16 = vsub.f32 2.0, %v2504_v36  ;;  %1607 = vst.msk [vmem:[#allocation2 + $0x70] sm:$0xff] %vm1592_vm2, %v1573_v62  ;;  %v5425_v53 = vpop.xlane.xlu1 %2473 }
 0x991   : > { %v3786_v23 = vpop.eup %3785  ;;  %v2670_v55 = vmul.f32 %v5406_v34, %v2525_v41  ;;  %v2515_v15 = vsub.f32 2.0, %v2499_v29  ;;  %3797 = vrcp.f32 %v5425_v53  ;;  %v3408_v61 = vpop.f32.mrf.mxu1 }
 0x992   : > { %v3788_v27 = vpop.eup %3787  ;;  %v2536_v45 = vmul.f32 %v3782_v4, %v2520_v16  ;;  %v2502_v7 = vmul.f32 %v3786_v23, %v2464_v0  ;;  %2712 = vrot.lane.b32.xlu1 %v2675_v1, %s3987_s25 }
 0x993   : > { %v2531_v2 = vmul.f32 %v3784_v35, %v2515_v15  ;;  %v2497_v12 = vmul.f32 %v3788_v27, %v2454_v18  ;;  %2702 = vrot.lane.b32.xlu0 %v2670_v55, %s3987_s25  ;;  %v2124_v24 = vpop.permute.xlu0 %2123  ;;  %v2658_v28 = vpop.f32.mrf.mxu1 }
 0x994   : > { %v2681_v22 = vmul.f32 %v3404_v54, %v2536_v45  ;;  %v2518_v8 = vsub.f32 2.0, %v2502_v7  ;;  %2172 = vst.msk [vmem:[#allocation2] sm:$0xff] %vm2171_vm3, %v2124_v24  ;;  %v2470_v34 = vpop.xlane.xlu1 %2469 }
 0x995   : > { %v3790_v37 = vpop.eup %3789  ;;  %v2676_v38 = vmul.f32 %v5408_v48, %v2531_v2  ;;  %v2513_v39 = vsub.f32 2.0, %v2497_v12  ;;  %3799 = vrcp.f32 %v2470_v34 }
 0x996   : > { %v3792_v47 = vpop.eup %3791  ;;  %v2534_v46 = vmul.f32 %v3786_v23, %v2518_v8  ;;  %2724 = vrot.lane.b32.xlu1 %v2681_v22, %s3987_s25  ;;  %v2508_v9 = vmul.f32 %v3790_v37, %v5417_v13 }
 0x997   : > { %v2529_v63 = vmul.f32 %v3788_v27, %v2513_v39  ;;  %v2503_v44 = vmul.f32 %v3792_v47, %v2466_v14  ;;  %2714 = vrot.lane.b32.xlu0 %v2676_v38, %s3987_s25  ;;  %v2128_v17 = vpop.permute.xlu0 %2127 }
 0x998   : > { %v2679_v0 = vmul.f32 %v2642_v58, %v2534_v46  ;;  %2174 = vst.msk [vmem:[#allocation2 + $0x10] sm:$0xff] %vm2171_vm3, %v2128_v17  ;;  %v1575_v42 = vpop.permute.xlu1 %1574  ;;  %v2524_v13 = vsub.f32 2.0, %v2508_v9 }
 0x999   : > { %v3794_v18 = vpop.eup %3793  ;;  %v2674_v48 = vmul.f32 %v5410_v10, %v2529_v63  ;;  %v2519_v31 = vsub.f32 2.0, %v2503_v44  ;;  %1608 = vst.msk [vmem:[#allocation2 + $0x78] sm:$0xff] %vm1592_vm2, %v1575_v42 }
 0x99a   : > { %v3796_v40 = vpop.eup %3795  ;;  %v2506_v59 = vmul.f32 %v3794_v18, %v2472_v32  ;;  %2720 = vrot.lane.b32.xlu1 %v2679_v0, %s3987_s25  ;;  %v2540_v52 = vmul.f32 %v3790_v37, %v2524_v13 }
 0x99b   : > { %v2535_v19 = vmul.f32 %v3792_v47, %v2519_v31  ;;  %v2501_v20 = vmul.f32 %v3796_v40, %v2462_v5  ;;  %2710 = vrot.lane.b32.xlu0 %v2674_v48, %s3987_s25  ;;  %v2132_v51 = vpop.permute.xlu0 %2131 }
 0x99c   : > { %v2522_v14 = vsub.f32 2.0, %v2506_v59  ;;  %2176 = vst.msk [vmem:[#allocation2 + $0x20] sm:$0xff] %vm2171_vm3, %v2132_v51  ;;  %v2126_v56 = vpop.permute.xlu1 %2125  ;;  %v2685_v60 = vmul.f32 %v3408_v61, %v2540_v52 }
 0x99d   : > { %v2680_v10 = vmul.f32 %v5412_v43, %v2535_v19  ;;  %v2517_v50 = vsub.f32 2.0, %v2501_v20  ;;  %2173 = vst.msk [vmem:[#allocation2 + $0x8] sm:$0xff] %vm2171_vm3, %v2126_v56 }
 0x99e   : > { %v3798_v26 = vpop.eup %3797  ;;  %v2538_v6 = vmul.f32 %v3794_v18, %v2522_v14 }
 0x99f   : > { %v2533_v54 = vmul.f32 %v3796_v40, %v2517_v50  ;;  %2722 = vrot.lane.b32.xlu0 %v2680_v10, %s3987_s25  ;;  %v2136_v33 = vpop.permute.xlu0 %2135  ;;  %v2507_v5 = vmul.f32 %v3798_v26, %v5425_v53 }
 0x9a0   : > { %v2683_v32 = vmul.f32 %v2658_v28, %v2538_v6  ;;  %2178 = vst.msk [vmem:[#allocation2 + $0x30] sm:$0xff] %vm2171_vm3, %v2136_v33  ;;  %v2130_v30 = vpop.permute.xlu1 %2129 }
 0x9a1   : > { %v2678_v21 = vmul.f32 %v5415_v3, %v2533_v54  ;;  %2175 = vst.msk [vmem:[#allocation2 + $0x18] sm:$0xff] %vm2171_vm3, %v2130_v30  ;;  %v2523_v11 = vsub.f32 2.0, %v2507_v5 }
 0x9a2   : > { %v3800_v43 = vpop.eup %3799  ;;  %2728 = vrot.lane.b32.xlu1 %v2683_v32, %s3987_s25 }
 0x9a3   : > { %v2505_v4 = vmul.f32 %v3800_v43, %v2470_v34  ;;  %2718 = vrot.lane.b32.xlu0 %v2678_v21, %s3987_s25  ;;  %v2140_v49 = vpop.permute.xlu0 %2139  ;;  %v2539_v29 = vmul.f32 %v3798_v26, %v2523_v11 }
 0x9a4   : > { %2180 = vst.msk [vmem:[#allocation2 + $0x40] sm:$0xff] %vm2171_vm3, %v2140_v49  ;;  %v2134_v35 = vpop.permute.xlu1 %2133 }
 0x9a5   : > { %v2521_v36 = vsub.f32 2.0, %v2505_v4  ;;  %2177 = vst.msk [vmem:[#allocation2 + $0x28] sm:$0xff] %vm2171_vm3, %v2134_v35  ;;  %v2684_v53 = vmul.f32 %v5430_v25, %v2539_v29 }
 0x9a6   : > { %2732 = vrot.lane.b32.xlu1 %v2685_v60, %s3987_s25 }
 0x9a7   : > { %v2537_v3 = vmul.f32 %v3800_v43, %v2521_v36  ;;  %v2144_v58 = vpop.permute.xlu0 %2143 }
 0x9a8   : > { %2182 = vst.msk [vmem:[#allocation2 + $0x50] sm:$0xff] %vm2171_vm3, %v2144_v58  ;;  %v2138_v41 = vpop.permute.xlu1 %2137 }
 0x9a9   : > { %v2682_v62 = vmul.f32 %v2655_v57, %v2537_v3  ;;  %2179 = vst.msk [vmem:[#allocation2 + $0x38] sm:$0xff] %vm2171_vm3, %v2138_v41 }
 0x9ab   : > { %2726 = vrot.lane.b32.xlu0 %v2682_v62, %s3987_s25  ;;  %v2148_v1 = vpop.permute.xlu0 %2147 }
 0x9ac   : > { %2184 = vst.msk [vmem:[#allocation2 + $0x60] sm:$0xff] %vm2171_vm3, %v2148_v1  ;;  %v2142_v16 = vpop.permute.xlu1 %2141 }
 0x9ad   : > { %2181 = vst.msk [vmem:[#allocation2 + $0x48] sm:$0xff] %vm2171_vm3, %v2142_v16 }
 0x9af   : > { %2730 = vrot.lane.b32.xlu0 %v2684_v53, %s3987_s25  ;;  %v2152_v23 = vpop.permute.xlu0 %2151 }
 0x9b0   : > { %2186 = vst.msk [vmem:[#allocation2 + $0x70] sm:$0xff] %vm2171_vm3, %v2152_v23  ;;  %v2146_v55 = vpop.permute.xlu1 %2145 }
 0x9b1   : > { %2183 = vst.msk [vmem:[#allocation2 + $0x58] sm:$0xff] %vm2171_vm3, %v2146_v55 }
 0x9b4   : > { %v2150_v15 = vpop.permute.xlu1 %2149 }
 0x9b5   : > { %2185 = vst.msk [vmem:[#allocation2 + $0x68] sm:$0xff] %vm2171_vm3, %v2150_v15 }
 0x9b8   : > { %v2154_v27 = vpop.permute.xlu1 %2153 }
 0x9b9   : > { %2187 = vst.msk [vmem:[#allocation2 + $0x78] sm:$0xff] %vm2171_vm3, %v2154_v27 }
 0x9f8   : > { %v2709_v45 = vpop.permute.xlu1 %2708 }
 0x9f9   : > { %2754 = vst.msk [vmem:[#allocation2 + $0x18] sm:$0xff] %vm2750_vm4, %v2709_v45 }
 0x9fc   : > { %v2705_v7 = vpop.permute.xlu1 %2704 }
 0x9fd   : > { %2752 = vst.msk [vmem:[#allocation2 + $0x8] sm:$0xff] %vm2750_vm4, %v2705_v7 }
 0xa00   : > { %v2770_v25 = vld [vmem:[#allocation2 + $0x18] sm:$0xff]  ;;  %v2717_v2 = vpop.permute.xlu1 %2716 }
 0xa01   : > { %2786 = vst.msk [vmem:[%s5471_s27 + $0x18] sm:$0xff] %vm354_vm0, %v2770_v25  ;;  %v2707_v12 = vpop.permute.xlu0 %2706 }
 0xa02   : > { %2758 = vst.msk [vmem:[#allocation2 + $0x38] sm:$0xff] %vm2750_vm4, %v2717_v2  ;;  %2753 = vst.msk [vmem:[#allocation2 + $0x10] sm:$0xff] %vm2750_vm4, %v2707_v12 }
 0xa04   : > { %v2768_v24 = vld [vmem:[#allocation2 + $0x8] sm:$0xff]  ;;  %v2713_v22 = vpop.permute.xlu1 %2712 }
 0xa05   : > { %2784 = vst.msk [vmem:[%s5471_s27 + $0x8] sm:$0xff] %vm354_vm0, %v2768_v24  ;;  %v2703_v8 = vpop.permute.xlu0 %2702 }
 0xa06   : > { %2756 = vst.msk [vmem:[#allocation2 + $0x28] sm:$0xff] %vm2750_vm4, %v2713_v22  ;;  %2751 = vst.msk [vmem:[#allocation2] sm:$0xff] %vm2750_vm4, %v2703_v8 }
 0xa08   : > { %v2725_v37 = vpop.permute.xlu1 %2724 }
 0xa09   : > { %v2774_v34 = vld [vmem:[#allocation2 + $0x38] sm:$0xff]  ;;  %v2769_v38 = vld [vmem:[#allocation2 + $0x10] sm:$0xff]  ;;  %2762 = vst.msk [vmem:[#allocation2 + $0x58] sm:$0xff] %vm2750_vm4, %v2725_v37  ;;  %v2715_v39 = vpop.permute.xlu0 %2714 }
 0xa0a   : > { %2790 = vst.msk [vmem:[%s5471_s27 + $0x38] sm:$0xff] %vm354_vm0, %v2774_v34  ;;  %2785 = vst.msk [vmem:[%s5471_s27 + $0x10] sm:$0xff] %vm354_vm0, %v2769_v38 }
 0xa0b   : > { %2757 = vst.msk [vmem:[#allocation2 + $0x30] sm:$0xff] %vm2750_vm4, %v2715_v39 }
 0xa0c   : > { %v2721_v46 = vpop.permute.xlu1 %2720 }
 0xa0d   : > { %v2772_v47 = vld [vmem:[#allocation2 + $0x28] sm:$0xff]  ;;  %v2767_v57 = vld [vmem:[#allocation2] sm:$0xff]  ;;  %2760 = vst.msk [vmem:[#allocation2 + $0x48] sm:$0xff] %vm2750_vm4, %v2721_v46  ;;  %v2711_v63 = vpop.permute.xlu0 %2710 }
 0xa0e   : > { %2788 = vst.msk [vmem:[%s5471_s27 + $0x28] sm:$0xff] %vm354_vm0, %v2772_v47  ;;  %2783 = vst.msk [vmem:[%s5471_s27] sm:$0xff] %vm354_vm0, %v2767_v57 }
 0xa0f   : > { %2755 = vst.msk [vmem:[#allocation2 + $0x20] sm:$0xff] %vm2750_vm4, %v2711_v63 }
 0xa10   : > { %v2778_v44 = vld [vmem:[#allocation2 + $0x58] sm:$0xff] }
 0xa11   : > { %2794 = vst.msk [vmem:[%s5471_s27 + $0x58] sm:$0xff] %vm354_vm0, %v2778_v44  ;;  %v2723_v0 = vpop.permute.xlu0 %2722 }
 0xa12   : > { %v2773_v17 = vld [vmem:[#allocation2 + $0x30] sm:$0xff]  ;;  %2761 = vst.msk [vmem:[#allocation2 + $0x50] sm:$0xff] %vm2750_vm4, %v2723_v0 }
 0xa13   : > { %2789 = vst.msk [vmem:[%s5471_s27 + $0x30] sm:$0xff] %vm354_vm0, %v2773_v17 }
 0xa14   : > { %v2776_v9 = vld [vmem:[#allocation2 + $0x48] sm:$0xff]  ;;  %v2729_v42 = vpop.permute.xlu1 %2728 }
 0xa15   : > { %2792 = vst.msk [vmem:[%s5471_s27 + $0x48] sm:$0xff] %vm354_vm0, %v2776_v9  ;;  %v2719_v48 = vpop.permute.xlu0 %2718 }
 0xa16   : > { %v2771_v18 = vld [vmem:[#allocation2 + $0x20] sm:$0xff]  ;;  %2764 = vst.msk [vmem:[#allocation2 + $0x68] sm:$0xff] %vm2750_vm4, %v2729_v42  ;;  %2759 = vst.msk [vmem:[#allocation2 + $0x40] sm:$0xff] %vm2750_vm4, %v2719_v48 }
 0xa17   : > { %2787 = vst.msk [vmem:[%s5471_s27 + $0x20] sm:$0xff] %vm354_vm0, %v2771_v18 }
 0xa18   : > { %v2733_v31 = vpop.permute.xlu1 %2732 }
 0xa19   : > { %v2777_v40 = vld [vmem:[#allocation2 + $0x50] sm:$0xff]  ;;  %2766 = vst.msk [vmem:[#allocation2 + $0x78] sm:$0xff] %vm2750_vm4, %v2733_v31 }
 0xa1a   : > { %2793 = vst.msk [vmem:[%s5471_s27 + $0x50] sm:$0xff] %vm354_vm0, %v2777_v40 }
 0xa1d   : > { %v2780_v59 = vld [vmem:[#allocation2 + $0x68] sm:$0xff]  ;;  %v2775_v61 = vld [vmem:[#allocation2 + $0x40] sm:$0xff]  ;;  %v2727_v19 = vpop.permute.xlu0 %2726 }
 0xa1e   : > { %2796 = vst.msk [vmem:[%s5471_s27 + $0x68] sm:$0xff] %vm354_vm0, %v2780_v59  ;;  %2791 = vst.msk [vmem:[%s5471_s27 + $0x40] sm:$0xff] %vm354_vm0, %v2775_v61 }
 0xa1f   : > { %2763 = vst.msk [vmem:[#allocation2 + $0x60] sm:$0xff] %vm2750_vm4, %v2727_v19 }
 0xa20   : > { %v2782_v20 = vld [vmem:[#allocation2 + $0x78] sm:$0xff] }
 0xa21   : > { %2798 = vst.msk [vmem:[%s5471_s27 + $0x78] sm:$0xff] %vm354_vm0, %v2782_v20  ;;  %v2731_v51 = vpop.permute.xlu0 %2730 }
 0xa22   : > { %2765 = vst.msk [vmem:[#allocation2 + $0x70] sm:$0xff] %vm2750_vm4, %v2731_v51 }
 0xa26   : > { %v2779_v13 = vld [vmem:[#allocation2 + $0x60] sm:$0xff] }
 0xa27   : > { %2795 = vst.msk [vmem:[%s5471_s27 + $0x60] sm:$0xff] %vm354_vm0, %v2779_v13 }
 0xa29   : > { %v2781_v14 = vld [vmem:[#allocation2 + $0x70] sm:$0xff] }
 0xa2a   : > { %2797 = vst.msk [vmem:[%s5471_s27 + $0x70] sm:$0xff] %vm354_vm0, %v2781_v14 }
 0xa2b   : > { %3894 = shalt.err (!%p3891_p10)
}
 0xa2c   : > { %s3895_s28 = scalar_lea.hbm %s5522_s10, 2048  ;;  %s3899_s25 = scalar_lea.hbm %s5580_s5, 4096 }
 0xa2d   : > { %p3896_p1 = scmp.ne.s32.totalorder %s5522_s10, %s3895_s28  ;;  %p3900_p12 = scmp.lt.s32.totalorder %s5522_s10, %s5580_s5 }
 0xa2e   : > { %p3901_p3 = scmp.lt.s32.totalorder %s3899_s25, %s3895_s28 }
 0xa2f   : > { %p3897_p4 = pnand %p3896_p1, %p4118_p7 }
 0xa30   : > { %p3902_p8 = por %p3901_p3, %p3900_p12 }
 0xa31   : > { %p3898_p6 = pneg %p3897_p4 }
 0xa33   : > { %p3903_p9 = pnand %p3902_p8, %p3898_p6 }
 0xa35   : > { %3906 = shalt.err (!%p3903_p9)
}
 0xa36   : > { %s3989_s9 = smov 128  }
 0xa37   : > { %3451 = dma.vmem_to_hbm [thread:$0]  (%p4118_p7), %s5524_s11, 2048, %s5522_s10, %s2800_s15, %s3989_s9, %s3989_s9, %s3985_s17  }
 0xa38 PF: > { %s2830_s13 = sand.u32 1, %s3945_s18   ;;  %p5741_p11 = scmp.ne.s32.totalorder %s5609_s29, 0 }
 0xa39   : > { %p5742_p2 = scmp.ge.s32.totalorder %s3965_s23, 2  ;;  %s2831_s16 = scalar_lea.sflag [#allocation5], %s2830_s13 }
 0xa3b   : > { %p3465_p13 = pnand %p5742_p2, %p5741_p11 }
 0xa3d   : > { %p3466_p0 = pneg %p3465_p13 }
 0xa3f   : > { %3940 = dma.done.wait (%p3466_p0), %s2831_s16, 2048  }
 0xa40   : > { %3942 = vsyncadd (%p3466_p0), %s2831_s16, 4294965248  ;;  %s22_s23 = sadd.s32 1, %s3965_s23   ;;  %s5743_s18 = smov %s3949_s19 }
 0xa41   : > { %p19_p5 = scmp.ge.s32.totalorder %s22_s23, 4   ;;  %s5744_s19 = smov %s3953_s20 }
 0xa42   : > { %s5745_s20 = smov %s4127_s14  ;;  %s5746_s21 = smov %s3961_s22 }
 0xa43   : > { %s5747_s22 = smov %s5749_s7  ;;  %21 = sbr.rel (!%p19_p5) target bundleno = 9 (0x9), region = 96 }
 0xa48   :  { %2836 = vsyncpa [#allocation4], 1 }
 0xa49   :  { %2838 = vsyncpa [#allocation4 + $0x1], 1 }
 0xa4a   :  { %2839 = vsyncpa [#allocation7], 1 }
 0xa4b   :  { %2840 = vsyncpa [#allocation5], 1 }
 0xa4c   :  { %2842 = vsyncpa [#allocation5 + $0x1], 1 }

</bundles_post_ra>
